<compile_context>
chip_gen: v7x
topology: tpu7x:2x2x1
jax: 0.10.0
libtpu: 0.0.40
codegen_flags: <defaults>
</compile_context>

<pallas_src>
import functools

import jax
import jax.numpy as jnp
from jax import lax
from jax.experimental import pallas as pl
from jax.experimental.pallas import tpu as pltpu


_COMPILER_PARAMS = pltpu.CompilerParams(
    dimension_semantics=("parallel",),      # batch grid axis -> both TCs on v7x
    vmem_limit_bytes=32 * 1024 * 1024,      # scratch+pipeline need <1 MiB; stay well under v7x 64 MiB
)


def _sigmoid(x):
    # exp rides the EUP; approx=True keeps the reciprocal on the EUP too instead of a
    # Newton-refine chain on the (busier) VALU.  ~1e-3 relative error, covered by the test tol.
    return pl.reciprocal(1.0 + jnp.exp(-x), approx=True)


# ------------------------------ fused Pallas kernel ------------------------------

def _counter_attention_kernel(
        a_ref, p_ref, mask_ref,
        wa_ref, wp_ref, sba_ref, sbp_ref,
        wf1_ref, wf2_ref, sbf1_ref, sbf2_ref,
        fc11_ref, fc12_ref, fc21_ref, fc22_ref,
        out_ref,
        can_a, can_p, cat_scr, slab25, slab9,
        *, Wp, L, M, inv_hw):
    """Whole Counter_attention forward for one image (both directions + SE gates)."""
    C = a_ref.shape[0]
    C3 = 3 * C
    f32 = jnp.float32
    bf16 = jnp.bfloat16
    offs5 = [dy * Wp + dx for dy in range(-2, 3) for dx in range(-2, 3)]   # 25 taps
    offs3 = [dy * Wp + dx for dy in range(-1, 2) for dx in range(-1, 2)]   # 9 taps

    # ---- build bf16 canvases: zero the lane margins every step (parallel-grid safe),
    #      cast each image exactly once. Interior write is 128-aligned, lane-dense. ----
    zc = jnp.zeros((C, M), bf16)
    can_a[:, 0:M] = zc
    can_a[:, M + L:M + L + M] = zc
    can_a[:, M:M + L] = a_ref[...].astype(bf16)
    can_p[:, 0:M] = zc
    can_p[:, M + L:M + L + M] = zc
    can_p[:, M:M + L] = p_ref[...].astype(bf16)
    zm = jnp.zeros((C3, M), bf16)
    cat_scr[:, 0:M] = zm
    cat_scr[:, M + L:M + L + M] = zm

    mask = mask_ref[...]                                     # (1, L) valid-pixel mask

    def canvas_convs(canvas, w_ref, sb_ref):
        # 25 shared shifted-slice taps -> ONE (4C, 25C) x (25C, L) MXU matmul producing
        # the three Multi_Context branch convs (rows 0:3C) and the *other* direction's
        # parallel 3x3 conv (rows 3C:4C) in a single pass.
        for k, d in enumerate(offs5):
            slab25[k * C:(k + 1) * C, :] = canvas[:, M + d:M + d + L]
        sb = sb_ref[...]
        pre = jnp.dot(w_ref[...], slab25[...], preferred_element_type=f32)
        pre = pre * sb[:, 0:1] + sb[:, 1:2]                  # folded conv-bias + BN
        cat = jnp.maximum(pre[0:C3, :], 0.0) * mask          # ReLU branches, masked concat
        sig_conv = _sigmoid(pre[C3:, :])                     # parallel conv -> sigmoid
        return cat, sig_conv

    def mc_conv2(cat, wf_ref, sbf_ref):
        # Multi_Context conv2: 3x3 over the 3C concat as ONE (C, 27C) x (27C, L) matmul.
        cat_scr[:, M:M + L] = cat.astype(bf16)
        for k, d in enumerate(offs3):
            slab9[k * C3:(k + 1) * C3, :] = cat_scr[:, M + d:M + d + L]
        sbf = sbf_ref[...]
        pre = jnp.dot(wf_ref[...], slab9[...], preferred_element_type=f32)
        return _sigmoid(pre * sbf[:, 0:1] + sbf[:, 1:2])

    def se_gate(x, fc1_ref, fc2_ref):
        # Adaptive_Weight squeeze-excite gate.  (C x C/4) is far too small for the MXU,
        # so it is done with VPU broadcasts + cross-lane / cross-sublane reductions.
        avg = jnp.sum(x, axis=-1, keepdims=True) * inv_hw                         # (C, 1)
        h = jnp.maximum(jnp.sum(fc1_ref[...] * avg, axis=0, keepdims=True), 0.0)  # (1, C/4)
        w = jnp.maximum(jnp.sum(h * fc2_ref[...], axis=1, keepdims=True), 0.0)    # (1, 1)
        return _sigmoid(w)

    # assistant canvas: mc1 branches + conv2 (conv2 feeds direction 2).
    cat_a, sig_conv2 = canvas_convs(can_a, wa_ref, sba_ref)
    sig_mc1 = mc_conv2(cat_a, wf1_ref, sbf1_ref)
    # present canvas: mc2 branches + conv1 (conv1 feeds direction 1).
    cat_p, sig_conv1 = canvas_convs(can_p, wp_ref, sbp_ref)

    # direction 1: out1 = present*sig(mc1) + present*sig(conv1) + present
    base_p = p_ref[...]
    out1 = base_p * (sig_mc1 + sig_conv1 + 1.0)
    acc = out1 * se_gate(out1, fc11_ref, fc12_ref)

    # direction 2: out2 = assistant*sig(mc2) + assistant*sig(conv2) + assistant
    sig_mc2 = mc_conv2(cat_p, wf2_ref, sbf2_ref)
    base_a = a_ref[...]
    out2 = base_a * (sig_mc2 + sig_conv2 + 1.0)
    out_ref[...] = acc + out2 * se_gate(out2, fc21_ref, fc22_ref)


# ------------------------------- weight packing ------------------------------------

def _pack_canvas_weights(mc, conv):
    """Fuse the 1x1/3x3/5x5 Multi_Context branch convs and the parallel 3x3 conv that
    share one canvas into a single (4C, 25*C) bf16 matmul weight (tap-major K)."""
    C = mc["c1"]["w"].shape[-1]

    def embed(w_hwio):                      # (k,k,Cin,Cout) HWIO -> (5,5,Cout,Cin), zero-embedded
        k = w_hwio.shape[0]
        o = (5 - k) // 2
        e = jnp.zeros((5, 5, C, C), jnp.float32)
        return e.at[o:o + k, o:o + k].set(jnp.transpose(w_hwio, (0, 1, 3, 2)))

    wb = jnp.concatenate([embed(mc["c1"]["w"]), embed(mc["c3"]["w"]),
                          embed(mc["c5"]["w"]), embed(conv["w"])], axis=2)   # (5,5,4C,C)
    wb = jnp.transpose(wb, (2, 0, 1, 3)).reshape(4 * C, 25 * C)              # (4C, 25C)
    return wb.astype(jnp.bfloat16)


def _pack_canvas_affine(mc, conv):
    """Per-channel folded BN scale|bias for the packed (4C)-row canvas matmul output."""
    scale = jnp.concatenate([mc["c1"]["scale"], mc["c3"]["scale"],
                             mc["c5"]["scale"], conv["scale"]])
    bias = jnp.concatenate([mc["c1"]["bias"], mc["c3"]["bias"],
                            mc["c5"]["bias"], conv["bias"]])
    return jnp.stack([scale, bias], axis=1).astype(jnp.float32)              # (4C, 2)


def _pack_3x3_big(w_hwio):
    """(3,3,Cin,Cout) HWIO -> (Cout, 9*Cin) bf16, tap-major K to match the 9-tap slab."""
    cin, cout = w_hwio.shape[2], w_hwio.shape[3]
    return jnp.transpose(w_hwio, (3, 0, 1, 2)).reshape(cout, 9 * cin).astype(jnp.bfloat16)


# --------------------------------- wrapper ------------------------------------------

def counter_attention_forward(assistant, present, params):
    """assistant, present: (N, C, H, W) float32 NCHW, matching the torch module."""
    N, C, H, W = assistant.shape
    P = 2                                     # widest padding needed (5x5 branch)
    Hp, Wp = H + 2 * P, W + 2 * P
    Lp = Hp * Wp                              # flattened padded image
    L = ((Lp + 127) // 128) * 128             # lane-padded length -> unmasked lane-dense stores
    M = ((2 * Wp + 2 + 127) // 128) * 128     # 128-aligned canvas margin (>= widest tap shift)
    C3 = 3 * C
    C4 = params["ada1"]["fc1"].shape[1]

    def interior(x):                          # pad ring + zero lane tail, kept f32 (exact base)
        xp = jnp.pad(x, ((0, 0), (0, 0), (P, P), (P, P))).reshape(N, C, Lp)
        return jnp.pad(xp, ((0, 0), (0, 0), (0, L - Lp)))

    a_int = interior(assistant)
    p_int = interior(present)

    pos = jnp.arange(L, dtype=jnp.int32)
    row, col = pos // Wp, pos % Wp
    valid = (pos < Lp) & (row >= P) & (row < P + H) & (col >= P) & (col < P + W)
    mask = valid.astype(jnp.float32).reshape(1, L)

    wa = _pack_canvas_weights(params["mc1"], params["conv2"])
    wp = _pack_canvas_weights(params["mc2"], params["conv1"])
    sba = _pack_canvas_affine(params["mc1"], params["conv2"])
    sbp = _pack_canvas_affine(params["mc2"], params["conv1"])
    wf1 = _pack_3x3_big(params["mc1"]["cf"]["w"])
    wf2 = _pack_3x3_big(params["mc2"]["cf"]["w"])
    sbf1 = jnp.stack([params["mc1"]["cf"]["scale"], params["mc1"]["cf"]["bias"]], axis=1)
    sbf2 = jnp.stack([params["mc2"]["cf"]["scale"], params["mc2"]["cf"]["bias"]], axis=1)
    fc11, fc12 = params["ada1"]["fc1"], params["ada1"]["fc2"].reshape(1, C4)
    fc21, fc22 = params["ada2"]["fc1"], params["ada2"]["fc2"].reshape(1, C4)

    def park(shape):                          # small resident parameter block
        return pl.BlockSpec(shape, lambda n: (0,) * len(shape))

    kernel = functools.partial(_counter_attention_kernel,
                               Wp=Wp, L=L, M=M, inv_hw=1.0 / float(H * W))

    out = pl.pallas_call(
        kernel,
        grid=(N,),
        in_specs=[
            pl.BlockSpec((None, C, L), lambda n: (n, 0, 0)),   # assistant interior (f32 base)
            pl.BlockSpec((None, C, L), lambda n: (n, 0, 0)),   # present interior (f32 base)
            park((1, L)),                                      # valid-pixel mask
            park((4 * C, 25 * C)),                             # canvas-a packed conv weights
            park((4 * C, 25 * C)),                             # canvas-p packed conv weights
            park((4 * C, 2)),                                  # canvas-a scale|bias
            park((4 * C, 2)),                                  # canvas-p scale|bias
            park((C, 9 * C3)),                                 # mc1.conv2 packed weights
            park((C, 9 * C3)),                                 # mc2.conv2 packed weights
            park((C, 2)),                                      # mc1.conv2 scale|bias
            park((C, 2)),                                      # mc2.conv2 scale|bias
            park((C, C4)), park((1, C4)),                      # ada_w1 fc1 / fc2
            park((C, C4)), park((1, C4)),                      # ada_w2 fc1 / fc2
        ],
        out_specs=pl.BlockSpec((None, C, L), lambda n: (n, 0, 0)),
        out_shape=jax.ShapeDtypeStruct((N, C, L), jnp.float32),
        scratch_shapes=[
            pltpu.VMEM((C, M + L + M), jnp.bfloat16),          # assistant canvas
            pltpu.VMEM((C, M + L + M), jnp.bfloat16),          # present canvas
            pltpu.VMEM((C3, M + L + M), jnp.bfloat16),         # masked branch-concat canvas
            pltpu.VMEM((25 * C, L), jnp.bfloat16),             # 25-tap slab (both canvases)
            pltpu.VMEM((9 * C3, L), jnp.bfloat16),             # 9-tap slab (both conv2s)
        ],
        compiler_params=_COMPILER_PARAMS,
    )(a_int, p_int, mask, wa, wp, sba, sbp, wf1, wf2, sbf1, sbf2,
      fc11, fc12, fc21, fc22)

    return out[:, :, :Lp].reshape(N, C, Hp, Wp)[:, :, P:P + H, P:P + W]


# ----------------------------- parameter init --------------------------------

def _init_conv_bn(key, k, cin, cout):
    kw, kb, kg, kbe, km, kv = jax.random.split(key, 6)
    fan_in = float(k * k * cin)
    w = jax.random.normal(kw, (k, k, cin, cout), jnp.float32) / jnp.sqrt(fan_in)
    conv_b = 0.1 * jax.random.normal(kb, (cout,), jnp.float32)
    gamma = 1.0 + 0.1 * jax.random.normal(kg, (cout,), jnp.float32)
    beta = 0.1 * jax.random.normal(kbe, (cout,), jnp.float32)
    mean = 0.1 * jax.random.normal(km, (cout,), jnp.float32)
    var = 0.5 + jax.random.uniform(kv, (cout,), jnp.float32)
    eps = 1e-5
    scale = gamma / jnp.sqrt(var + eps)
    bias = (conv_b - mean) * scale + beta          # fold conv bias + eval-mode BN
    return {"w": w, "scale": scale, "bias": bias}


def init_params(key, C):
    keys = jax.random.split(key, 6)

    def mc(k):
        k1, k2, k3, k4 = jax.random.split(k, 4)
        return {"c1": _init_conv_bn(k1, 1, C, C),
                "c3": _init_conv_bn(k2, 3, C, C),
                "c5": _init_conv_bn(k3, 5, C, C),
                "cf": _init_conv_bn(k4, 3, 3 * C, C)}

    def ada(k):
        k1, k2 = jax.random.split(k, 2)
        return {"fc1": jax.random.normal(k1, (C, C // 4), jnp.float32) / (C ** 0.5),
                "fc2": jax.random.normal(k2, (C // 4, 1), jnp.float32) / ((C // 4) ** 0.5)}

    return {"mc1": mc(keys[0]), "mc2": mc(keys[1]),
            "conv1": _init_conv_bn(keys[2], 3, C, C),
            "conv2": _init_conv_bn(keys[3], 3, C, C),
            "ada1": ada(keys[4]), "ada2": ada(keys[5])}


# -------------------------- pure-JAX reference --------------------------------
# Reference casts conv operands to bf16 (exactly like the kernel's MXU path) so the
# comparison isolates structural bugs rather than bf16-vs-f32 operand rounding.

def _ref_conv_bn(x, w, scale, bias, pad):
    y = lax.conv_general_dilated(
        x.astype(jnp.bfloat16), w.astype(jnp.bfloat16), (1, 1),
        [(pad, pad), (pad, pad)],
        dimension_numbers=("NCHW", "HWIO", "NCHW"),
        preferred_element_type=jnp.float32)
    return y * scale[None, :, None, None] + bias[None, :, None, None]


def _ref_mc(x, p):
    x1 = jax.nn.relu(_ref_conv_bn(x, p["c1"]["w"], p["c1"]["scale"], p["c1"]["bias"], 0))
    x2 = jax.nn.relu(_ref_conv_bn(x, p["c3"]["w"], p["c3"]["scale"], p["c3"]["bias"], 1))
    x3 = jax.nn.relu(_ref_conv_bn(x, p["c5"]["w"], p["c5"]["scale"], p["c5"]["bias"], 2))
    cat = jnp.concatenate([x1, x2, x3], axis=1)
    return _ref_conv_bn(cat, p["cf"]["w"], p["cf"]["scale"], p["cf"]["bias"], 1)


def _ref_ada(x, fc1, fc2):
    avg = jnp.mean(x, axis=(2, 3))
    h = jax.nn.relu(avg @ fc1)
    w = jax.nn.relu(h @ fc2)
    return x * jax.nn.sigmoid(w)[:, :, None, None]


def reference_forward(a, p, params):
    mc1 = _ref_mc(a, params["mc1"])
    pr1 = p * jax.nn.sigmoid(mc1)
    pr2 = p * jax.nn.sigmoid(_ref_conv_bn(p, params["conv1"]["w"],
                                          params["conv1"]["scale"],
                                          params["conv1"]["bias"], 1))
    out1 = pr1 + pr2 + p
    mc2 = _ref_mc(p, params["mc2"])
    as1 = a * jax.nn.sigmoid(mc2)
    as2 = a * jax.nn.sigmoid(_ref_conv_bn(a, params["conv2"]["w"],
                                          params["conv2"]["scale"],
                                          params["conv2"]["bias"], 1))
    out2 = as1 + as2 + a
    return (_ref_ada(out1, params["ada1"]["fc1"], params["ada1"]["fc2"])
            + _ref_ada(out2, params["ada2"]["fc1"], params["ada2"]["fc2"]))


# ---------------------------------- main --------------------------------------

if __name__ == "__main__":
    import numpy as np

    key = jax.random.PRNGKey(0)
    kparams, ka, kp = jax.random.split(key, 3)

    N, C, H, W = 2, 8, 16, 16              # small NCHW shapes, inchannels=8
    params = init_params(kparams, C)
    assistant = jax.random.normal(ka, (N, C, H, W), jnp.float32)
    present = jax.random.normal(kp, (N, C, H, W), jnp.float32)

    fwd = jax.jit(counter_attention_forward)
    out = jax.block_until_ready(fwd(assistant, present, params))
    assert out.shape == (N, C, H, W)

    ref = reference_forward(assistant, present, params)
    # Tolerance covers bf16 MXU operands, differing f32 accumulation order between the
    # fused big-K matmuls and XLA's convs, and the EUP approximate reciprocal (~1e-3)
    # inside the sigmoids; any structural/offset bug would be O(0.1..1).
    np.testing.assert_allclose(np.asarray(out), np.asarray(ref), rtol=2e-2, atol=2e-2)
    print("KERNEL_OK")
</pallas_src>

<mosaic_0001>
module attributes {stable_mosaic.version = 11 : i64} {
  func.func @_counter_attention_kernel(%arg0: i32, %arg1: memref<1x8x512xf32, #tpu.memory_space<vmem>>, %arg2: memref<1x8x512xf32, #tpu.memory_space<vmem>>, %arg3: memref<1x512xf32, #tpu.memory_space<vmem>>, %arg4: memref<32x200xbf16, #tpu.memory_space<vmem>>, %arg5: memref<32x200xbf16, #tpu.memory_space<vmem>>, %arg6: memref<32x2xf32, #tpu.memory_space<vmem>>, %arg7: memref<32x2xf32, #tpu.memory_space<vmem>>, %arg8: memref<8x216xbf16, #tpu.memory_space<vmem>>, %arg9: memref<8x216xbf16, #tpu.memory_space<vmem>>, %arg10: memref<8x2xf32, #tpu.memory_space<vmem>>, %arg11: memref<8x2xf32, #tpu.memory_space<vmem>>, %arg12: memref<8x2xf32, #tpu.memory_space<vmem>>, %arg13: memref<1x2xf32, #tpu.memory_space<vmem>>, %arg14: memref<8x2xf32, #tpu.memory_space<vmem>>, %arg15: memref<1x2xf32, #tpu.memory_space<vmem>>, %arg16: memref<1x8x512xf32, #tpu.memory_space<vmem>>, %arg17: memref<8x768xbf16, #tpu.memory_space<vmem>>, %arg18: memref<8x768xbf16, #tpu.memory_space<vmem>>, %arg19: memref<24x768xbf16, #tpu.memory_space<vmem>>, %arg20: memref<200x512xbf16, #tpu.memory_space<vmem>>, %arg21: memref<216x512xbf16, #tpu.memory_space<vmem>>) attributes {dimension_semantics = [#tpu.dimension_semantics<parallel>], iteration_bounds = array<i64: 2>, scalar_prefetch = 0 : i64, scratch_operands = 5 : i64, tpu.core_type = #tpu.core_type<tc>, window_params = [{transform_indices = @transform_0, window_bounds = array<i64: 1, 8, 512>}, {transform_indices = @transform_1, window_bounds = array<i64: 1, 8, 512>}, {pipeline_mode = #tpu.pipeline_mode<synchronous>, transform_indices = @transform_2, window_bounds = array<i64: 1, 512>}, {pipeline_mode = #tpu.pipeline_mode<synchronous>, transform_indices = @transform_3, window_bounds = array<i64: 32, 200>}, {pipeline_mode = #tpu.pipeline_mode<synchronous>, transform_indices = @transform_4, window_bounds = array<i64: 32, 200>}, {pipeline_mode = #tpu.pipeline_mode<synchronous>, transform_indices = @transform_5, window_bounds = array<i64: 32, 2>}, {pipeline_mode = #tpu.pipeline_mode<synchronous>, transform_indices = @transform_6, window_bounds = array<i64: 32, 2>}, {pipeline_mode = #tpu.pipeline_mode<synchronous>, transform_indices = @transform_7, window_bounds = array<i64: 8, 216>}, {pipeline_mode = #tpu.pipeline_mode<synchronous>, transform_indices = @transform_8, window_bounds = array<i64: 8, 216>}, {pipeline_mode = #tpu.pipeline_mode<synchronous>, transform_indices = @transform_9, window_bounds = array<i64: 8, 2>}, {pipeline_mode = #tpu.pipeline_mode<synchronous>, transform_indices = @transform_10, window_bounds = array<i64: 8, 2>}, {pipeline_mode = #tpu.pipeline_mode<synchronous>, transform_indices = @transform_11, window_bounds = array<i64: 8, 2>}, {pipeline_mode = #tpu.pipeline_mode<synchronous>, transform_indices = @transform_12, window_bounds = array<i64: 1, 2>}, {pipeline_mode = #tpu.pipeline_mode<synchronous>, transform_indices = @transform_13, window_bounds = array<i64: 8, 2>}, {pipeline_mode = #tpu.pipeline_mode<synchronous>, transform_indices = @transform_14, window_bounds = array<i64: 1, 2>}, {transform_indices = @transform_15, window_bounds = array<i64: 1, 8, 512>}]} {
    %cst = arith.constant 0.000000e+00 : bf16
    %0 = vector.broadcast %cst : bf16 to vector<8x128xbf16>
    %c0 = arith.constant 0 : index
    %c0_0 = arith.constant 0 : index
    %1 = vector.load %arg17[%c0, %c0_0] : memref<8x768xbf16, #tpu.memory_space<vmem>>, vector<8x128xbf16>
    tpu.vector_store %arg17[%c0, %c0_0], %0 {strides = array<i32>} : memref<8x768xbf16, #tpu.memory_space<vmem>>, vector<8x128xbf16>,
    %c0_1 = arith.constant 0 : index
    %c640 = arith.constant 640 : index
    %2 = vector.load %arg17[%c0_1, %c640] : memref<8x768xbf16, #tpu.memory_space<vmem>>, vector<8x128xbf16>
    tpu.vector_store %arg17[%c0_1, %c640], %0 {strides = array<i32>} : memref<8x768xbf16, #tpu.memory_space<vmem>>, vector<8x128xbf16>,
    %c0_2 = arith.constant 0 : index
    %c0_3 = arith.constant 0 : index
    %c0_4 = arith.constant 0 : index
    %3 = vector.load %arg1[%c0_2, %c0_3, %c0_4] : memref<1x8x512xf32, #tpu.memory_space<vmem>>, vector<1x8x512xf32>
    %4 = vector.shape_cast %3 : vector<1x8x512xf32> to vector<8x512xf32>
    %5 = arith.truncf %4 : vector<8x512xf32> to vector<8x512xbf16>
    %c0_5 = arith.constant 0 : index
    %c128 = arith.constant 128 : index
    %6 = vector.load %arg17[%c0_5, %c128] : memref<8x768xbf16, #tpu.memory_space<vmem>>, vector<8x512xbf16>
    tpu.vector_store %arg17[%c0_5, %c128], %5 {strides = array<i32>} : memref<8x768xbf16, #tpu.memory_space<vmem>>, vector<8x512xbf16>,
    %c0_6 = arith.constant 0 : index
    %c0_7 = arith.constant 0 : index
    %7 = vector.load %arg18[%c0_6, %c0_7] : memref<8x768xbf16, #tpu.memory_space<vmem>>, vector<8x128xbf16>
    tpu.vector_store %arg18[%c0_6, %c0_7], %0 {strides = array<i32>} : memref<8x768xbf16, #tpu.memory_space<vmem>>, vector<8x128xbf16>,
    %c0_8 = arith.constant 0 : index
    %c640_9 = arith.constant 640 : index
    %8 = vector.load %arg18[%c0_8, %c640_9] : memref<8x768xbf16, #tpu.memory_space<vmem>>, vector<8x128xbf16>
    tpu.vector_store %arg18[%c0_8, %c640_9], %0 {strides = array<i32>} : memref<8x768xbf16, #tpu.memory_space<vmem>>, vector<8x128xbf16>,
    %c0_10 = arith.constant 0 : index
    %c0_11 = arith.constant 0 : index
    %c0_12 = arith.constant 0 : index
    %9 = vector.load %arg2[%c0_10, %c0_11, %c0_12] : memref<1x8x512xf32, #tpu.memory_space<vmem>>, vector<1x8x512xf32>
    %10 = vector.shape_cast %9 : vector<1x8x512xf32> to vector<8x512xf32>
    %11 = arith.truncf %10 : vector<8x512xf32> to vector<8x512xbf16>
    %c0_13 = arith.constant 0 : index
    %c128_14 = arith.constant 128 : index
    %12 = vector.load %arg18[%c0_13, %c128_14] : memref<8x768xbf16, #tpu.memory_space<vmem>>, vector<8x512xbf16>
    tpu.vector_store %arg18[%c0_13, %c128_14], %11 {strides = array<i32>} : memref<8x768xbf16, #tpu.memory_space<vmem>>, vector<8x512xbf16>,
    %cst_15 = arith.constant 0.000000e+00 : bf16
    %13 = vector.broadcast %cst_15 : bf16 to vector<24x128xbf16>
    %c0_16 = arith.constant 0 : index
    %c0_17 = arith.constant 0 : index
    %14 = vector.load %arg19[%c0_16, %c0_17] : memref<24x768xbf16, #tpu.memory_space<vmem>>, vector<24x128xbf16>
    tpu.vector_store %arg19[%c0_16, %c0_17], %13 {strides = array<i32>} : memref<24x768xbf16, #tpu.memory_space<vmem>>, vector<24x128xbf16>,
    %c0_18 = arith.constant 0 : index
    %c640_19 = arith.constant 640 : index
    %15 = vector.load %arg19[%c0_18, %c640_19] : memref<24x768xbf16, #tpu.memory_space<vmem>>, vector<24x128xbf16>
    tpu.vector_store %arg19[%c0_18, %c640_19], %13 {strides = array<i32>} : memref<24x768xbf16, #tpu.memory_space<vmem>>, vector<24x128xbf16>,
    %c0_20 = arith.constant 0 : index
    %c0_21 = arith.constant 0 : index
    %16 = vector.load %arg3[%c0_20, %c0_21] : memref<1x512xf32, #tpu.memory_space<vmem>>, vector<1x512xf32>
    %c0_22 = arith.constant 0 : index
    %c86 = arith.constant 86 : index
    %17 = vector.load %arg17[%c0_22, %c86] : memref<8x768xbf16, #tpu.memory_space<vmem>>, vector<8x512xbf16>
    %c0_23 = arith.constant 0 : index
    %c0_24 = arith.constant 0 : index
    %18 = vector.load %arg20[%c0_23, %c0_24] : memref<200x512xbf16, #tpu.memory_space<vmem>>, vector<8x512xbf16>
    tpu.vector_store %arg20[%c0_23, %c0_24], %17 {strides = array<i32>} : memref<200x512xbf16, #tpu.memory_space<vmem>>, vector<8x512xbf16>,
    %c0_25 = arith.constant 0 : index
    %c87 = arith.constant 87 : index
    %19 = vector.load %arg17[%c0_25, %c87] : memref<8x768xbf16, #tpu.memory_space<vmem>>, vector<8x512xbf16>
    %c8 = arith.constant 8 : index
    %c0_26 = arith.constant 0 : index
    %20 = vector.load %arg20[%c8, %c0_26] : memref<200x512xbf16, #tpu.memory_space<vmem>>, vector<8x512xbf16>
    tpu.vector_store %arg20[%c8, %c0_26], %19 {strides = array<i32>} : memref<200x512xbf16, #tpu.memory_space<vmem>>, vector<8x512xbf16>,
    %c0_27 = arith.constant 0 : index
    %c88 = arith.constant 88 : index
    %21 = vector.load %arg17[%c0_27, %c88] : memref<8x768xbf16, #tpu.memory_space<vmem>>, vector<8x512xbf16>
    %c16 = arith.constant 16 : index
    %c0_28 = arith.constant 0 : index
    %22 = vector.load %arg20[%c16, %c0_28] : memref<200x512xbf16, #tpu.memory_space<vmem>>, vector<8x512xbf16>
    tpu.vector_store %arg20[%c16, %c0_28], %21 {strides = array<i32>} : memref<200x512xbf16, #tpu.memory_space<vmem>>, vector<8x512xbf16>,
    %c0_29 = arith.constant 0 : index
    %c89 = arith.constant 89 : index
    %23 = vector.load %arg17[%c0_29, %c89] : memref<8x768xbf16, #tpu.memory_space<vmem>>, vector<8x512xbf16>
    %c24 = arith.constant 24 : index
    %c0_30 = arith.constant 0 : index
    %24 = vector.load %arg20[%c24, %c0_30] : memref<200x512xbf16, #tpu.memory_space<vmem>>, vector<8x512xbf16>
    tpu.vector_store %arg20[%c24, %c0_30], %23 {strides = array<i32>} : memref<200x512xbf16, #tpu.memory_space<vmem>>, vector<8x512xbf16>,
    %c0_31 = arith.constant 0 : index
    %c90 = arith.constant 90 : index
    %25 = vector.load %arg17[%c0_31, %c90] : memref<8x768xbf16, #tpu.memory_space<vmem>>, vector<8x512xbf16>
    %c32 = arith.constant 32 : index
    %c0_32 = arith.constant 0 : index
    %26 = vector.load %arg20[%c32, %c0_32] : memref<200x512xbf16, #tpu.memory_space<vmem>>, vector<8x512xbf16>
    tpu.vector_store %arg20[%c32, %c0_32], %25 {strides = array<i32>} : memref<200x512xbf16, #tpu.memory_space<vmem>>, vector<8x512xbf16>,
    %c0_33 = arith.constant 0 : index
    %c106 = arith.constant 106 : index
    %27 = vector.load %arg17[%c0_33, %c106] : memref<8x768xbf16, #tpu.memory_space<vmem>>, vector<8x512xbf16>
    %c40 = arith.constant 40 : index
    %c0_34 = arith.constant 0 : index
    %28 = vector.load %arg20[%c40, %c0_34] : memref<200x512xbf16, #tpu.memory_space<vmem>>, vector<8x512xbf16>
    tpu.vector_store %arg20[%c40, %c0_34], %27 {strides = array<i32>} : memref<200x512xbf16, #tpu.memory_space<vmem>>, vector<8x512xbf16>,
    %c0_35 = arith.constant 0 : index
    %c107 = arith.constant 107 : index
    %29 = vector.load %arg17[%c0_35, %c107] : memref<8x768xbf16, #tpu.memory_space<vmem>>, vector<8x512xbf16>
    %c48 = arith.constant 48 : index
    %c0_36 = arith.constant 0 : index
    %30 = vector.load %arg20[%c48, %c0_36] : memref<200x512xbf16, #tpu.memory_space<vmem>>, vector<8x512xbf16>
    tpu.vector_store %arg20[%c48, %c0_36], %29 {strides = array<i32>} : memref<200x512xbf16, #tpu.memory_space<vmem>>, vector<8x512xbf16>,
    %c0_37 = arith.constant 0 : index
    %c108 = arith.constant 108 : index
    %31 = vector.load %arg17[%c0_37, %c108] : memref<8x768xbf16, #tpu.memory_space<vmem>>, vector<8x512xbf16>
    %c56 = arith.constant 56 : index
    %c0_38 = arith.constant 0 : index
    %32 = vector.load %arg20[%c56, %c0_38] : memref<200x512xbf16, #tpu.memory_space<vmem>>, vector<8x512xbf16>
    tpu.vector_store %arg20[%c56, %c0_38], %31 {strides = array<i32>} : memref<200x512xbf16, #tpu.memory_space<vmem>>, vector<8x512xbf16>,
    %c0_39 = arith.constant 0 : index
    %c109 = arith.constant 109 : index
    %33 = vector.load %arg17[%c0_39, %c109] : memref<8x768xbf16, #tpu.memory_space<vmem>>, vector<8x512xbf16>
    %c64 = arith.constant 64 : index
    %c0_40 = arith.constant 0 : index
    %34 = vector.load %arg20[%c64, %c0_40] : memref<200x512xbf16, #tpu.memory_space<vmem>>, vector<8x512xbf16>
    tpu.vector_store %arg20[%c64, %c0_40], %33 {strides = array<i32>} : memref<200x512xbf16, #tpu.memory_space<vmem>>, vector<8x512xbf16>,
    %c0_41 = arith.constant 0 : index
    %c110 = arith.constant 110 : index
    %35 = vector.load %arg17[%c0_41, %c110] : memref<8x768xbf16, #tpu.memory_space<vmem>>, vector<8x512xbf16>
    %c72 = arith.constant 72 : index
    %c0_42 = arith.constant 0 : index
    %36 = vector.load %arg20[%c72, %c0_42] : memref<200x512xbf16, #tpu.memory_space<vmem>>, vector<8x512xbf16>
    tpu.vector_store %arg20[%c72, %c0_42], %35 {strides = array<i32>} : memref<200x512xbf16, #tpu.memory_space<vmem>>, vector<8x512xbf16>,
    %c0_43 = arith.constant 0 : index
    %c126 = arith.constant 126 : index
    %37 = vector.load %arg17[%c0_43, %c126] : memref<8x768xbf16, #tpu.memory_space<vmem>>, vector<8x512xbf16>
    %c80 = arith.constant 80 : index
    %c0_44 = arith.constant 0 : index
    %38 = vector.load %arg20[%c80, %c0_44] : memref<200x512xbf16, #tpu.memory_space<vmem>>, vector<8x512xbf16>
    tpu.vector_store %arg20[%c80, %c0_44], %37 {strides = array<i32>} : memref<200x512xbf16, #tpu.memory_space<vmem>>, vector<8x512xbf16>,
    %c0_45 = arith.constant 0 : index
    %c127 = arith.constant 127 : index
    %39 = vector.load %arg17[%c0_45, %c127] : memref<8x768xbf16, #tpu.memory_space<vmem>>, vector<8x512xbf16>
    %c88_46 = arith.constant 88 : index
    %c0_47 = arith.constant 0 : index
    %40 = vector.load %arg20[%c88_46, %c0_47] : memref<200x512xbf16, #tpu.memory_space<vmem>>, vector<8x512xbf16>
    tpu.vector_store %arg20[%c88_46, %c0_47], %39 {strides = array<i32>} : memref<200x512xbf16, #tpu.memory_space<vmem>>, vector<8x512xbf16>,
    %c0_48 = arith.constant 0 : index
    %c128_49 = arith.constant 128 : index
    %41 = vector.load %arg17[%c0_48, %c128_49] : memref<8x768xbf16, #tpu.memory_space<vmem>>, vector<8x512xbf16>
    %c96 = arith.constant 96 : index
    %c0_50 = arith.constant 0 : index
    %42 = vector.load %arg20[%c96, %c0_50] : memref<200x512xbf16, #tpu.memory_space<vmem>>, vector<8x512xbf16>
    tpu.vector_store %arg20[%c96, %c0_50], %41 {strides = array<i32>} : memref<200x512xbf16, #tpu.memory_space<vmem>>, vector<8x512xbf16>,
    %c0_51 = arith.constant 0 : index
    %c129 = arith.constant 129 : index
    %43 = vector.load %arg17[%c0_51, %c129] : memref<8x768xbf16, #tpu.memory_space<vmem>>, vector<8x512xbf16>
    %c104 = arith.constant 104 : index
    %c0_52 = arith.constant 0 : index
    %44 = vector.load %arg20[%c104, %c0_52] : memref<200x512xbf16, #tpu.memory_space<vmem>>, vector<8x512xbf16>
    tpu.vector_store %arg20[%c104, %c0_52], %43 {strides = array<i32>} : memref<200x512xbf16, #tpu.memory_space<vmem>>, vector<8x512xbf16>,
    %c0_53 = arith.constant 0 : index
    %c130 = arith.constant 130 : index
    %45 = vector.load %arg17[%c0_53, %c130] : memref<8x768xbf16, #tpu.memory_space<vmem>>, vector<8x512xbf16>
    %c112 = arith.constant 112 : index
    %c0_54 = arith.constant 0 : index
    %46 = vector.load %arg20[%c112, %c0_54] : memref<200x512xbf16, #tpu.memory_space<vmem>>, vector<8x512xbf16>
    tpu.vector_store %arg20[%c112, %c0_54], %45 {strides = array<i32>} : memref<200x512xbf16, #tpu.memory_space<vmem>>, vector<8x512xbf16>,
    %c0_55 = arith.constant 0 : index
    %c146 = arith.constant 146 : index
    %47 = vector.load %arg17[%c0_55, %c146] : memref<8x768xbf16, #tpu.memory_space<vmem>>, vector<8x512xbf16>
    %c120 = arith.constant 120 : index
    %c0_56 = arith.constant 0 : index
    %48 = vector.load %arg20[%c120, %c0_56] : memref<200x512xbf16, #tpu.memory_space<vmem>>, vector<8x512xbf16>
    tpu.vector_store %arg20[%c120, %c0_56], %47 {strides = array<i32>} : memref<200x512xbf16, #tpu.memory_space<vmem>>, vector<8x512xbf16>,
    %c0_57 = arith.constant 0 : index
    %c147 = arith.constant 147 : index
    %49 = vector.load %arg17[%c0_57, %c147] : memref<8x768xbf16, #tpu.memory_space<vmem>>, vector<8x512xbf16>
    %c128_58 = arith.constant 128 : index
    %c0_59 = arith.constant 0 : index
    %50 = vector.load %arg20[%c128_58, %c0_59] : memref<200x512xbf16, #tpu.memory_space<vmem>>, vector<8x512xbf16>
    tpu.vector_store %arg20[%c128_58, %c0_59], %49 {strides = array<i32>} : memref<200x512xbf16, #tpu.memory_space<vmem>>, vector<8x512xbf16>,
    %c0_60 = arith.constant 0 : index
    %c148 = arith.constant 148 : index
    %51 = vector.load %arg17[%c0_60, %c148] : memref<8x768xbf16, #tpu.memory_space<vmem>>, vector<8x512xbf16>
    %c136 = arith.constant 136 : index
    %c0_61 = arith.constant 0 : index
    %52 = vector.load %arg20[%c136, %c0_61] : memref<200x512xbf16, #tpu.memory_space<vmem>>, vector<8x512xbf16>
    tpu.vector_store %arg20[%c136, %c0_61], %51 {strides = array<i32>} : memref<200x512xbf16, #tpu.memory_space<vmem>>, vector<8x512xbf16>,
    %c0_62 = arith.constant 0 : index
    %c149 = arith.constant 149 : index
    %53 = vector.load %arg17[%c0_62, %c149] : memref<8x768xbf16, #tpu.memory_space<vmem>>, vector<8x512xbf16>
    %c144 = arith.constant 144 : index
    %c0_63 = arith.constant 0 : index
    %54 = vector.load %arg20[%c144, %c0_63] : memref<200x512xbf16, #tpu.memory_space<vmem>>, vector<8x512xbf16>
    tpu.vector_store %arg20[%c144, %c0_63], %53 {strides = array<i32>} : memref<200x512xbf16, #tpu.memory_space<vmem>>, vector<8x512xbf16>,
    %c0_64 = arith.constant 0 : index
    %c150 = arith.constant 150 : index
    %55 = vector.load %arg17[%c0_64, %c150] : memref<8x768xbf16, #tpu.memory_space<vmem>>, vector<8x512xbf16>
    %c152 = arith.constant 152 : index
    %c0_65 = arith.constant 0 : index
    %56 = vector.load %arg20[%c152, %c0_65] : memref<200x512xbf16, #tpu.memory_space<vmem>>, vector<8x512xbf16>
    tpu.vector_store %arg20[%c152, %c0_65], %55 {strides = array<i32>} : memref<200x512xbf16, #tpu.memory_space<vmem>>, vector<8x512xbf16>,
    %c0_66 = arith.constant 0 : index
    %c166 = arith.constant 166 : index
    %57 = vector.load %arg17[%c0_66, %c166] : memref<8x768xbf16, #tpu.memory_space<vmem>>, vector<8x512xbf16>
    %c160 = arith.constant 160 : index
    %c0_67 = arith.constant 0 : index
    %58 = vector.load %arg20[%c160, %c0_67] : memref<200x512xbf16, #tpu.memory_space<vmem>>, vector<8x512xbf16>
    tpu.vector_store %arg20[%c160, %c0_67], %57 {strides = array<i32>} : memref<200x512xbf16, #tpu.memory_space<vmem>>, vector<8x512xbf16>,
    %c0_68 = arith.constant 0 : index
    %c167 = arith.constant 167 : index
    %59 = vector.load %arg17[%c0_68, %c167] : memref<8x768xbf16, #tpu.memory_space<vmem>>, vector<8x512xbf16>
    %c168 = arith.constant 168 : index
    %c0_69 = arith.constant 0 : index
    %60 = vector.load %arg20[%c168, %c0_69] : memref<200x512xbf16, #tpu.memory_space<vmem>>, vector<8x512xbf16>
    tpu.vector_store %arg20[%c168, %c0_69], %59 {strides = array<i32>} : memref<200x512xbf16, #tpu.memory_space<vmem>>, vector<8x512xbf16>,
    %c0_70 = arith.constant 0 : index
    %c168_71 = arith.constant 168 : index
    %61 = vector.load %arg17[%c0_70, %c168_71] : memref<8x768xbf16, #tpu.memory_space<vmem>>, vector<8x512xbf16>
    %c176 = arith.constant 176 : index
    %c0_72 = arith.constant 0 : index
    %62 = vector.load %arg20[%c176, %c0_72] : memref<200x512xbf16, #tpu.memory_space<vmem>>, vector<8x512xbf16>
    tpu.vector_store %arg20[%c176, %c0_72], %61 {strides = array<i32>} : memref<200x512xbf16, #tpu.memory_space<vmem>>, vector<8x512xbf16>,
    %c0_73 = arith.constant 0 : index
    %c169 = arith.constant 169 : index
    %63 = vector.load %arg17[%c0_73, %c169] : memref<8x768xbf16, #tpu.memory_space<vmem>>, vector<8x512xbf16>
    %c184 = arith.constant 184 : index
    %c0_74 = arith.constant 0 : index
    %64 = vector.load %arg20[%c184, %c0_74] : memref<200x512xbf16, #tpu.memory_space<vmem>>, vector<8x512xbf16>
    tpu.vector_store %arg20[%c184, %c0_74], %63 {strides = array<i32>} : memref<200x512xbf16, #tpu.memory_space<vmem>>, vector<8x512xbf16>,
    %c0_75 = arith.constant 0 : index
    %c170 = arith.constant 170 : index
    %65 = vector.load %arg17[%c0_75, %c170] : memref<8x768xbf16, #tpu.memory_space<vmem>>, vector<8x512xbf16>
    %c192 = arith.constant 192 : index
    %c0_76 = arith.constant 0 : index
    %66 = vector.load %arg20[%c192, %c0_76] : memref<200x512xbf16, #tpu.memory_space<vmem>>, vector<8x512xbf16>
    tpu.vector_store %arg20[%c192, %c0_76], %65 {strides = array<i32>} : memref<200x512xbf16, #tpu.memory_space<vmem>>, vector<8x512xbf16>,
    %c0_77 = arith.constant 0 : index
    %c0_78 = arith.constant 0 : index
    %67 = vector.load %arg6[%c0_77, %c0_78] : memref<32x2xf32, #tpu.memory_space<vmem>>, vector<32x2xf32>
    %c0_79 = arith.constant 0 : index
    %c0_80 = arith.constant 0 : index
    %68 = vector.load %arg4[%c0_79, %c0_80] : memref<32x200xbf16, #tpu.memory_space<vmem>>, vector<32x200xbf16>
    %c0_81 = arith.constant 0 : index
    %c0_82 = arith.constant 0 : index
    %69 = vector.load %arg20[%c0_81, %c0_82] : memref<200x512xbf16, #tpu.memory_space<vmem>>, vector<200x512xbf16>
    %cst_83 = arith.constant dense<0.000000e+00> : vector<32x512xf32>
    %70 = tpu.matmul %68, %69, %cst_83 {dimension_numbers = #tpu.dot_dimension_numbers<[1], [0], [0], [1], [0, 0, 1, 1], [], []>} : vector<32x200xbf16>, vector<200x512xbf16>, vector<32x512xf32> -> vector<32x512xf32>
    %71 = vector.extract_strided_slice %67 {offsets = [0, 0], sizes = [32, 1], strides = [1, 1]} : vector<32x2xf32> to vector<32x1xf32>
    %72 = vector.broadcast %71 : vector<32x1xf32> to vector<32x512xf32>
    %73 = arith.mulf %70, %72 : vector<32x512xf32>
    %74 = vector.extract_strided_slice %67 {offsets = [0, 1], sizes = [32, 1], strides = [1, 1]} : vector<32x2xf32> to vector<32x1xf32>
    %75 = vector.broadcast %74 : vector<32x1xf32> to vector<32x512xf32>
    %76 = arith.addf %73, %75 : vector<32x512xf32>
    %77 = vector.extract_strided_slice %76 {offsets = [0, 0], sizes = [24, 512], strides = [1, 1]} : vector<32x512xf32> to vector<24x512xf32>
    %cst_84 = arith.constant 0.000000e+00 : f32
    %78 = vector.broadcast %cst_84 : f32 to vector<24x512xf32>
    %79 = arith.maximumf %77, %78 : vector<24x512xf32>
    %80 = vector.broadcast %16 : vector<1x512xf32> to vector<24x512xf32>
    %81 = arith.mulf %79, %80 : vector<24x512xf32>
    %82 = vector.extract_strided_slice %76 {offsets = [24, 0], sizes = [8, 512], strides = [1, 1]} : vector<32x512xf32> to vector<8x512xf32>
    %cst_85 = arith.constant 0.000000e+00 : f32
    %83 = vector.broadcast %cst_85 : f32 to vector<8x512xf32>
    %84 = arith.subf %83, %82 : vector<8x512xf32>
    %85 = math.exp %84 : vector<8x512xf32>
    %cst_86 = arith.constant 1.000000e+00 : f32
    %86 = vector.broadcast %cst_86 : f32 to vector<8x512xf32>
    %87 = arith.addf %86, %85 : vector<8x512xf32>
    %88 = tpu.reciprocal %87 {approx = true} : vector<8x512xf32> -> vector<8x512xf32>
    %89 = arith.truncf %81 : vector<24x512xf32> to vector<24x512xbf16>
    %c0_87 = arith.constant 0 : index
    %c128_88 = arith.constant 128 : index
    %90 = vector.load %arg19[%c0_87, %c128_88] : memref<24x768xbf16, #tpu.memory_space<vmem>>, vector<24x512xbf16>
    tpu.vector_store %arg19[%c0_87, %c128_88], %89 {strides = array<i32>} : memref<24x768xbf16, #tpu.memory_space<vmem>>, vector<24x512xbf16>,
    %c0_89 = arith.constant 0 : index
    %c107_90 = arith.constant 107 : index
    %91 = vector.load %arg19[%c0_89, %c107_90] : memref<24x768xbf16, #tpu.memory_space<vmem>>, vector<24x512xbf16>
    %c0_91 = arith.constant 0 : index
    %c0_92 = arith.constant 0 : index
    %92 = vector.load %arg21[%c0_91, %c0_92] : memref<216x512xbf16, #tpu.memory_space<vmem>>, vector<24x512xbf16>
    tpu.vector_store %arg21[%c0_91, %c0_92], %91 {strides = array<i32>} : memref<216x512xbf16, #tpu.memory_space<vmem>>, vector<24x512xbf16>,
    %c0_93 = arith.constant 0 : index
    %c108_94 = arith.constant 108 : index
    %93 = vector.load %arg19[%c0_93, %c108_94] : memref<24x768xbf16, #tpu.memory_space<vmem>>, vector<24x512xbf16>
    %c24_95 = arith.constant 24 : index
    %c0_96 = arith.constant 0 : index
    %94 = vector.load %arg21[%c24_95, %c0_96] : memref<216x512xbf16, #tpu.memory_space<vmem>>, vector<24x512xbf16>
    tpu.vector_store %arg21[%c24_95, %c0_96], %93 {strides = array<i32>} : memref<216x512xbf16, #tpu.memory_space<vmem>>, vector<24x512xbf16>,
    %c0_97 = arith.constant 0 : index
    %c109_98 = arith.constant 109 : index
    %95 = vector.load %arg19[%c0_97, %c109_98] : memref<24x768xbf16, #tpu.memory_space<vmem>>, vector<24x512xbf16>
    %c48_99 = arith.constant 48 : index
    %c0_100 = arith.constant 0 : index
    %96 = vector.load %arg21[%c48_99, %c0_100] : memref<216x512xbf16, #tpu.memory_space<vmem>>, vector<24x512xbf16>
    tpu.vector_store %arg21[%c48_99, %c0_100], %95 {strides = array<i32>} : memref<216x512xbf16, #tpu.memory_space<vmem>>, vector<24x512xbf16>,
    %c0_101 = arith.constant 0 : index
    %c127_102 = arith.constant 127 : index
    %97 = vector.load %arg19[%c0_101, %c127_102] : memref<24x768xbf16, #tpu.memory_space<vmem>>, vector<24x512xbf16>
    %c72_103 = arith.constant 72 : index
    %c0_104 = arith.constant 0 : index
    %98 = vector.load %arg21[%c72_103, %c0_104] : memref<216x512xbf16, #tpu.memory_space<vmem>>, vector<24x512xbf16>
    tpu.vector_store %arg21[%c72_103, %c0_104], %97 {strides = array<i32>} : memref<216x512xbf16, #tpu.memory_space<vmem>>, vector<24x512xbf16>,
    %c0_105 = arith.constant 0 : index
    %c128_106 = arith.constant 128 : index
    %99 = vector.load %arg19[%c0_105, %c128_106] : memref<24x768xbf16, #tpu.memory_space<vmem>>, vector<24x512xbf16>
    %c96_107 = arith.constant 96 : index
    %c0_108 = arith.constant 0 : index
    %100 = vector.load %arg21[%c96_107, %c0_108] : memref<216x512xbf16, #tpu.memory_space<vmem>>, vector<24x512xbf16>
    tpu.vector_store %arg21[%c96_107, %c0_108], %99 {strides = array<i32>} : memref<216x512xbf16, #tpu.memory_space<vmem>>, vector<24x512xbf16>,
    %c0_109 = arith.constant 0 : index
    %c129_110 = arith.constant 129 : index
    %101 = vector.load %arg19[%c0_109, %c129_110] : memref<24x768xbf16, #tpu.memory_space<vmem>>, vector<24x512xbf16>
    %c120_111 = arith.constant 120 : index
    %c0_112 = arith.constant 0 : index
    %102 = vector.load %arg21[%c120_111, %c0_112] : memref<216x512xbf16, #tpu.memory_space<vmem>>, vector<24x512xbf16>
    tpu.vector_store %arg21[%c120_111, %c0_112], %101 {strides = array<i32>} : memref<216x512xbf16, #tpu.memory_space<vmem>>, vector<24x512xbf16>,
    %c0_113 = arith.constant 0 : index
    %c147_114 = arith.constant 147 : index
    %103 = vector.load %arg19[%c0_113, %c147_114] : memref<24x768xbf16, #tpu.memory_space<vmem>>, vector<24x512xbf16>
    %c144_115 = arith.constant 144 : index
    %c0_116 = arith.constant 0 : index
    %104 = vector.load %arg21[%c144_115, %c0_116] : memref<216x512xbf16, #tpu.memory_space<vmem>>, vector<24x512xbf16>
    tpu.vector_store %arg21[%c144_115, %c0_116], %103 {strides = array<i32>} : memref<216x512xbf16, #tpu.memory_space<vmem>>, vector<24x512xbf16>,
    %c0_117 = arith.constant 0 : index
    %c148_118 = arith.constant 148 : index
    %105 = vector.load %arg19[%c0_117, %c148_118] : memref<24x768xbf16, #tpu.memory_space<vmem>>, vector<24x512xbf16>
    %c168_119 = arith.constant 168 : index
    %c0_120 = arith.constant 0 : index
    %106 = vector.load %arg21[%c168_119, %c0_120] : memref<216x512xbf16, #tpu.memory_space<vmem>>, vector<24x512xbf16>
    tpu.vector_store %arg21[%c168_119, %c0_120], %105 {strides = array<i32>} : memref<216x512xbf16, #tpu.memory_space<vmem>>, vector<24x512xbf16>,
    %c0_121 = arith.constant 0 : index
    %c149_122 = arith.constant 149 : index
    %107 = vector.load %arg19[%c0_121, %c149_122] : memref<24x768xbf16, #tpu.memory_space<vmem>>, vector<24x512xbf16>
    %c192_123 = arith.constant 192 : index
    %c0_124 = arith.constant 0 : index
    %108 = vector.load %arg21[%c192_123, %c0_124] : memref<216x512xbf16, #tpu.memory_space<vmem>>, vector<24x512xbf16>
    tpu.vector_store %arg21[%c192_123, %c0_124], %107 {strides = array<i32>} : memref<216x512xbf16, #tpu.memory_space<vmem>>, vector<24x512xbf16>,
    %c0_125 = arith.constant 0 : index
    %c0_126 = arith.constant 0 : index
    %109 = vector.load %arg10[%c0_125, %c0_126] : memref<8x2xf32, #tpu.memory_space<vmem>>, vector<8x2xf32>
    %c0_127 = arith.constant 0 : index
    %c0_128 = arith.constant 0 : index
    %110 = vector.load %arg8[%c0_127, %c0_128] : memref<8x216xbf16, #tpu.memory_space<vmem>>, vector<8x216xbf16>
    %c0_129 = arith.constant 0 : index
    %c0_130 = arith.constant 0 : index
    %111 = vector.load %arg21[%c0_129, %c0_130] : memref<216x512xbf16, #tpu.memory_space<vmem>>, vector<216x512xbf16>
    %cst_131 = arith.constant dense<0.000000e+00> : vector<8x512xf32>
    %112 = tpu.matmul %110, %111, %cst_131 {dimension_numbers = #tpu.dot_dimension_numbers<[1], [0], [0], [1], [0, 0, 1, 1], [], []>} : vector<8x216xbf16>, vector<216x512xbf16>, vector<8x512xf32> -> vector<8x512xf32>
    %113 = vector.extract_strided_slice %109 {offsets = [0, 0], sizes = [8, 1], strides = [1, 1]} : vector<8x2xf32> to vector<8x1xf32>
    %114 = vector.broadcast %113 : vector<8x1xf32> to vector<8x512xf32>
    %115 = arith.mulf %112, %114 : vector<8x512xf32>
    %116 = vector.extract_strided_slice %109 {offsets = [0, 1], sizes = [8, 1], strides = [1, 1]} : vector<8x2xf32> to vector<8x1xf32>
    %117 = vector.broadcast %116 : vector<8x1xf32> to vector<8x512xf32>
    %118 = arith.addf %115, %117 : vector<8x512xf32>
    %cst_132 = arith.constant 0.000000e+00 : f32
    %119 = vector.broadcast %cst_132 : f32 to vector<8x512xf32>
    %120 = arith.subf %119, %118 : vector<8x512xf32>
    %121 = math.exp %120 : vector<8x512xf32>
    %cst_133 = arith.constant 1.000000e+00 : f32
    %122 = vector.broadcast %cst_133 : f32 to vector<8x512xf32>
    %123 = arith.addf %122, %121 : vector<8x512xf32>
    %124 = tpu.reciprocal %123 {approx = true} : vector<8x512xf32> -> vector<8x512xf32>
    %c0_134 = arith.constant 0 : index
    %c86_135 = arith.constant 86 : index
    %125 = vector.load %arg18[%c0_134, %c86_135] : memref<8x768xbf16, #tpu.memory_space<vmem>>, vector<8x512xbf16>
    %c0_136 = arith.constant 0 : index
    %c0_137 = arith.constant 0 : index
    %126 = vector.load %arg20[%c0_136, %c0_137] : memref<200x512xbf16, #tpu.memory_space<vmem>>, vector<8x512xbf16>
    tpu.vector_store %arg20[%c0_136, %c0_137], %125 {strides = array<i32>} : memref<200x512xbf16, #tpu.memory_space<vmem>>, vector<8x512xbf16>,
    %c0_138 = arith.constant 0 : index
    %c87_139 = arith.constant 87 : index
    %127 = vector.load %arg18[%c0_138, %c87_139] : memref<8x768xbf16, #tpu.memory_space<vmem>>, vector<8x512xbf16>
    %c8_140 = arith.constant 8 : index
    %c0_141 = arith.constant 0 : index
    %128 = vector.load %arg20[%c8_140, %c0_141] : memref<200x512xbf16, #tpu.memory_space<vmem>>, vector<8x512xbf16>
    tpu.vector_store %arg20[%c8_140, %c0_141], %127 {strides = array<i32>} : memref<200x512xbf16, #tpu.memory_space<vmem>>, vector<8x512xbf16>,
    %c0_142 = arith.constant 0 : index
    %c88_143 = arith.constant 88 : index
    %129 = vector.load %arg18[%c0_142, %c88_143] : memref<8x768xbf16, #tpu.memory_space<vmem>>, vector<8x512xbf16>
    %c16_144 = arith.constant 16 : index
    %c0_145 = arith.constant 0 : index
    %130 = vector.load %arg20[%c16_144, %c0_145] : memref<200x512xbf16, #tpu.memory_space<vmem>>, vector<8x512xbf16>
    tpu.vector_store %arg20[%c16_144, %c0_145], %129 {strides = array<i32>} : memref<200x512xbf16, #tpu.memory_space<vmem>>, vector<8x512xbf16>,
    %c0_146 = arith.constant 0 : index
    %c89_147 = arith.constant 89 : index
    %131 = vector.load %arg18[%c0_146, %c89_147] : memref<8x768xbf16, #tpu.memory_space<vmem>>, vector<8x512xbf16>
    %c24_148 = arith.constant 24 : index
    %c0_149 = arith.constant 0 : index
    %132 = vector.load %arg20[%c24_148, %c0_149] : memref<200x512xbf16, #tpu.memory_space<vmem>>, vector<8x512xbf16>
    tpu.vector_store %arg20[%c24_148, %c0_149], %131 {strides = array<i32>} : memref<200x512xbf16, #tpu.memory_space<vmem>>, vector<8x512xbf16>,
    %c0_150 = arith.constant 0 : index
    %c90_151 = arith.constant 90 : index
    %133 = vector.load %arg18[%c0_150, %c90_151] : memref<8x768xbf16, #tpu.memory_space<vmem>>, vector<8x512xbf16>
    %c32_152 = arith.constant 32 : index
    %c0_153 = arith.constant 0 : index
    %134 = vector.load %arg20[%c32_152, %c0_153] : memref<200x512xbf16, #tpu.memory_space<vmem>>, vector<8x512xbf16>
    tpu.vector_store %arg20[%c32_152, %c0_153], %133 {strides = array<i32>} : memref<200x512xbf16, #tpu.memory_space<vmem>>, vector<8x512xbf16>,
    %c0_154 = arith.constant 0 : index
    %c106_155 = arith.constant 106 : index
    %135 = vector.load %arg18[%c0_154, %c106_155] : memref<8x768xbf16, #tpu.memory_space<vmem>>, vector<8x512xbf16>
    %c40_156 = arith.constant 40 : index
    %c0_157 = arith.constant 0 : index
    %136 = vector.load %arg20[%c40_156, %c0_157] : memref<200x512xbf16, #tpu.memory_space<vmem>>, vector<8x512xbf16>
    tpu.vector_store %arg20[%c40_156, %c0_157], %135 {strides = array<i32>} : memref<200x512xbf16, #tpu.memory_space<vmem>>, vector<8x512xbf16>,
    %c0_158 = arith.constant 0 : index
    %c107_159 = arith.constant 107 : index
    %137 = vector.load %arg18[%c0_158, %c107_159] : memref<8x768xbf16, #tpu.memory_space<vmem>>, vector<8x512xbf16>
    %c48_160 = arith.constant 48 : index
    %c0_161 = arith.constant 0 : index
    %138 = vector.load %arg20[%c48_160, %c0_161] : memref<200x512xbf16, #tpu.memory_space<vmem>>, vector<8x512xbf16>
    tpu.vector_store %arg20[%c48_160, %c0_161], %137 {strides = array<i32>} : memref<200x512xbf16, #tpu.memory_space<vmem>>, vector<8x512xbf16>,
    %c0_162 = arith.constant 0 : index
    %c108_163 = arith.constant 108 : index
    %139 = vector.load %arg18[%c0_162, %c108_163] : memref<8x768xbf16, #tpu.memory_space<vmem>>, vector<8x512xbf16>
    %c56_164 = arith.constant 56 : index
    %c0_165 = arith.constant 0 : index
    %140 = vector.load %arg20[%c56_164, %c0_165] : memref<200x512xbf16, #tpu.memory_space<vmem>>, vector<8x512xbf16>
    tpu.vector_store %arg20[%c56_164, %c0_165], %139 {strides = array<i32>} : memref<200x512xbf16, #tpu.memory_space<vmem>>, vector<8x512xbf16>,
    %c0_166 = arith.constant 0 : index
    %c109_167 = arith.constant 109 : index
    %141 = vector.load %arg18[%c0_166, %c109_167] : memref<8x768xbf16, #tpu.memory_space<vmem>>, vector<8x512xbf16>
    %c64_168 = arith.constant 64 : index
    %c0_169 = arith.constant 0 : index
    %142 = vector.load %arg20[%c64_168, %c0_169] : memref<200x512xbf16, #tpu.memory_space<vmem>>, vector<8x512xbf16>
    tpu.vector_store %arg20[%c64_168, %c0_169], %141 {strides = array<i32>} : memref<200x512xbf16, #tpu.memory_space<vmem>>, vector<8x512xbf16>,
    %c0_170 = arith.constant 0 : index
    %c110_171 = arith.constant 110 : index
    %143 = vector.load %arg18[%c0_170, %c110_171] : memref<8x768xbf16, #tpu.memory_space<vmem>>, vector<8x512xbf16>
    %c72_172 = arith.constant 72 : index
    %c0_173 = arith.constant 0 : index
    %144 = vector.load %arg20[%c72_172, %c0_173] : memref<200x512xbf16, #tpu.memory_space<vmem>>, vector<8x512xbf16>
    tpu.vector_store %arg20[%c72_172, %c0_173], %143 {strides = array<i32>} : memref<200x512xbf16, #tpu.memory_space<vmem>>, vector<8x512xbf16>,
    %c0_174 = arith.constant 0 : index
    %c126_175 = arith.constant 126 : index
    %145 = vector.load %arg18[%c0_174, %c126_175] : memref<8x768xbf16, #tpu.memory_space<vmem>>, vector<8x512xbf16>
    %c80_176 = arith.constant 80 : index
    %c0_177 = arith.constant 0 : index
    %146 = vector.load %arg20[%c80_176, %c0_177] : memref<200x512xbf16, #tpu.memory_space<vmem>>, vector<8x512xbf16>
    tpu.vector_store %arg20[%c80_176, %c0_177], %145 {strides = array<i32>} : memref<200x512xbf16, #tpu.memory_space<vmem>>, vector<8x512xbf16>,
    %c0_178 = arith.constant 0 : index
    %c127_179 = arith.constant 127 : index
    %147 = vector.load %arg18[%c0_178, %c127_179] : memref<8x768xbf16, #tpu.memory_space<vmem>>, vector<8x512xbf16>
    %c88_180 = arith.constant 88 : index
    %c0_181 = arith.constant 0 : index
    %148 = vector.load %arg20[%c88_180, %c0_181] : memref<200x512xbf16, #tpu.memory_space<vmem>>, vector<8x512xbf16>
    tpu.vector_store %arg20[%c88_180, %c0_181], %147 {strides = array<i32>} : memref<200x512xbf16, #tpu.memory_space<vmem>>, vector<8x512xbf16>,
    %c0_182 = arith.constant 0 : index
    %c128_183 = arith.constant 128 : index
    %149 = vector.load %arg18[%c0_182, %c128_183] : memref<8x768xbf16, #tpu.memory_space<vmem>>, vector<8x512xbf16>
    %c96_184 = arith.constant 96 : index
    %c0_185 = arith.constant 0 : index
    %150 = vector.load %arg20[%c96_184, %c0_185] : memref<200x512xbf16, #tpu.memory_space<vmem>>, vector<8x512xbf16>
    tpu.vector_store %arg20[%c96_184, %c0_185], %149 {strides = array<i32>} : memref<200x512xbf16, #tpu.memory_space<vmem>>, vector<8x512xbf16>,
    %c0_186 = arith.constant 0 : index
    %c129_187 = arith.constant 129 : index
    %151 = vector.load %arg18[%c0_186, %c129_187] : memref<8x768xbf16, #tpu.memory_space<vmem>>, vector<8x512xbf16>
    %c104_188 = arith.constant 104 : index
    %c0_189 = arith.constant 0 : index
    %152 = vector.load %arg20[%c104_188, %c0_189] : memref<200x512xbf16, #tpu.memory_space<vmem>>, vector<8x512xbf16>
    tpu.vector_store %arg20[%c104_188, %c0_189], %151 {strides = array<i32>} : memref<200x512xbf16, #tpu.memory_space<vmem>>, vector<8x512xbf16>,
    %c0_190 = arith.constant 0 : index
    %c130_191 = arith.constant 130 : index
    %153 = vector.load %arg18[%c0_190, %c130_191] : memref<8x768xbf16, #tpu.memory_space<vmem>>, vector<8x512xbf16>
    %c112_192 = arith.constant 112 : index
    %c0_193 = arith.constant 0 : index
    %154 = vector.load %arg20[%c112_192, %c0_193] : memref<200x512xbf16, #tpu.memory_space<vmem>>, vector<8x512xbf16>
    tpu.vector_store %arg20[%c112_192, %c0_193], %153 {strides = array<i32>} : memref<200x512xbf16, #tpu.memory_space<vmem>>, vector<8x512xbf16>,
    %c0_194 = arith.constant 0 : index
    %c146_195 = arith.constant 146 : index
    %155 = vector.load %arg18[%c0_194, %c146_195] : memref<8x768xbf16, #tpu.memory_space<vmem>>, vector<8x512xbf16>
    %c120_196 = arith.constant 120 : index
    %c0_197 = arith.constant 0 : index
    %156 = vector.load %arg20[%c120_196, %c0_197] : memref<200x512xbf16, #tpu.memory_space<vmem>>, vector<8x512xbf16>
    tpu.vector_store %arg20[%c120_196, %c0_197], %155 {strides = array<i32>} : memref<200x512xbf16, #tpu.memory_space<vmem>>, vector<8x512xbf16>,
    %c0_198 = arith.constant 0 : index
    %c147_199 = arith.constant 147 : index
    %157 = vector.load %arg18[%c0_198, %c147_199] : memref<8x768xbf16, #tpu.memory_space<vmem>>, vector<8x512xbf16>
    %c128_200 = arith.constant 128 : index
    %c0_201 = arith.constant 0 : index
    %158 = vector.load %arg20[%c128_200, %c0_201] : memref<200x512xbf16, #tpu.memory_space<vmem>>, vector<8x512xbf16>
    tpu.vector_store %arg20[%c128_200, %c0_201], %157 {strides = array<i32>} : memref<200x512xbf16, #tpu.memory_space<vmem>>, vector<8x512xbf16>,
    %c0_202 = arith.constant 0 : index
    %c148_203 = arith.constant 148 : index
    %159 = vector.load %arg18[%c0_202, %c148_203] : memref<8x768xbf16, #tpu.memory_space<vmem>>, vector<8x512xbf16>
    %c136_204 = arith.constant 136 : index
    %c0_205 = arith.constant 0 : index
    %160 = vector.load %arg20[%c136_204, %c0_205] : memref<200x512xbf16, #tpu.memory_space<vmem>>, vector<8x512xbf16>
    tpu.vector_store %arg20[%c136_204, %c0_205], %159 {strides = array<i32>} : memref<200x512xbf16, #tpu.memory_space<vmem>>, vector<8x512xbf16>,
    %c0_206 = arith.constant 0 : index
    %c149_207 = arith.constant 149 : index
    %161 = vector.load %arg18[%c0_206, %c149_207] : memref<8x768xbf16, #tpu.memory_space<vmem>>, vector<8x512xbf16>
    %c144_208 = arith.constant 144 : index
    %c0_209 = arith.constant 0 : index
    %162 = vector.load %arg20[%c144_208, %c0_209] : memref<200x512xbf16, #tpu.memory_space<vmem>>, vector<8x512xbf16>
    tpu.vector_store %arg20[%c144_208, %c0_209], %161 {strides = array<i32>} : memref<200x512xbf16, #tpu.memory_space<vmem>>, vector<8x512xbf16>,
    %c0_210 = arith.constant 0 : index
    %c150_211 = arith.constant 150 : index
    %163 = vector.load %arg18[%c0_210, %c150_211] : memref<8x768xbf16, #tpu.memory_space<vmem>>, vector<8x512xbf16>
    %c152_212 = arith.constant 152 : index
    %c0_213 = arith.constant 0 : index
    %164 = vector.load %arg20[%c152_212, %c0_213] : memref<200x512xbf16, #tpu.memory_space<vmem>>, vector<8x512xbf16>
    tpu.vector_store %arg20[%c152_212, %c0_213], %163 {strides = array<i32>} : memref<200x512xbf16, #tpu.memory_space<vmem>>, vector<8x512xbf16>,
    %c0_214 = arith.constant 0 : index
    %c166_215 = arith.constant 166 : index
    %165 = vector.load %arg18[%c0_214, %c166_215] : memref<8x768xbf16, #tpu.memory_space<vmem>>, vector<8x512xbf16>
    %c160_216 = arith.constant 160 : index
    %c0_217 = arith.constant 0 : index
    %166 = vector.load %arg20[%c160_216, %c0_217] : memref<200x512xbf16, #tpu.memory_space<vmem>>, vector<8x512xbf16>
    tpu.vector_store %arg20[%c160_216, %c0_217], %165 {strides = array<i32>} : memref<200x512xbf16, #tpu.memory_space<vmem>>, vector<8x512xbf16>,
    %c0_218 = arith.constant 0 : index
    %c167_219 = arith.constant 167 : index
    %167 = vector.load %arg18[%c0_218, %c167_219] : memref<8x768xbf16, #tpu.memory_space<vmem>>, vector<8x512xbf16>
    %c168_220 = arith.constant 168 : index
    %c0_221 = arith.constant 0 : index
    %168 = vector.load %arg20[%c168_220, %c0_221] : memref<200x512xbf16, #tpu.memory_space<vmem>>, vector<8x512xbf16>
    tpu.vector_store %arg20[%c168_220, %c0_221], %167 {strides = array<i32>} : memref<200x512xbf16, #tpu.memory_space<vmem>>, vector<8x512xbf16>,
    %c0_222 = arith.constant 0 : index
    %c168_223 = arith.constant 168 : index
    %169 = vector.load %arg18[%c0_222, %c168_223] : memref<8x768xbf16, #tpu.memory_space<vmem>>, vector<8x512xbf16>
    %c176_224 = arith.constant 176 : index
    %c0_225 = arith.constant 0 : index
    %170 = vector.load %arg20[%c176_224, %c0_225] : memref<200x512xbf16, #tpu.memory_space<vmem>>, vector<8x512xbf16>
    tpu.vector_store %arg20[%c176_224, %c0_225], %169 {strides = array<i32>} : memref<200x512xbf16, #tpu.memory_space<vmem>>, vector<8x512xbf16>,
    %c0_226 = arith.constant 0 : index
    %c169_227 = arith.constant 169 : index
    %171 = vector.load %arg18[%c0_226, %c169_227] : memref<8x768xbf16, #tpu.memory_space<vmem>>, vector<8x512xbf16>
    %c184_228 = arith.constant 184 : index
    %c0_229 = arith.constant 0 : index
    %172 = vector.load %arg20[%c184_228, %c0_229] : memref<200x512xbf16, #tpu.memory_space<vmem>>, vector<8x512xbf16>
    tpu.vector_store %arg20[%c184_228, %c0_229], %171 {strides = array<i32>} : memref<200x512xbf16, #tpu.memory_space<vmem>>, vector<8x512xbf16>,
    %c0_230 = arith.constant 0 : index
    %c170_231 = arith.constant 170 : index
    %173 = vector.load %arg18[%c0_230, %c170_231] : memref<8x768xbf16, #tpu.memory_space<vmem>>, vector<8x512xbf16>
    %c192_232 = arith.constant 192 : index
    %c0_233 = arith.constant 0 : index
    %174 = vector.load %arg20[%c192_232, %c0_233] : memref<200x512xbf16, #tpu.memory_space<vmem>>, vector<8x512xbf16>
    tpu.vector_store %arg20[%c192_232, %c0_233], %173 {strides = array<i32>} : memref<200x512xbf16, #tpu.memory_space<vmem>>, vector<8x512xbf16>,
    %c0_234 = arith.constant 0 : index
    %c0_235 = arith.constant 0 : index
    %175 = vector.load %arg7[%c0_234, %c0_235] : memref<32x2xf32, #tpu.memory_space<vmem>>, vector<32x2xf32>
    %c0_236 = arith.constant 0 : index
    %c0_237 = arith.constant 0 : index
    %176 = vector.load %arg5[%c0_236, %c0_237] : memref<32x200xbf16, #tpu.memory_space<vmem>>, vector<32x200xbf16>
    %c0_238 = arith.constant 0 : index
    %c0_239 = arith.constant 0 : index
    %177 = vector.load %arg20[%c0_238, %c0_239] : memref<200x512xbf16, #tpu.memory_space<vmem>>, vector<200x512xbf16>
    %cst_240 = arith.constant dense<0.000000e+00> : vector<32x512xf32>
    %178 = tpu.matmul %176, %177, %cst_240 {dimension_numbers = #tpu.dot_dimension_numbers<[1], [0], [0], [1], [0, 0, 1, 1], [], []>} : vector<32x200xbf16>, vector<200x512xbf16>, vector<32x512xf32> -> vector<32x512xf32>
    %179 = vector.extract_strided_slice %175 {offsets = [0, 0], sizes = [32, 1], strides = [1, 1]} : vector<32x2xf32> to vector<32x1xf32>
    %180 = vector.broadcast %179 : vector<32x1xf32> to vector<32x512xf32>
    %181 = arith.mulf %178, %180 : vector<32x512xf32>
    %182 = vector.extract_strided_slice %175 {offsets = [0, 1], sizes = [32, 1], strides = [1, 1]} : vector<32x2xf32> to vector<32x1xf32>
    %183 = vector.broadcast %182 : vector<32x1xf32> to vector<32x512xf32>
    %184 = arith.addf %181, %183 : vector<32x512xf32>
    %185 = vector.extract_strided_slice %184 {offsets = [0, 0], sizes = [24, 512], strides = [1, 1]} : vector<32x512xf32> to vector<24x512xf32>
    %cst_241 = arith.constant 0.000000e+00 : f32
    %186 = vector.broadcast %cst_241 : f32 to vector<24x512xf32>
    %187 = arith.maximumf %185, %186 : vector<24x512xf32>
    %188 = vector.broadcast %16 : vector<1x512xf32> to vector<24x512xf32>
    %189 = arith.mulf %187, %188 : vector<24x512xf32>
    %190 = vector.extract_strided_slice %184 {offsets = [24, 0], sizes = [8, 512], strides = [1, 1]} : vector<32x512xf32> to vector<8x512xf32>
    %cst_242 = arith.constant 0.000000e+00 : f32
    %191 = vector.broadcast %cst_242 : f32 to vector<8x512xf32>
    %192 = arith.subf %191, %190 : vector<8x512xf32>
    %193 = math.exp %192 : vector<8x512xf32>
    %cst_243 = arith.constant 1.000000e+00 : f32
    %194 = vector.broadcast %cst_243 : f32 to vector<8x512xf32>
    %195 = arith.addf %194, %193 : vector<8x512xf32>
    %196 = tpu.reciprocal %195 {approx = true} : vector<8x512xf32> -> vector<8x512xf32>
    %c0_244 = arith.constant 0 : index
    %c0_245 = arith.constant 0 : index
    %c0_246 = arith.constant 0 : index
    %197 = vector.load %arg2[%c0_244, %c0_245, %c0_246] : memref<1x8x512xf32, #tpu.memory_space<vmem>>, vector<1x8x512xf32>
    %198 = vector.shape_cast %197 : vector<1x8x512xf32> to vector<8x512xf32>
    %199 = arith.addf %124, %196 : vector<8x512xf32>
    %cst_247 = arith.constant 1.000000e+00 : f32
    %200 = vector.broadcast %cst_247 : f32 to vector<8x512xf32>
    %201 = arith.addf %199, %200 : vector<8x512xf32>
    %202 = arith.mulf %198, %201 : vector<8x512xf32>
    %cst_248 = arith.constant dense<0.000000e+00> : vector<8xf32>
    %203 = vector.multi_reduction <add>, %202, %cst_248 [1] : vector<8x512xf32> to vector<8xf32>
    %204 = vector.shape_cast %203 : vector<8xf32> to vector<8x1xf32>
    %cst_249 = arith.constant 3.906250e-03 : f32
    %205 = vector.broadcast %cst_249 : f32 to vector<8x1xf32>
    %206 = arith.mulf %204, %205 : vector<8x1xf32>
    %c0_250 = arith.constant 0 : index
    %c0_251 = arith.constant 0 : index
    %207 = vector.load %arg12[%c0_250, %c0_251] : memref<8x2xf32, #tpu.memory_space<vmem>>, vector<8x2xf32>
    %208 = vector.broadcast %206 : vector<8x1xf32> to vector<8x2xf32>
    %209 = arith.mulf %207, %208 : vector<8x2xf32>
    %cst_252 = arith.constant dense<0.000000e+00> : vector<2xf32>
    %210 = vector.multi_reduction <add>, %209, %cst_252 [0] : vector<8x2xf32> to vector<2xf32>
    %211 = vector.shape_cast %210 : vector<2xf32> to vector<1x2xf32>
    %cst_253 = arith.constant 0.000000e+00 : f32
    %212 = vector.broadcast %cst_253 : f32 to vector<1x2xf32>
    %213 = arith.maximumf %211, %212 : vector<1x2xf32>
    %c0_254 = arith.constant 0 : index
    %c0_255 = arith.constant 0 : index
    %214 = vector.load %arg13[%c0_254, %c0_255] : memref<1x2xf32, #tpu.memory_space<vmem>>, vector<1x2xf32>
    %215 = arith.mulf %213, %214 : vector<1x2xf32>
    %cst_256 = arith.constant dense<0.000000e+00> : vector<1xf32>
    %216 = vector.multi_reduction <add>, %215, %cst_256 [1] : vector<1x2xf32> to vector<1xf32>
    %217 = vector.shape_cast %216 : vector<1xf32> to vector<1x1xf32>
    %cst_257 = arith.constant 0.000000e+00 : f32
    %218 = vector.broadcast %cst_257 : f32 to vector<1x1xf32>
    %219 = arith.maximumf %217, %218 : vector<1x1xf32>
    %cst_258 = arith.constant 0.000000e+00 : f32
    %220 = vector.broadcast %cst_258 : f32 to vector<1x1xf32>
    %221 = arith.subf %220, %219 : vector<1x1xf32>
    %222 = math.exp %221 : vector<1x1xf32>
    %cst_259 = arith.constant 1.000000e+00 : f32
    %223 = vector.broadcast %cst_259 : f32 to vector<1x1xf32>
    %224 = arith.addf %223, %222 : vector<1x1xf32>
    %225 = tpu.reciprocal %224 {approx = true} : vector<1x1xf32> -> vector<1x1xf32>
    %226 = vector.broadcast %225 : vector<1x1xf32> to vector<8x512xf32>
    %227 = arith.mulf %202, %226 : vector<8x512xf32>
    %228 = arith.truncf %189 : vector<24x512xf32> to vector<24x512xbf16>
    %c0_260 = arith.constant 0 : index
    %c128_261 = arith.constant 128 : index
    %229 = vector.load %arg19[%c0_260, %c128_261] : memref<24x768xbf16, #tpu.memory_space<vmem>>, vector<24x512xbf16>
    tpu.vector_store %arg19[%c0_260, %c128_261], %228 {strides = array<i32>} : memref<24x768xbf16, #tpu.memory_space<vmem>>, vector<24x512xbf16>,
    %c0_262 = arith.constant 0 : index
    %c107_263 = arith.constant 107 : index
    %230 = vector.load %arg19[%c0_262, %c107_263] : memref<24x768xbf16, #tpu.memory_space<vmem>>, vector<24x512xbf16>
    %c0_264 = arith.constant 0 : index
    %c0_265 = arith.constant 0 : index
    %231 = vector.load %arg21[%c0_264, %c0_265] : memref<216x512xbf16, #tpu.memory_space<vmem>>, vector<24x512xbf16>
    tpu.vector_store %arg21[%c0_264, %c0_265], %230 {strides = array<i32>} : memref<216x512xbf16, #tpu.memory_space<vmem>>, vector<24x512xbf16>,
    %c0_266 = arith.constant 0 : index
    %c108_267 = arith.constant 108 : index
    %232 = vector.load %arg19[%c0_266, %c108_267] : memref<24x768xbf16, #tpu.memory_space<vmem>>, vector<24x512xbf16>
    %c24_268 = arith.constant 24 : index
    %c0_269 = arith.constant 0 : index
    %233 = vector.load %arg21[%c24_268, %c0_269] : memref<216x512xbf16, #tpu.memory_space<vmem>>, vector<24x512xbf16>
    tpu.vector_store %arg21[%c24_268, %c0_269], %232 {strides = array<i32>} : memref<216x512xbf16, #tpu.memory_space<vmem>>, vector<24x512xbf16>,
    %c0_270 = arith.constant 0 : index
    %c109_271 = arith.constant 109 : index
    %234 = vector.load %arg19[%c0_270, %c109_271] : memref<24x768xbf16, #tpu.memory_space<vmem>>, vector<24x512xbf16>
    %c48_272 = arith.constant 48 : index
    %c0_273 = arith.constant 0 : index
    %235 = vector.load %arg21[%c48_272, %c0_273] : memref<216x512xbf16, #tpu.memory_space<vmem>>, vector<24x512xbf16>
    tpu.vector_store %arg21[%c48_272, %c0_273], %234 {strides = array<i32>} : memref<216x512xbf16, #tpu.memory_space<vmem>>, vector<24x512xbf16>,
    %c0_274 = arith.constant 0 : index
    %c127_275 = arith.constant 127 : index
    %236 = vector.load %arg19[%c0_274, %c127_275] : memref<24x768xbf16, #tpu.memory_space<vmem>>, vector<24x512xbf16>
    %c72_276 = arith.constant 72 : index
    %c0_277 = arith.constant 0 : index
    %237 = vector.load %arg21[%c72_276, %c0_277] : memref<216x512xbf16, #tpu.memory_space<vmem>>, vector<24x512xbf16>
    tpu.vector_store %arg21[%c72_276, %c0_277], %236 {strides = array<i32>} : memref<216x512xbf16, #tpu.memory_space<vmem>>, vector<24x512xbf16>,
    %c0_278 = arith.constant 0 : index
    %c128_279 = arith.constant 128 : index
    %238 = vector.load %arg19[%c0_278, %c128_279] : memref<24x768xbf16, #tpu.memory_space<vmem>>, vector<24x512xbf16>
    %c96_280 = arith.constant 96 : index
    %c0_281 = arith.constant 0 : index
    %239 = vector.load %arg21[%c96_280, %c0_281] : memref<216x512xbf16, #tpu.memory_space<vmem>>, vector<24x512xbf16>
    tpu.vector_store %arg21[%c96_280, %c0_281], %238 {strides = array<i32>} : memref<216x512xbf16, #tpu.memory_space<vmem>>, vector<24x512xbf16>,
    %c0_282 = arith.constant 0 : index
    %c129_283 = arith.constant 129 : index
    %240 = vector.load %arg19[%c0_282, %c129_283] : memref<24x768xbf16, #tpu.memory_space<vmem>>, vector<24x512xbf16>
    %c120_284 = arith.constant 120 : index
    %c0_285 = arith.constant 0 : index
    %241 = vector.load %arg21[%c120_284, %c0_285] : memref<216x512xbf16, #tpu.memory_space<vmem>>, vector<24x512xbf16>
    tpu.vector_store %arg21[%c120_284, %c0_285], %240 {strides = array<i32>} : memref<216x512xbf16, #tpu.memory_space<vmem>>, vector<24x512xbf16>,
    %c0_286 = arith.constant 0 : index
    %c147_287 = arith.constant 147 : index
    %242 = vector.load %arg19[%c0_286, %c147_287] : memref<24x768xbf16, #tpu.memory_space<vmem>>, vector<24x512xbf16>
    %c144_288 = arith.constant 144 : index
    %c0_289 = arith.constant 0 : index
    %243 = vector.load %arg21[%c144_288, %c0_289] : memref<216x512xbf16, #tpu.memory_space<vmem>>, vector<24x512xbf16>
    tpu.vector_store %arg21[%c144_288, %c0_289], %242 {strides = array<i32>} : memref<216x512xbf16, #tpu.memory_space<vmem>>, vector<24x512xbf16>,
    %c0_290 = arith.constant 0 : index
    %c148_291 = arith.constant 148 : index
    %244 = vector.load %arg19[%c0_290, %c148_291] : memref<24x768xbf16, #tpu.memory_space<vmem>>, vector<24x512xbf16>
    %c168_292 = arith.constant 168 : index
    %c0_293 = arith.constant 0 : index
    %245 = vector.load %arg21[%c168_292, %c0_293] : memref<216x512xbf16, #tpu.memory_space<vmem>>, vector<24x512xbf16>
    tpu.vector_store %arg21[%c168_292, %c0_293], %244 {strides = array<i32>} : memref<216x512xbf16, #tpu.memory_space<vmem>>, vector<24x512xbf16>,
    %c0_294 = arith.constant 0 : index
    %c149_295 = arith.constant 149 : index
    %246 = vector.load %arg19[%c0_294, %c149_295] : memref<24x768xbf16, #tpu.memory_space<vmem>>, vector<24x512xbf16>
    %c192_296 = arith.constant 192 : index
    %c0_297 = arith.constant 0 : index
    %247 = vector.load %arg21[%c192_296, %c0_297] : memref<216x512xbf16, #tpu.memory_space<vmem>>, vector<24x512xbf16>
    tpu.vector_store %arg21[%c192_296, %c0_297], %246 {strides = array<i32>} : memref<216x512xbf16, #tpu.memory_space<vmem>>, vector<24x512xbf16>,
    %c0_298 = arith.constant 0 : index
    %c0_299 = arith.constant 0 : index
    %248 = vector.load %arg11[%c0_298, %c0_299] : memref<8x2xf32, #tpu.memory_space<vmem>>, vector<8x2xf32>
    %c0_300 = arith.constant 0 : index
    %c0_301 = arith.constant 0 : index
    %249 = vector.load %arg9[%c0_300, %c0_301] : memref<8x216xbf16, #tpu.memory_space<vmem>>, vector<8x216xbf16>
    %c0_302 = arith.constant 0 : index
    %c0_303 = arith.constant 0 : index
    %250 = vector.load %arg21[%c0_302, %c0_303] : memref<216x512xbf16, #tpu.memory_space<vmem>>, vector<216x512xbf16>
    %cst_304 = arith.constant dense<0.000000e+00> : vector<8x512xf32>
    %251 = tpu.matmul %249, %250, %cst_304 {dimension_numbers = #tpu.dot_dimension_numbers<[1], [0], [0], [1], [0, 0, 1, 1], [], []>} : vector<8x216xbf16>, vector<216x512xbf16>, vector<8x512xf32> -> vector<8x512xf32>
    %252 = vector.extract_strided_slice %248 {offsets = [0, 0], sizes = [8, 1], strides = [1, 1]} : vector<8x2xf32> to vector<8x1xf32>
    %253 = vector.broadcast %252 : vector<8x1xf32> to vector<8x512xf32>
    %254 = arith.mulf %251, %253 : vector<8x512xf32>
    %255 = vector.extract_strided_slice %248 {offsets = [0, 1], sizes = [8, 1], strides = [1, 1]} : vector<8x2xf32> to vector<8x1xf32>
    %256 = vector.broadcast %255 : vector<8x1xf32> to vector<8x512xf32>
    %257 = arith.addf %254, %256 : vector<8x512xf32>
    %cst_305 = arith.constant 0.000000e+00 : f32
    %258 = vector.broadcast %cst_305 : f32 to vector<8x512xf32>
    %259 = arith.subf %258, %257 : vector<8x512xf32>
    %260 = math.exp %259 : vector<8x512xf32>
    %cst_306 = arith.constant 1.000000e+00 : f32
    %261 = vector.broadcast %cst_306 : f32 to vector<8x512xf32>
    %262 = arith.addf %261, %260 : vector<8x512xf32>
    %263 = tpu.reciprocal %262 {approx = true} : vector<8x512xf32> -> vector<8x512xf32>
    %c0_307 = arith.constant 0 : index
    %c0_308 = arith.constant 0 : index
    %c0_309 = arith.constant 0 : index
    %264 = vector.load %arg1[%c0_307, %c0_308, %c0_309] : memref<1x8x512xf32, #tpu.memory_space<vmem>>, vector<1x8x512xf32>
    %265 = vector.shape_cast %264 : vector<1x8x512xf32> to vector<8x512xf32>
    %266 = arith.addf %263, %88 : vector<8x512xf32>
    %cst_310 = arith.constant 1.000000e+00 : f32
    %267 = vector.broadcast %cst_310 : f32 to vector<8x512xf32>
    %268 = arith.addf %266, %267 : vector<8x512xf32>
    %269 = arith.mulf %265, %268 : vector<8x512xf32>
    %cst_311 = arith.constant dense<0.000000e+00> : vector<8xf32>
    %270 = vector.multi_reduction <add>, %269, %cst_311 [1] : vector<8x512xf32> to vector<8xf32>
    %271 = vector.shape_cast %270 : vector<8xf32> to vector<8x1xf32>
    %cst_312 = arith.constant 3.906250e-03 : f32
    %272 = vector.broadcast %cst_312 : f32 to vector<8x1xf32>
    %273 = arith.mulf %271, %272 : vector<8x1xf32>
    %c0_313 = arith.constant 0 : index
    %c0_314 = arith.constant 0 : index
    %274 = vector.load %arg14[%c0_313, %c0_314] : memref<8x2xf32, #tpu.memory_space<vmem>>, vector<8x2xf32>
    %275 = vector.broadcast %273 : vector<8x1xf32> to vector<8x2xf32>
    %276 = arith.mulf %274, %275 : vector<8x2xf32>
    %cst_315 = arith.constant dense<0.000000e+00> : vector<2xf32>
    %277 = vector.multi_reduction <add>, %276, %cst_315 [0] : vector<8x2xf32> to vector<2xf32>
    %278 = vector.shape_cast %277 : vector<2xf32> to vector<1x2xf32>
    %cst_316 = arith.constant 0.000000e+00 : f32
    %279 = vector.broadcast %cst_316 : f32 to vector<1x2xf32>
    %280 = arith.maximumf %278, %279 : vector<1x2xf32>
    %c0_317 = arith.constant 0 : index
    %c0_318 = arith.constant 0 : index
    %281 = vector.load %arg15[%c0_317, %c0_318] : memref<1x2xf32, #tpu.memory_space<vmem>>, vector<1x2xf32>
    %282 = arith.mulf %280, %281 : vector<1x2xf32>
    %cst_319 = arith.constant dense<0.000000e+00> : vector<1xf32>
    %283 = vector.multi_reduction <add>, %282, %cst_319 [1] : vector<1x2xf32> to vector<1xf32>
    %284 = vector.shape_cast %283 : vector<1xf32> to vector<1x1xf32>
    %cst_320 = arith.constant 0.000000e+00 : f32
    %285 = vector.broadcast %cst_320 : f32 to vector<1x1xf32>
    %286 = arith.maximumf %284, %285 : vector<1x1xf32>
    %cst_321 = arith.constant 0.000000e+00 : f32
    %287 = vector.broadcast %cst_321 : f32 to vector<1x1xf32>
    %288 = arith.subf %287, %286 : vector<1x1xf32>
    %289 = math.exp %288 : vector<1x1xf32>
    %cst_322 = arith.constant 1.000000e+00 : f32
    %290 = vector.broadcast %cst_322 : f32 to vector<1x1xf32>
    %291 = arith.addf %290, %289 : vector<1x1xf32>
    %292 = tpu.reciprocal %291 {approx = true} : vector<1x1xf32> -> vector<1x1xf32>
    %293 = vector.broadcast %292 : vector<1x1xf32> to vector<8x512xf32>
    %294 = arith.mulf %269, %293 : vector<8x512xf32>
    %295 = arith.addf %227, %294 : vector<8x512xf32>
    %c0_323 = arith.constant 0 : index
    %c0_324 = arith.constant 0 : index
    %c0_325 = arith.constant 0 : index
    %296 = vector.load %arg16[%c0_323, %c0_324, %c0_325] : memref<1x8x512xf32, #tpu.memory_space<vmem>>, vector<1x8x512xf32>
    %297 = vector.shape_cast %296 : vector<1x8x512xf32> to vector<8x512xf32>
    %298 = vector.shape_cast %295 : vector<8x512xf32> to vector<1x8x512xf32>
    tpu.vector_store %arg16[%c0_323, %c0_324, %c0_325], %298 {strides = array<i32>} : memref<1x8x512xf32, #tpu.memory_space<vmem>>, vector<1x8x512xf32>,
    return
  }
  func.func @transform_0(%arg0: i32) -> (i32, i32, i32) {
    %c0_i32 = arith.constant 0 : i32
    %c0_i32_0 = arith.constant 0 : i32
    %c0_i32_1 = arith.constant 0 : i32
    return %arg0, %c0_i32, %c0_i32_0 : i32, i32, i32
  }
  func.func @transform_1(%arg0: i32) -> (i32, i32, i32) {
    %c0_i32 = arith.constant 0 : i32
    %c0_i32_0 = arith.constant 0 : i32
    %c0_i32_1 = arith.constant 0 : i32
    return %arg0, %c0_i32, %c0_i32_0 : i32, i32, i32
  }
  func.func @transform_2(%arg0: i32) -> (i32, i32) {
    %c0_i32 = arith.constant 0 : i32
    %c0_i32_0 = arith.constant 0 : i32
    %c0_i32_1 = arith.constant 0 : i32
    return %c0_i32, %c0_i32_0 : i32, i32
  }
  func.func @transform_3(%arg0: i32) -> (i32, i32) {
    %c0_i32 = arith.constant 0 : i32
    %c0_i32_0 = arith.constant 0 : i32
    %c0_i32_1 = arith.constant 0 : i32
    return %c0_i32, %c0_i32_0 : i32, i32
  }
  func.func @transform_4(%arg0: i32) -> (i32, i32) {
    %c0_i32 = arith.constant 0 : i32
    %c0_i32_0 = arith.constant 0 : i32
    %c0_i32_1 = arith.constant 0 : i32
    return %c0_i32, %c0_i32_0 : i32, i32
  }
  func.func @transform_5(%arg0: i32) -> (i32, i32) {
    %c0_i32 = arith.constant 0 : i32
    %c0_i32_0 = arith.constant 0 : i32
    %c0_i32_1 = arith.constant 0 : i32
    return %c0_i32, %c0_i32_0 : i32, i32
  }
  func.func @transform_6(%arg0: i32) -> (i32, i32) {
    %c0_i32 = arith.constant 0 : i32
    %c0_i32_0 = arith.constant 0 : i32
    %c0_i32_1 = arith.constant 0 : i32
    return %c0_i32, %c0_i32_0 : i32, i32
  }
  func.func @transform_7(%arg0: i32) -> (i32, i32) {
    %c0_i32 = arith.constant 0 : i32
    %c0_i32_0 = arith.constant 0 : i32
    %c0_i32_1 = arith.constant 0 : i32
    return %c0_i32, %c0_i32_0 : i32, i32
  }
  func.func @transform_8(%arg0: i32) -> (i32, i32) {
    %c0_i32 = arith.constant 0 : i32
    %c0_i32_0 = arith.constant 0 : i32
    %c0_i32_1 = arith.constant 0 : i32
    return %c0_i32, %c0_i32_0 : i32, i32
  }
  func.func @transform_9(%arg0: i32) -> (i32, i32) {
    %c0_i32 = arith.constant 0 : i32
    %c0_i32_0 = arith.constant 0 : i32
    %c0_i32_1 = arith.constant 0 : i32
    return %c0_i32, %c0_i32_0 : i32, i32
  }
  func.func @transform_10(%arg0: i32) -> (i32, i32) {
    %c0_i32 = arith.constant 0 : i32
    %c0_i32_0 = arith.constant 0 : i32
    %c0_i32_1 = arith.constant 0 : i32
    return %c0_i32, %c0_i32_0 : i32, i32
  }
  func.func @transform_11(%arg0: i32) -> (i32, i32) {
    %c0_i32 = arith.constant 0 : i32
    %c0_i32_0 = arith.constant 0 : i32
    %c0_i32_1 = arith.constant 0 : i32
    return %c0_i32, %c0_i32_0 : i32, i32
  }
  func.func @transform_12(%arg0: i32) -> (i32, i32) {
    %c0_i32 = arith.constant 0 : i32
    %c0_i32_0 = arith.constant 0 : i32
    %c0_i32_1 = arith.constant 0 : i32
    return %c0_i32, %c0_i32_0 : i32, i32
  }
  func.func @transform_13(%arg0: i32) -> (i32, i32) {
    %c0_i32 = arith.constant 0 : i32
    %c0_i32_0 = arith.constant 0 : i32
    %c0_i32_1 = arith.constant 0 : i32
    return %c0_i32, %c0_i32_0 : i32, i32
  }
  func.func @transform_14(%arg0: i32) -> (i32, i32) {
    %c0_i32 = arith.constant 0 : i32
    %c0_i32_0 = arith.constant 0 : i32
    %c0_i32_1 = arith.constant 0 : i32
    return %c0_i32, %c0_i32_0 : i32, i32
  }
  func.func @transform_15(%arg0: i32) -> (i32, i32, i32) {
    %c0_i32 = arith.constant 0 : i32
    %c0_i32_0 = arith.constant 0 : i32
    %c0_i32_1 = arith.constant 0 : i32
    return %arg0, %c0_i32, %c0_i32_0 : i32, i32, i32
  }
}

</mosaic_0001>

<bundles_post_ra>
// kernel: counter_attention_forward.1
= control target key start
LH: loop header
LB: loop body
LE: loop exit
PB: predicated region body
PF: predicated region fallthrough
CT: control target
= control target key end

     0   :  { %s5787_s18 = smov 0   ;;  %s7662_s0 = inlined_call_operand.vmem [shape: f32[2,8,512], index: 0, kind: input, shape index: {}]   ;;  %s7663_s1 = inlined_call_operand.vmem [shape: f32[2,8,512], index: 1, kind: input, shape index: {}]   ;;  %s7664_s2 = inlined_call_operand.vmem [shape: f32[1,512], index: 2, kind: input, shape index: {}]   ;;  %s7665_s3 = inlined_call_operand.vmem [shape: bf16[32,200], index: 3, kind: input, shape index: {}]   ;;  %s7666_s4 = inlined_call_operand.vmem [shape: bf16[32,200], index: 4, kind: input, shape index: {}]   ;;  %s7667_s5 = inlined_call_operand.vmem [shape: f32[32,2], index: 5, kind: input, shape index: {}]   ;;  %s7668_s6 = inlined_call_operand.vmem [shape: f32[32,2], index: 6, kind: input, shape index: {}]   ;;  %s7669_s7 = inlined_call_operand.vmem [shape: bf16[8,216], index: 7, kind: input, shape index: {}]   ;;  %s7670_s8 = inlined_call_operand.vmem [shape: bf16[8,216], index: 8, kind: input, shape index: {}]   ;;  %s7671_s9 = inlined_call_operand.vmem [shape: f32[8,2], index: 9, kind: input, shape index: {}]   ;;  %s7672_s10 = inlined_call_operand.vmem [shape: f32[8,2], index: 10, kind: input, shape index: {}]   ;;  %s7673_s11 = inlined_call_operand.vmem [shape: f32[8,2], index: 11, kind: input, shape index: {}]   ;;  %s7674_s12 = inlined_call_operand.vmem [shape: f32[1,2], index: 12, kind: input, shape index: {}]   ;;  %s7675_s13 = inlined_call_operand.vmem [shape: f32[8,2], index: 13, kind: input, shape index: {}]   ;;  %s7676_s14 = inlined_call_operand.vmem [shape: f32[1,2], index: 14, kind: input, shape index: {}]   ;;  %s7677_s15 = inlined_call_operand.vmem [shape: f32[2,8,512], index: 15, kind: output, shape index: {}]  }
   0x1   :  { %7784 = sst [smem:[#allocation62_spill]] %s7662_s0 }
   0x2   :  { %7785 = sst [smem:[#allocation63_spill]] %s7663_s1 }
   0x3 LB: > { %s5187_s19 = sadd.s32 4294967295, %s5679_s18   ;;  %p5191_p0 = scmp.ge.s32.totalorder %s5679_s18, 1  ;;  %s5679_s18 = sphi %s5787_s18, %s25_s18  }
   0x4   : > { %p447_p1 = scmp.lt.s32.totalorder %s5679_s18, 3 }
   0x6   : > { %p448_p2 = pnand %p5191_p0, %p447_p1 }
   0x8   : > { %451 = sbr.rel (%p448_p2) target bundleno = 1922 (0x782), region = 80 }
   0xf   : > { %p5795_p3 = scmp.lt.s32.totalorder %s5187_s19, 1  ;;  %v7734_v0 = vmov 0   ;;  %s7787_s0 = sld [smem:[#allocation62_spill]]  ;;  %vm586_vm0 = vcmask 1043456   ;;  %vm588_vm1 = vcmask 343040   ;;  %vm612_vm2 = vcmask 334848  }
  0x10   : > { %516 = vst [vmem:[#allocation2] sm:$0xf] %v7734_v0  ;;  %517 = vst [vmem:[#allocation2 + $0x14] sm:$0xf] %v7734_v0  ;;  %5518 = vset.pattern.permute.xlu1 %v7734_v0  ;;  %5517 = vset.pattern.permute.xlu0 %v7734_v0  ;;  %s5682_s25 = smov 42   ;;  %s7714_s26 = smov 41  }
  0x11   : > { %540 = vst [vmem:[#allocation3] sm:$0xf] %v7734_v0  ;;  %541 = vst [vmem:[#allocation3 + $0x14] sm:$0xf] %v7734_v0  ;;  %s7989_s19 = smov (!%p5795_p3, %s5187_s19), 1  ;;  %s7712_s27 = smov 40  }
  0x12   : > { %564 = vst [vmem:[#allocation4] sm:$0xf] %v7734_v0  ;;  %565 = vst [vmem:[#allocation4 + $0x18] sm:$0xf] %v7734_v0  ;;  %s5813_s21 = sshll.u32 %s7989_s19, 5  ;;  %s7710_s28 = smov 39  }
  0x13   : > { %566 = vst [vmem:[#allocation4 + $0x30] sm:$0xf] %v7734_v0  ;;  %567 = vst [vmem:[#allocation4 + $0x14] sm:$0xf] %v7734_v0  ;;  %s7704_s29 = smov 38   ;;  %s7694_s30 = smov 22  }
  0x14   : > { %568 = vst [vmem:[#allocation4 + $0x2c] sm:$0xf] %v7734_v0  ;;  %569 = vst [vmem:[#allocation4 + $0x44] sm:$0xf] %v7734_v0  ;;  %s7692_s16 = smov 21   ;;  %s7688_s17 = smov 20  }
  0x15   : > { %s5819_s24 = scalar_lea.vmem %s7787_s0, %s5813_s21  ;;  %s7678_s19 = smov 19   ;;  %vm636_vm3 = vcmask 326656   ;;  %vm660_vm4 = vcmask 318464   ;;  %vm1478_vm5 = vcmask 588800   ;;  %vm7721_vm6 = vcmask 310272  }
  0x16   : > { %v520_v1 = vld [vmem:[%s5819_s24 + $0x10] sm:$0xff]  ;;  %v521_v2 = vld [vmem:[%s5819_s24 + $0x18] sm:$0xff]  ;;  %v518_v3 = vld [vmem:[%s5819_s24] sm:$0xff]  ;;  %s7680_s20 = smov 18   ;;  %s7684_s22 = smov 2   ;;  %vm7720_vm7 = vcmask 179200  }
  0x17   : > { %v5824_v4 = vpack.c.bf16 %v521_v2, %v520_v1  ;;  %v519_v5 = vld [vmem:[%s5819_s24 + $0x8] sm:$0xff]  ;;  %s7682_s23 = smov 1   ;;  %v866_v21 = vld [vmem:[#allocation2 + $0x14] sm:$0xf]  ;;  %s7788_s1 = sld [smem:[#allocation63_spill]]  ;;  %vm732_vm8 = vcmask 171008  }
  0x18   : > { %v5827_v6 = vpack.c.bf16 %v519_v5, %v518_v3  ;;  %v890_v22 = vld [vmem:[#allocation2 + $0x14] sm:$0xf]  ;;  %v5573_v3 = vld [vmem:[%s7665_s3 + $0x4] ss:$8 sps:$4 sm:$0xff]   ;;  %vm756_vm9 = vcmask 162816   ;;  %vm780_vm10 = vcmask 154624  }
  0x19   : > { %539 = vst [vmem:[#allocation2 + $0xc] sm:$0xff] %v5824_v4  ;;  %v914_v23 = vld [vmem:[#allocation2 + $0x14] sm:$0xf]  ;;  %5259 = vmatprep.mubr.msk.bf16.mxu0 %vm1478_vm5, %v5573_v3  ;;  %5262 = vmatprep.mubr.msk.bf16.mxu1 %vm1478_vm5, %v5573_v3  ;;  %vm7717_vm11 = vcmask 146432   ;;  %vm7716_vm12 = vcmask 15360   ;;  %vm852_vm13 = vcmask 7168  }
  0x1a   : > { %538 = vst [vmem:[#allocation2 + $0x4] sm:$0xff] %v5827_v6  ;;  %v938_v24 = vld [vmem:[#allocation2 + $0x14] sm:$0xf]  ;;  %vm880_vm14 = vcmask 1039360   ;;  %vm7718_vm15 = vcmask 1031168  }
  0x1b   : > { %v962_v25 = vld [vmem:[#allocation2 + $0x14] sm:$0xf] }
  0x1c   : > { %v986_v26 = vld [vmem:[#allocation2 + $0x14] sm:$0xf] }
  0x1d   : > { %v1010_v27 = vld [vmem:[#allocation2 + $0x14] sm:$0xf] }
  0x1e   : > { %v1034_v28 = vld [vmem:[#allocation2 + $0x14] sm:$0xf] }
  0x1f   : > { %v1058_v37 = vld [vmem:[#allocation2 + $0x14] sm:$0xf] }
  0x20   : > { %v573_v7 = vld [vmem:[#allocation2 + $0x10] sm:$0xf]  ;;  %v1082_v44 = vld [vmem:[#allocation2 + $0x14] sm:$0xf] }
  0x21   : > { %581 = vrot.lane.b32.xlu1 %v573_v7, %s5682_s25  ;;  %v571_v8 = vld [vmem:[#allocation2] sm:$0xff]  ;;  %v572_v9 = vld [vmem:[#allocation2 + $0x8] sm:$0xff]  ;;  %v598_v10 = vld [vmem:[#allocation2 + $0x10] sm:$0xf] }
  0x22   : > { %577 = vrot.lane.b32.xlu0 %v571_v8, %s5682_s25  ;;  %v622_v11 = vld [vmem:[#allocation2 + $0x10] sm:$0xf]  ;;  %v1106_v63 = vld [vmem:[#allocation2 + $0x14] sm:$0xf] }
  0x23   : > { %v646_v12 = vld [vmem:[#allocation2 + $0x10] sm:$0xf] }
  0x24   : > { %v670_v13 = vld [vmem:[#allocation2 + $0x10] sm:$0xf] }
  0x25   : > { %602 = vrot.lane.b32.xlu1 %v571_v8, %s7714_s26  ;;  %v694_v14 = vld [vmem:[#allocation2 + $0x10] sm:$0xf] }
  0x26   : > { %579 = vrot.lane.b32.xlu0 %v572_v9, %s5682_s25  ;;  %v718_v15 = vld [vmem:[#allocation2 + $0x10] sm:$0xf] }
  0x27   : > { %v742_v16 = vld [vmem:[#allocation2 + $0x10] sm:$0xf] }
  0x28   : > { %v766_v17 = vld [vmem:[#allocation2 + $0x10] sm:$0xf] }
  0x29   : > { %606 = vrot.lane.b32.xlu1 %v598_v10, %s7714_s26  ;;  %v790_v18 = vld [vmem:[#allocation2 + $0x10] sm:$0xf]  ;;  %v1130_v10 = vld [vmem:[#allocation2 + $0x14] sm:$0xf] }
  0x2a   : > { %604 = vrot.lane.b32.xlu0 %v572_v9, %s7714_s26  ;;  %v814_v19 = vld [vmem:[#allocation2 + $0x10] sm:$0xf]  ;;  %s5959_s26 = scalar_lea.vmem %s7788_s1, %s5813_s21 }
  0x2b   : > { %v838_v20 = vld [vmem:[#allocation2 + $0x10] sm:$0xf] }
  0x2d   : > { %628 = vrot.lane.b32.xlu1 %v572_v9, %s7712_s27 }
  0x2e   : > { %626 = vrot.lane.b32.xlu0 %v571_v8, %s7712_s27 }
  0x31   : > { %650 = vrot.lane.b32.xlu1 %v571_v8, %s7710_s28 }
  0x32   : > { %630 = vrot.lane.b32.xlu0 %v622_v11, %s7712_s27  ;;  %s7794_s27 = smov 21  }
  0x35   : > { %654 = vrot.lane.b32.xlu1 %v646_v12, %s7710_s28 }
  0x36   : > { %652 = vrot.lane.b32.xlu0 %v572_v9, %s7710_s28  ;;  %s7795_s28 = smov 20  }
  0x39   : > { %676 = vrot.lane.b32.xlu1 %v572_v9, %s7704_s29 }
  0x3a   : > { %674 = vrot.lane.b32.xlu0 %v571_v8, %s7704_s29 }
  0x3d   : > { %698 = vrot.lane.b32.xlu1 %v571_v8, %s7694_s30 }
  0x3e   : > { %678 = vrot.lane.b32.xlu0 %v670_v13, %s7704_s29  ;;  %s7706_s29 = smov 86  }
  0x41   : > { %702 = vrot.lane.b32.xlu1 %v694_v14, %s7694_s30 }
  0x42   : > { %700 = vrot.lane.b32.xlu0 %v572_v9, %s7694_s30  ;;  %s7698_s30 = smov 89  }
  0x45   : > { %724 = vrot.lane.b32.xlu1 %v572_v9, %s7692_s16 }
  0x46   : > { %722 = vrot.lane.b32.xlu0 %v571_v8, %s7692_s16 }
  0x49   : > { %746 = vrot.lane.b32.xlu1 %v571_v8, %s7688_s17 }
  0x4a   : > { %726 = vrot.lane.b32.xlu0 %v718_v15, %s7692_s16  ;;  %s7696_s16 = smov 90  }
  0x4d   : > { %750 = vrot.lane.b32.xlu1 %v742_v16, %s7688_s17 }
  0x4e   : > { %748 = vrot.lane.b32.xlu0 %v572_v9, %s7688_s17  ;;  %s7726_s17 = smov 107  }
  0x51   : > { %772 = vrot.lane.b32.xlu1 %v572_v9, %s7678_s19 }
  0x52   : > { %770 = vrot.lane.b32.xlu0 %v571_v8, %s7678_s19 }
  0x55   : > { %794 = vrot.lane.b32.xlu1 %v571_v8, %s7680_s20 }
  0x56   : > { %774 = vrot.lane.b32.xlu0 %v766_v17, %s7678_s19  ;;  %s7763_s19 = smov 127  }
  0x59   : > { %798 = vrot.lane.b32.xlu1 %v790_v18, %s7680_s20 }
  0x5a   : > { %796 = vrot.lane.b32.xlu0 %v572_v9, %s7680_s20  ;;  %s7686_s20 = smov 126  }
  0x5d   : > { %820 = vrot.lane.b32.xlu1 %v572_v9, %s7684_s22 }
  0x5e   : > { %818 = vrot.lane.b32.xlu0 %v571_v8, %s7684_s22 }
  0x61   : > { %842 = vrot.lane.b32.xlu1 %v571_v8, %s7682_s23 }
  0x62   : > { %822 = vrot.lane.b32.xlu0 %v814_v19, %s7684_s22  ;;  %s7730_s22 = smov 109  }
  0x65   : > { %846 = vrot.lane.b32.xlu1 %v838_v20, %s7682_s23 }
  0x66   : > { %844 = vrot.lane.b32.xlu0 %v572_v9, %s7682_s23  ;;  %s7690_s23 = smov 110  }
  0x69   : > { %872 = vrot.lane.b32.xlu1 %v5824_v4, %s7763_s19 }
  0x6a   : > { %870 = vrot.lane.b32.xlu0 %v5827_v6, %s7763_s19 }
  0x6d   : > { %894 = vrot.lane.b32.xlu1 %v5827_v6, %s7686_s20 }
  0x6e   : > { %874 = vrot.lane.b32.xlu0 %v866_v21, %s7763_s19 }
  0x71   : > { %898 = vrot.lane.b32.xlu1 %v890_v22, %s7686_s20 }
  0x72   : > { %896 = vrot.lane.b32.xlu0 %v5824_v4, %s7686_s20  ;;  %s7728_s20 = smov 108  }
  0x75   : > { %920 = vrot.lane.b32.xlu1 %v5824_v4, %s7690_s23 }
  0x76   : > { %918 = vrot.lane.b32.xlu0 %v5827_v6, %s7690_s23 }
  0x79   : > { %942 = vrot.lane.b32.xlu1 %v5827_v6, %s7730_s22 }
  0x7a   : > { %922 = vrot.lane.b32.xlu0 %v914_v23, %s7690_s23  ;;  %s7702_s23 = smov 106  }
  0x7d   : > { %946 = vrot.lane.b32.xlu1 %v938_v24, %s7730_s22 }
  0x7e   : > { %944 = vrot.lane.b32.xlu0 %v5824_v4, %s7730_s22 }
  0x81   : > { %968 = vrot.lane.b32.xlu1 %v5824_v4, %s7728_s20 }
  0x82   : > { %966 = vrot.lane.b32.xlu0 %v5827_v6, %s7728_s20 }
  0x85   : > { %990 = vrot.lane.b32.xlu1 %v5827_v6, %s7726_s17 }
  0x86   : > { %970 = vrot.lane.b32.xlu0 %v962_v25, %s7728_s20 }
  0x89   : > { %994 = vrot.lane.b32.xlu1 %v986_v26, %s7726_s17 }
  0x8a   : > { %992 = vrot.lane.b32.xlu0 %v5824_v4, %s7726_s17 }
  0x8d   : > { %1016 = vrot.lane.b32.xlu1 %v5824_v4, %s7702_s23 }
  0x8e   : > { %1014 = vrot.lane.b32.xlu0 %v5827_v6, %s7702_s23 }
  0x91   : > { %1038 = vrot.lane.b32.xlu1 %v5827_v6, %s7696_s16 }
  0x92   : > { %1018 = vrot.lane.b32.xlu0 %v1010_v27, %s7702_s23  ;;  %s7793_s23 = smov 22  }
  0x93   : > { %v582_v29 = vpop.permute.xlu1 %581 }
  0x94   : > { %v578_v30 = vpop.permute.xlu0 %577  ;;  %v585_v34 = vrot.slane %v582_v29, 4 }
  0x95   : > { %1042 = vrot.lane.b32.xlu1 %v1034_v28, %s7696_s16  ;;  %v583_v35 = vrot.slane %v578_v30, 4 }
  0x96   : > { %1040 = vrot.lane.b32.xlu0 %v5824_v4, %s7696_s16  ;;  %s7700_s16 = smov 88  }
  0x97   : > { %v603_v31 = vpop.permute.xlu1 %602 }
  0x98   : > { %v580_v32 = vpop.permute.xlu0 %579  ;;  %v608_v40 = vrot.slane %v603_v31, 4 }
  0x99   : > { %v584_v33 = vrot.slane %v580_v32, 4  ;;  %1064 = vrot.lane.b32.xlu1 %v5824_v4, %s7698_s30 }
  0x9a   : > { %1062 = vrot.lane.b32.xlu0 %v5827_v6, %s7698_s30 }
  0x9b   : > { %v607_v36 = vpop.permute.xlu1 %606  ;;  %v587_v42 = vsel %vm586_vm0, %v583_v35, %v584_v33  ;;  %v590_v43 = vsel %vm586_vm0, %v584_v33, %v585_v34 }
  0x9c   : > { %v610_v38 = vrot.slane %v607_v36, 4  ;;  %v605_v39 = vpop.permute.xlu0 %604  ;;  %v589_v49 = vsel %vm588_vm1, %v578_v30, %v587_v42  ;;  %v591_v51 = vsel %vm588_vm1, %v580_v32, %v590_v43  ;;  %v1153_v30 = vld [vmem:[%s7667_s5 + $0x8] sm:$0xff]  ;;  %v542_v36 = vld [vmem:[%s5959_s26] sm:$0xff] }
  0x9d   : > { %v609_v41 = vrot.slane %v605_v39, 4  ;;  %1086 = vrot.lane.b32.xlu1 %v5827_v6, %s7700_s16 }
  0x9e   : > { %1066 = vrot.lane.b32.xlu0 %v1058_v37, %s7698_s30  ;;  %s7708_s30 = smov 87  }
  0x9f   : > { %v629_v45 = vpop.permute.xlu1 %628  ;;  %v611_v46 = vsel %vm586_vm0, %v608_v40, %v609_v41  ;;  %v614_v47 = vsel %vm586_vm0, %v609_v41, %v610_v38  ;;  %v2073_v38 = vld [vmem:[#allocation4 + $0x14] sm:$0xf]  ;;  %v543_v40 = vld [vmem:[%s5959_s26 + $0x8] sm:$0xff] }
  0xa0   : > { %v627_v48 = vpop.permute.xlu0 %626  ;;  %v613_v50 = vsel %vm612_vm2, %v603_v31, %v611_v46  ;;  %v615_v52 = vsel %vm612_vm2, %v605_v39, %v614_v47  ;;  %v633_v59 = vrot.slane %v629_v45, 4  ;;  %v1152_v31 = vld [vmem:[%s7667_s5] sm:$0xff]  ;;  %v2076_v39 = vld [vmem:[#allocation4 + $0x2c] sm:$0xf]  ;;  %v5964_v41 = vpack.c.bf16 %v543_v40, %v542_v36 }
  0xa1   : > { %1090 = vrot.lane.b32.xlu1 %v1082_v44, %s7700_s16  ;;  %v5207_v53 = vcombine.high %v589_v49, %v613_v50  ;;  %v5209_v54 = vcombine.high %v591_v51, %v615_v52  ;;  %v5206_v55 = vcombine.low %v589_v49, %v613_v50  ;;  %v5208_v56 = vcombine.low %v591_v51, %v615_v52  ;;  %v544_v52 = vld [vmem:[%s5959_s26 + $0x10] sm:$0xff] }
  0xa2   : > { %1088 = vrot.lane.b32.xlu0 %v5824_v4, %s7700_s16  ;;  %v632_v60 = vrot.slane %v627_v48, 4  ;;  %v7732_v50 = vmov 1   ;;  %v5523_v51 = vpack.i.bf16 %v2076_v39, %v2073_v38  ;;  %562 = vst [vmem:[#allocation3 + $0x4] sm:$0xff] %v5964_v41  ;;  %v2148_v38 = vld [vmem:[#allocation4 + $0x44] sm:$0xf]  ;;  %s7792_s16 = smov 38  }
  0xa3   : > { %1498 = vmatprep.subr.bf16.mxu0 %v5207_v53  ;;  %1551 = vmatprep.subr.bf16.mxu1 %v5209_v54  ;;  %v651_v57 = vpop.permute.xlu1 %650 }
  0xa4   : > { %1499 = vmatpush1.bf16.msra.mxu0 %v5206_v55  ;;  %1552 = vmatpush1.bf16.msra.mxu1 %v5208_v56  ;;  %v631_v58 = vpop.permute.xlu0 %630  ;;  %v635_v5 = vsel %vm586_vm0, %v632_v60, %v633_v59  ;;  %v656_v7 = vrot.slane %v651_v57, 4  ;;  %v545_v56 = vld [vmem:[%s5959_s26 + $0x18] sm:$0xff] }
  0xa5   : > { %v634_v61 = vrot.slane %v631_v58, 4  ;;  %1112 = vrot.lane.b32.xlu1 %v5824_v4, %s7708_s30  ;;  %v637_v14 = vsel %vm636_vm3, %v627_v48, %v635_v5  ;;  %v2142_v58 = vld [vmem:[#allocation4 + $0x14] sm:$0xf]  ;;  %v5977_v60 = vpack.c.bf16 %v545_v56, %v544_v52 }
  0xa6   : > { %1110 = vrot.lane.b32.xlu0 %v5827_v6, %s7708_s30 }
  0xa7   : > { %v655_v62 = vpop.permute.xlu1 %654  ;;  %v638_v8 = vsel %vm586_vm0, %v633_v59, %v634_v61  ;;  %v2145_v59 = vld [vmem:[#allocation4 + $0x2c] sm:$0xf]  ;;  %563 = vst [vmem:[#allocation3 + $0xc] sm:$0xff] %v5977_v60 }
  0xa8   : > { %v658_v1 = vrot.slane %v655_v62, 4  ;;  %v653_v2 = vpop.permute.xlu0 %652  ;;  %v639_v18 = vsel %vm636_vm3, %v629_v45, %v638_v8  ;;  %v1154_v62 = vld [vmem:[%s7667_s5 + $0x10] sm:$0xff]  ;;  %v2214_v8 = vld [vmem:[#allocation4 + $0x2c] sm:$0xf] }
  0xa9   : > { %v657_v9 = vrot.slane %v653_v2, 4  ;;  %1134 = vrot.lane.b32.xlu1 %v5827_v6, %s7706_s29  ;;  %v5998_v39 = vld [vmem:[#allocation3] sm:$0xff] }
  0xaa   : > { %1114 = vrot.lane.b32.xlu0 %v1106_v63, %s7708_s30  ;;  %s7790_s30 = smov 40  }
  0xab   : > { %v662_v11 = vsel %vm586_vm0, %v657_v9, %v658_v1  ;;  %v677_v12 = vpop.permute.xlu1 %676  ;;  %v659_v13 = vsel %vm586_vm0, %v656_v7, %v657_v9  ;;  %v2211_v1 = vld [vmem:[#allocation4 + $0x14] sm:$0xf]  ;;  %v5528_v7 = vpack.i.bf16 %v2145_v59, %v2142_v58 }
  0xac   : > { %v663_v15 = vsel %vm660_vm4, %v653_v2, %v662_v11  ;;  %v675_v16 = vpop.permute.xlu0 %674  ;;  %v661_v17 = vsel %vm660_vm4, %v651_v57, %v659_v13  ;;  %v681_v23 = vrot.slane %v677_v12, 4 }
  0xad   : > { %1138 = vrot.lane.b32.xlu1 %v1130_v10, %s7706_s29  ;;  %v5211_v19 = vcombine.high %v637_v14, %v661_v17  ;;  %v5213_v20 = vcombine.high %v639_v18, %v663_v15  ;;  %v5210_v21 = vcombine.low %v637_v14, %v661_v17  ;;  %v5212_v22 = vcombine.low %v639_v18, %v663_v15  ;;  %v2280_v17 = vld [vmem:[#allocation4 + $0x14] sm:$0xf]  ;;  %v2283_v18 = vld [vmem:[#allocation4 + $0x2c] sm:$0xf] }
  0xae   : > { %1136 = vrot.lane.b32.xlu0 %v5824_v4, %s7706_s29  ;;  %v680_v24 = vrot.slane %v675_v16, 4  ;;  %s7789_s29 = smov 41  }
  0xaf   : > { %1500 = vmatprep.subr.bf16.mxu0 %v5211_v19  ;;  %1553 = vmatprep.subr.bf16.mxu1 %v5213_v20  ;;  %v699_v25 = vpop.permute.xlu1 %698 }
  0xb0   : > { %1501 = vmatpush1.bf16.msra.mxu0 %v5210_v21  ;;  %1554 = vmatpush1.bf16.msra.mxu1 %v5212_v22  ;;  %v679_v26 = vpop.permute.xlu0 %678  ;;  %v683_v28 = vsel %vm586_vm0, %v680_v24, %v681_v23  ;;  %v704_v32 = vrot.slane %v699_v25, 4 }
  0xb1   : > { %v682_v27 = vrot.slane %v679_v26, 4  ;;  %1611 = vperm.xlu1 %5518, %v1153_v30   ;;  %v685_v42 = vsel %vm7721_vm6, %v675_v16, %v683_v28 }
  0xb2   : > { %1606 = vperm.xlu0 %5517, %v1152_v31  }
  0xb3   : > { %v703_v29 = vpop.permute.xlu1 %702  ;;  %v686_v33 = vsel %vm586_vm0, %v681_v23, %v682_v27 }
  0xb4   : > { %v706_v34 = vrot.slane %v703_v29, 4  ;;  %v701_v35 = vpop.permute.xlu0 %700  ;;  %v687_v46 = vsel %vm7721_vm6, %v677_v12, %v686_v33  ;;  %v5533_v12 = vpack.i.bf16 %v2214_v8, %v2211_v1  ;;  %v2286_v1 = vld [vmem:[#allocation4 + $0x44] sm:$0xf]  ;;  %v6014_v8 = vld [vmem:[#allocation3 + $0x8] sm:$0xff]  ;;  %vm7724_vm6 = vcmask 736256  }
  0xb5   : > { %v705_v37 = vrot.slane %v701_v35, 4  ;;  %5519 = vset.pattern.permute.xlu1 %v7732_v50 }
  0xb6   : > { %5520 = vset.pattern.permute.xlu0 %v7732_v50  ;;  %1641 = vperm.xlu1 %5519, %v1152_v31  }
  0xb7   : > { %v710_v43 = vsel %vm586_vm0, %v705_v37, %v706_v34  ;;  %v725_v44 = vpop.permute.xlu1 %724  ;;  %v707_v45 = vsel %vm586_vm0, %v704_v32, %v705_v37  ;;  %1645 = vperm.xlu0 %5520, %v1153_v30   ;;  %v5538_v30 = vpack.i.bf16 %v2283_v18, %v2280_v17  ;;  %v2079_v32 = vld [vmem:[#allocation4 + $0x44] sm:$0xf]  ;;  %v2862_v17 = vld [vmem:[#allocation3 + $0x10] sm:$0xf] }
  0xb8   : > { %v711_v47 = vsel %vm7720_vm7, %v701_v35, %v710_v43  ;;  %v723_v48 = vpop.permute.xlu0 %722  ;;  %v709_v49 = vsel %vm7720_vm7, %v699_v25, %v707_v45  ;;  %v729_v2 = vrot.slane %v725_v44, 4  ;;  %vm7723_vm7 = vcmask 867328  }
  0xb9   : > { %v5215_v53 = vcombine.high %v685_v42, %v709_v49  ;;  %v5217_v54 = vcombine.high %v687_v46, %v711_v47  ;;  %v5214_v55 = vcombine.low %v685_v42, %v709_v49  ;;  %v5216_v57 = vcombine.low %v687_v46, %v711_v47  ;;  %v2816_v49 = vld [vmem:[#allocation3 + $0x10] sm:$0xf] }
  0xba   : > { %v728_v3 = vrot.slane %v723_v48, 4  ;;  %5521 = vset.pattern.permute.xlu1 %v7734_v0 }
  0xbb   : > { %1502 = vmatprep.subr.bf16.mxu0 %v5215_v53  ;;  %1555 = vmatprep.subr.bf16.mxu1 %v5217_v54  ;;  %v747_v61 = vpop.permute.xlu1 %746 }
  0xbc   : > { %1503 = vmatpush1.bf16.msra.mxu0 %v5214_v55  ;;  %1556 = vmatpush1.bf16.msra.mxu1 %v5216_v57  ;;  %v727_v63 = vpop.permute.xlu0 %726  ;;  %v731_v13 = vsel %vm586_vm0, %v728_v3, %v729_v2  ;;  %v752_v14 = vrot.slane %v747_v61, 4 }
  0xbd   : > { %v730_v5 = vrot.slane %v727_v63, 4  ;;  %5524 = vrot.lane.b32.xlu0 %v5523_v51, %s7763_s19  ;;  %1616 = vperm.xlu1 %5521, %v1154_v62   ;;  %v733_v22 = vsel %vm732_vm8, %v723_v48, %v731_v13  ;;  %v2217_v48 = vld [vmem:[#allocation4 + $0x44] sm:$0xf] }
  0xbf   : > { %v751_v9 = vpop.permute.xlu1 %750  ;;  %v734_v15 = vsel %vm586_vm0, %v729_v2, %v730_v5 }
  0xc0   : > { %v754_v10 = vrot.slane %v751_v9, 4  ;;  %v749_v11 = vpop.permute.xlu0 %748  ;;  %v735_v26 = vsel %vm732_vm8, %v725_v44, %v734_v15 }
  0xc1   : > { %v753_v16 = vrot.slane %v749_v11, 4  ;;  %5529 = vrot.lane.b32.xlu0 %v5528_v7, %s7730_s22  ;;  %5522 = vset.pattern.permute.xlu1 %v7732_v50 }
  0xc2   : > { %1649 = vperm.xlu1 %5522, %v1154_v62  }
  0xc3   : > { %v758_v19 = vsel %vm586_vm0, %v753_v16, %v754_v10  ;;  %v773_v20 = vpop.permute.xlu1 %772  ;;  %v755_v21 = vsel %vm586_vm0, %v752_v14, %v753_v16 }
  0xc4   : > { %v759_v23 = vsel %vm756_vm9, %v749_v11, %v758_v19  ;;  %v771_v24 = vpop.permute.xlu0 %770  ;;  %v757_v25 = vsel %vm756_vm9, %v747_v61, %v755_v21  ;;  %v777_v35 = vrot.slane %v773_v20, 4 }
  0xc5   : > { %v5219_v27 = vcombine.high %v733_v22, %v757_v25  ;;  %v5221_v28 = vcombine.high %v735_v26, %v759_v23  ;;  %v5218_v29 = vcombine.low %v733_v22, %v757_v25  ;;  %5534 = vrot.lane.b32.xlu0 %v5533_v12, %s7728_s20  ;;  %v5220_v31 = vcombine.low %v735_v26, %v759_v23 }
  0xc6   : > { %v776_v36 = vrot.slane %v771_v24, 4  ;;  %2105 = vrot.lane.b32.xlu1 %v2079_v32, %s7763_s19  ;;  %v2839_v32 = vld [vmem:[#allocation3 + $0x10] sm:$0xf] }
  0xc7   : > { %1504 = vmatprep.subr.bf16.mxu0 %v5219_v27  ;;  %1557 = vmatprep.subr.bf16.mxu1 %v5221_v28  ;;  %v795_v33 = vpop.permute.xlu1 %794 }
  0xc8   : > { %1505 = vmatpush1.bf16.msra.mxu0 %v5218_v29  ;;  %1558 = vmatpush1.bf16.msra.mxu1 %v5220_v31  ;;  %v775_v34 = vpop.permute.xlu0 %774  ;;  %v779_v44 = vsel %vm586_vm0, %v776_v36, %v777_v35  ;;  %v800_v45 = vrot.slane %v795_v33, 4 }
  0xc9   : > { %v778_v37 = vrot.slane %v775_v34, 4  ;;  %5539 = vrot.lane.b32.xlu0 %v5538_v30, %s7726_s17  ;;  %5543 = vset.pattern.permute.xlu1 %v7734_v0  ;;  %v781_v54 = vsel %vm780_vm10, %v771_v24, %v779_v44 }
  0xca   : > { %2174 = vrot.lane.b32.xlu1 %v2148_v38, %s7730_s22  ;;  %s7814_s22 = smov 109  }
  0xcb   : > { %v799_v40 = vpop.permute.xlu1 %798  ;;  %v782_v46 = vsel %vm586_vm0, %v777_v35, %v778_v37 }
  0xcc   : > { %v802_v42 = vrot.slane %v799_v40, 4  ;;  %v797_v43 = vpop.permute.xlu0 %796  ;;  %v783_v58 = vsel %vm780_vm10, %v773_v20, %v782_v46 }
  0xcd   : > { %v801_v47 = vrot.slane %v797_v43, 4  ;;  %2820 = vrot.lane.b32.xlu0 %v5998_v39, %s5682_s25 }
  0xce   : > { %2243 = vrot.lane.b32.xlu1 %v2217_v48, %s7728_s20  ;;  %s7852_s20 = smov 90  }
  0xcf   : > { %v806_v51 = vsel %vm586_vm0, %v801_v47, %v802_v42  ;;  %v821_v52 = vpop.permute.xlu1 %820  ;;  %v803_v53 = vsel %vm586_vm0, %v800_v45, %v801_v47 }
  0xd0   : > { %v807_v55 = vsel %vm7717_vm11, %v797_v43, %v806_v51  ;;  %v819_v56 = vpop.permute.xlu0 %818  ;;  %v805_v57 = vsel %vm7717_vm11, %v795_v33, %v803_v53  ;;  %v825_v3 = vrot.slane %v821_v52, 4  ;;  %vm952_vm11 = vcmask 891904  }
  0xd1   : > { %v5223_v59 = vcombine.high %v781_v54, %v805_v57  ;;  %v5225_v61 = vcombine.high %v783_v58, %v807_v55  ;;  %v5222_v62 = vcombine.low %v781_v54, %v805_v57  ;;  %2824 = vrot.lane.b32.xlu0 %v2816_v49, %s5682_s25  ;;  %v5224_v63 = vcombine.low %v783_v58, %v807_v55 }
  0xd2   : > { %v824_v5 = vrot.slane %v819_v56, 4  ;;  %2312 = vrot.lane.b32.xlu1 %v2286_v1, %s7726_s17  ;;  %s7845_s17 = smov 110  }
  0xd3   : > { %1506 = vmatprep.subr.bf16.mxu0 %v5223_v59  ;;  %1559 = vmatprep.subr.bf16.mxu1 %v5225_v61  ;;  %v843_v2 = vpop.permute.xlu1 %842 }
  0xd4   : > { %1507 = vmatpush1.bf16.msra.mxu0 %v5222_v62  ;;  %1560 = vmatpush1.bf16.msra.mxu1 %v5224_v63  ;;  %v823_v7 = vpop.permute.xlu0 %822  ;;  %v827_v11 = vsel %vm586_vm0, %v824_v5, %v825_v3  ;;  %v848_v14 = vrot.slane %v843_v2, 4 }
  0xd5   : > { %v826_v9 = vrot.slane %v823_v7, 4  ;;  %2845 = vrot.lane.b32.xlu0 %v6014_v8, %s7789_s29  ;;  %v829_v18 = vsel %vm7716_vm12, %v819_v56, %v827_v11 }
  0xd6   : > { %2822 = vrot.lane.b32.xlu1 %v6014_v8, %s5682_s25  ;;  %s7791_s25 = smov 39  }
  0xd7   : > { %v847_v10 = vpop.permute.xlu1 %846  ;;  %v830_v15 = vsel %vm586_vm0, %v825_v3, %v826_v9 }
  0xd8   : > { %v850_v12 = vrot.slane %v847_v10, 4  ;;  %v845_v13 = vpop.permute.xlu0 %844  ;;  %v831_v26 = vsel %vm7716_vm12, %v821_v52, %v830_v15  ;;  %vm7719_vm12 = vcmask 900096   ;;  %v2954_v15 = vld [vmem:[#allocation3 + $0x10] sm:$0xf] }
  0xd9   : > { %v849_v16 = vrot.slane %v845_v13, 4  ;;  %2866 = vrot.lane.b32.xlu0 %v5998_v39, %s7790_s30 }
  0xda   : > { %2843 = vrot.lane.b32.xlu1 %v5998_v39, %s7789_s29 }
  0xdb   : > { %v854_v19 = vsel %vm586_vm0, %v849_v16, %v850_v12  ;;  %v873_v20 = vpop.permute.xlu1 %872  ;;  %v851_v21 = vsel %vm586_vm0, %v848_v14, %v849_v16 }
  0xdc   : > { %v855_v22 = vsel %vm852_vm13, %v845_v13, %v854_v19  ;;  %v877_v23 = vrot.slane %v873_v20, 4  ;;  %v871_v24 = vpop.permute.xlu0 %870  ;;  %v853_v25 = vsel %vm852_vm13, %v843_v2, %v851_v21 }
  0xdd   : > { %v876_v27 = vrot.slane %v871_v24, 4  ;;  %v5227_v28 = vcombine.high %v829_v18, %v853_v25  ;;  %v5229_v29 = vcombine.high %v831_v26, %v855_v22  ;;  %v5226_v30 = vcombine.low %v829_v18, %v853_v25  ;;  %2870 = vrot.lane.b32.xlu0 %v2862_v17, %s7790_s30 }
  0xde   : > { %v5228_v31 = vcombine.low %v831_v26, %v855_v22  ;;  %2847 = vrot.lane.b32.xlu1 %v2839_v32, %s7789_s29  ;;  %s7796_s29 = smov 19  }
  0xdf   : > { %v879_v33 = vsel %vm586_vm0, %v876_v27, %v877_v23  ;;  %1508 = vmatprep.subr.bf16.mxu0 %v5227_v28  ;;  %1561 = vmatprep.subr.bf16.mxu1 %v5229_v29  ;;  %v895_v34 = vpop.permute.xlu1 %894 }
  0xe0   : > { %v881_v35 = vsel %vm880_vm14, %v871_v24, %v879_v33  ;;  %1509 = vmatpush1.bf16.msra.mxu0 %v5226_v30  ;;  %1562 = vmatpush1.bf16.msra.mxu1 %v5228_v31  ;;  %v875_v36 = vpop.permute.xlu0 %874  ;;  %v900_v49 = vrot.slane %v895_v34, 4 }
  0xe1   : > { %v878_v37 = vrot.slane %v875_v36, 4  ;;  %v5231_v38 = vcombine.high %v5827_v6, %v881_v35  ;;  %v5230_v40 = vcombine.low %v5827_v6, %v881_v35  ;;  %2891 = vrot.lane.b32.xlu0 %v6014_v8, %s7791_s25  ;;  %v2908_v6 = vld [vmem:[#allocation3 + $0x10] sm:$0xf] }
  0xe2   : > { %2868 = vrot.lane.b32.xlu1 %v6014_v8, %s7790_s30  ;;  %s7797_s30 = smov 18  }
  0xe3   : > { %v882_v42 = vsel %vm586_vm0, %v877_v23, %v878_v37  ;;  %1510 = vmatprep.subr.bf16.mxu0 %v5231_v38  ;;  %v899_v43 = vpop.permute.xlu1 %898  ;;  %v2931_v23 = vld [vmem:[#allocation3 + $0x10] sm:$0xf] }
  0xe4   : > { %1511 = vmatpush1.bf16.msra.mxu0 %v5230_v40  ;;  %v897_v44 = vpop.permute.xlu0 %896  ;;  %v883_v45 = vsel %vm880_vm14, %v873_v20, %v882_v42  ;;  %v902_v54 = vrot.slane %v899_v43, 4  ;;  %v3000_v43 = vld [vmem:[#allocation3 + $0x10] sm:$0xf] }
  0xe5   : > { %v901_v46 = vrot.slane %v897_v44, 4  ;;  %v5233_v47 = vcombine.high %v5824_v4, %v883_v45  ;;  %v5232_v48 = vcombine.low %v5824_v4, %v883_v45  ;;  %2912 = vrot.lane.b32.xlu0 %v5998_v39, %s7792_s16  ;;  %v2885_v4 = vld [vmem:[#allocation3 + $0x10] sm:$0xf] }
  0xe6   : > { %2889 = vrot.lane.b32.xlu1 %v5998_v39, %s7791_s25 }
  0xe7   : > { %1563 = vmatprep.subr.bf16.mxu1 %v5233_v47  ;;  %v921_v51 = vpop.permute.xlu1 %920  ;;  %v903_v56 = vsel %vm586_vm0, %v900_v49, %v901_v46  ;;  %v906_v63 = vsel %vm586_vm0, %v901_v46, %v902_v54 }
  0xe8   : > { %v925_v52 = vrot.slane %v921_v51, 4  ;;  %1564 = vmatpush1.bf16.msra.mxu1 %v5232_v48  ;;  %v919_v53 = vpop.permute.xlu0 %918  ;;  %v905_v62 = vsel %vm7718_vm15, %v895_v34, %v903_v56  ;;  %v907_v9 = vsel %vm7718_vm15, %v897_v44, %v906_v63  ;;  %vm976_vm15 = vcmask 883712  }
  0xe9   : > { %v924_v55 = vrot.slane %v919_v53, 4  ;;  %2916 = vrot.lane.b32.xlu0 %v2908_v6, %s7792_s16 }
  0xea   : > { %2893 = vrot.lane.b32.xlu1 %v2885_v4, %s7791_s25  ;;  %s7798_s25 = smov 2  }
  0xeb   : > { %v927_v57 = vsel %vm586_vm0, %v924_v55, %v925_v52  ;;  %v943_v58 = vpop.permute.xlu1 %942 }
  0xec   : > { %v929_v59 = vsel %vm7719_vm12, %v919_v53, %v927_v57  ;;  %v923_v61 = vpop.permute.xlu0 %922  ;;  %v948_v16 = vrot.slane %v943_v58, 4 }
  0xed   : > { %v926_v1 = vrot.slane %v923_v61, 4  ;;  %v5235_v2 = vcombine.high %v905_v62, %v929_v59  ;;  %v5234_v3 = vcombine.low %v905_v62, %v929_v59  ;;  %2937 = vrot.lane.b32.xlu0 %v6014_v8, %s7793_s23 }
  0xee   : > { %2914 = vrot.lane.b32.xlu1 %v6014_v8, %s7792_s16  ;;  %s7799_s16 = smov 1  }
  0xef   : > { %v930_v5 = vsel %vm586_vm0, %v925_v52, %v926_v1  ;;  %1512 = vmatprep.subr.bf16.mxu0 %v5235_v2  ;;  %v947_v7 = vpop.permute.xlu1 %946 }
  0xf0   : > { %1513 = vmatpush1.bf16.msra.mxu0 %v5234_v3  ;;  %v945_v10 = vpop.permute.xlu0 %944  ;;  %v931_v11 = vsel %vm7719_vm12, %v921_v51, %v930_v5  ;;  %v950_v20 = vrot.slane %v947_v7, 4  ;;  %vm7722_vm12 = vcmask 875520   ;;  %v2977_v51 = vld [vmem:[#allocation3 + $0x10] sm:$0xf] }
  0xf1   : > { %v949_v12 = vrot.slane %v945_v10, 4  ;;  %v5237_v13 = vcombine.high %v907_v9, %v931_v11  ;;  %v5236_v14 = vcombine.low %v907_v9, %v931_v11  ;;  %2958 = vrot.lane.b32.xlu0 %v5998_v39, %s7794_s27  ;;  %v3046_v9 = vld [vmem:[#allocation3 + $0x10] sm:$0xf] }
  0xf2   : > { %2935 = vrot.lane.b32.xlu1 %v5998_v39, %s7793_s23 }
  0xf3   : > { %1565 = vmatprep.subr.bf16.mxu1 %v5237_v13  ;;  %v969_v17 = vpop.permute.xlu1 %968  ;;  %v951_v22 = vsel %vm586_vm0, %v948_v16, %v949_v12  ;;  %v954_v29 = vsel %vm586_vm0, %v949_v12, %v950_v20 }
  0xf4   : > { %v973_v18 = vrot.slane %v969_v17, 4  ;;  %1566 = vmatpush1.bf16.msra.mxu1 %v5236_v14  ;;  %v967_v19 = vpop.permute.xlu0 %966  ;;  %v953_v28 = vsel %vm952_vm11, %v943_v58, %v951_v22  ;;  %v955_v35 = vsel %vm952_vm11, %v945_v10, %v954_v29 }
  0xf5   : > { %v972_v21 = vrot.slane %v967_v19, 4  ;;  %2962 = vrot.lane.b32.xlu0 %v2954_v15, %s7794_s27 }
  0xf6   : > { %2939 = vrot.lane.b32.xlu1 %v2931_v23, %s7793_s23  ;;  %s7816_s23 = smov 108  }
  0xf7   : > { %v975_v24 = vsel %vm586_vm0, %v972_v21, %v973_v18  ;;  %v991_v25 = vpop.permute.xlu1 %990 }
  0xf8   : > { %v977_v26 = vsel %vm976_vm15, %v967_v19, %v975_v24  ;;  %v971_v27 = vpop.permute.xlu0 %970  ;;  %v996_v44 = vrot.slane %v991_v25, 4 }
  0xf9   : > { %v974_v30 = vrot.slane %v971_v27, 4  ;;  %v5239_v31 = vcombine.high %v953_v28, %v977_v26  ;;  %v5238_v32 = vcombine.low %v953_v28, %v977_v26  ;;  %2983 = vrot.lane.b32.xlu0 %v6014_v8, %s7795_s28 }
  0xfa   : > { %2960 = vrot.lane.b32.xlu1 %v6014_v8, %s7794_s27 }
  0xfb   : > { %v978_v33 = vsel %vm586_vm0, %v973_v18, %v974_v30  ;;  %1514 = vmatprep.subr.bf16.mxu0 %v5239_v31  ;;  %v995_v34 = vpop.permute.xlu1 %994 }
  0xfc   : > { %1515 = vmatpush1.bf16.msra.mxu0 %v5238_v32  ;;  %v993_v36 = vpop.permute.xlu0 %992  ;;  %v979_v37 = vsel %vm976_vm15, %v969_v17, %v978_v33  ;;  %v998_v48 = vrot.slane %v995_v34, 4  ;;  %v3023_v17 = vld [vmem:[#allocation3 + $0x10] sm:$0xf] }
  0xfd   : > { %v997_v38 = vrot.slane %v993_v36, 4  ;;  %v5241_v40 = vcombine.high %v955_v35, %v979_v37  ;;  %v5240_v42 = vcombine.low %v955_v35, %v979_v37  ;;  %3004 = vrot.lane.b32.xlu0 %v5998_v39, %s7796_s29 }
  0xfe   : > { %2981 = vrot.lane.b32.xlu1 %v5998_v39, %s7795_s28 }
  0xff   : > { %1567 = vmatprep.subr.bf16.mxu1 %v5241_v40  ;;  %v1017_v45 = vpop.permute.xlu1 %1016  ;;  %v999_v49 = vsel %vm586_vm0, %v996_v44, %v997_v38  ;;  %v1002_v4 = vsel %vm586_vm0, %v997_v38, %v998_v48 }
 0x100   : > { %v1021_v46 = vrot.slane %v1017_v45, 4  ;;  %1568 = vmatpush1.bf16.msra.mxu1 %v5240_v42  ;;  %v1015_v47 = vpop.permute.xlu0 %1014  ;;  %v1001_v56 = vsel %vm7722_vm12, %v991_v25, %v999_v49  ;;  %v1003_v63 = vsel %vm7722_vm12, %v993_v36, %v1002_v4  ;;  %vm7725_vm12 = vcmask 728064  }
 0x101   : > { %v1020_v6 = vrot.slane %v1015_v47, 4  ;;  %3008 = vrot.lane.b32.xlu0 %v3000_v43, %s7796_s29 }
 0x102   : > { %2985 = vrot.lane.b32.xlu1 %v2977_v51, %s7795_s28 }
 0x103   : > { %v1023_v52 = vsel %vm586_vm0, %v1020_v6, %v1021_v46  ;;  %v1039_v53 = vpop.permute.xlu1 %1038 }
 0x104   : > { %v1025_v54 = vsel %vm7723_vm7, %v1015_v47, %v1023_v52  ;;  %v1019_v55 = vpop.permute.xlu0 %1018  ;;  %v1044_v10 = vrot.slane %v1039_v53, 4 }
 0x105   : > { %v1022_v57 = vrot.slane %v1019_v55, 4  ;;  %v5243_v58 = vcombine.high %v1001_v56, %v1025_v54  ;;  %v5242_v59 = vcombine.low %v1001_v56, %v1025_v54  ;;  %3029 = vrot.lane.b32.xlu0 %v6014_v8, %s7797_s30 }
 0x106   : > { %3006 = vrot.lane.b32.xlu1 %v6014_v8, %s7796_s29 }
 0x107   : > { %v1026_v61 = vsel %vm586_vm0, %v1021_v46, %v1022_v57  ;;  %1516 = vmatprep.subr.bf16.mxu0 %v5243_v58  ;;  %v1043_v62 = vpop.permute.xlu1 %1042 }
 0x108   : > { %1517 = vmatpush1.bf16.msra.mxu0 %v5242_v59  ;;  %v1041_v1 = vpop.permute.xlu0 %1040  ;;  %v1027_v2 = vsel %vm7723_vm7, %v1017_v45, %v1026_v61  ;;  %v1046_v14 = vrot.slane %v1043_v62, 4  ;;  %vm1096_vm7 = vcmask 719872  }
 0x109   : > { %v1045_v3 = vrot.slane %v1041_v1, 4  ;;  %v5245_v5 = vcombine.high %v1003_v63, %v1027_v2  ;;  %v5244_v7 = vcombine.low %v1003_v63, %v1027_v2  ;;  %3050 = vrot.lane.b32.xlu0 %v5998_v39, %s7798_s25 }
 0x10a   : > { %3027 = vrot.lane.b32.xlu1 %v5998_v39, %s7797_s30 }
 0x10b   : > { %1569 = vmatprep.subr.bf16.mxu1 %v5245_v5  ;;  %v1065_v11 = vpop.permute.xlu1 %1064  ;;  %v1047_v16 = vsel %vm586_vm0, %v1044_v10, %v1045_v3  ;;  %v1050_v23 = vsel %vm586_vm0, %v1045_v3, %v1046_v14  ;;  %v5571_v10 = vld [vmem:[%s7665_s3] ss:$8 sps:$4 sm:$0xff]  }
 0x10c   : > { %v1069_v12 = vrot.slane %v1065_v11, 4  ;;  %1570 = vmatpush1.bf16.msra.mxu1 %v5244_v7  ;;  %v1063_v13 = vpop.permute.xlu0 %1062  ;;  %v1049_v22 = vsel %vm7724_vm6, %v1039_v53, %v1047_v16  ;;  %v1051_v29 = vsel %vm7724_vm6, %v1041_v1, %v1050_v23  ;;  %vm1120_vm6 = vcmask 711680  }
 0x10d   : > { %v1068_v15 = vrot.slane %v1063_v13, 4  ;;  %3054 = vrot.lane.b32.xlu0 %v3046_v9, %s7798_s25 }
 0x10e   : > { %3031 = vrot.lane.b32.xlu1 %v3023_v17, %s7797_s30  ;;  %s7817_s30 = smov 107  }
 0x10f   : > { %v1071_v18 = vsel %vm586_vm0, %v1068_v15, %v1069_v12  ;;  %v1087_v19 = vpop.permute.xlu1 %1086 }
 0x110   : > { %v1073_v20 = vsel %vm7725_vm12, %v1063_v13, %v1071_v18  ;;  %v1067_v21 = vpop.permute.xlu0 %1066  ;;  %v1092_v35 = vrot.slane %v1087_v19, 4  ;;  %v3069_v13 = vld [vmem:[#allocation3 + $0x10] sm:$0xf]  ;;  %v1685_v18 = vlaneseq }
 0x111   : > { %v1070_v24 = vrot.slane %v1067_v21, 4  ;;  %v5247_v25 = vcombine.high %v1049_v22, %v1073_v20  ;;  %v5246_v26 = vcombine.low %v1049_v22, %v1073_v20  ;;  %3075 = vrot.lane.b32.xlu0 %v6014_v8, %s7799_s16 }
 0x112   : > { %3052 = vrot.lane.b32.xlu1 %v6014_v8, %s7798_s25  ;;  %s7840_s25 = smov 126  }
 0x113   : > { %v1074_v27 = vsel %vm586_vm0, %v1069_v12, %v1070_v24  ;;  %1518 = vmatprep.subr.bf16.mxu0 %v5247_v25  ;;  %v1091_v28 = vpop.permute.xlu1 %1090  ;;  %v5576_v12 = vld [vmem:[%s7665_s3 + $0x10] ss:$8 sps:$4 sm:$0xff]   ;;  %v570_v24 = vld [vmem:[%s7664_s2] sm:$0xf] }
 0x114   : > { %1519 = vmatpush1.bf16.msra.mxu0 %v5246_v26  ;;  %v1089_v30 = vpop.permute.xlu0 %1088  ;;  %v1075_v31 = vsel %vm7725_vm12, %v1065_v11, %v1074_v27  ;;  %v1094_v40 = vrot.slane %v1091_v28, 4  ;;  %vm1144_vm12 = vcmask 703488   ;;  %v5574_v11 = vld [vmem:[%s7665_s3 + $0x14] ss:$8 sps:$4 sm:$0xff]  }
 0x115   : > { %v1093_v32 = vrot.slane %v1089_v30, 4  ;;  %v5249_v33 = vcombine.high %v1051_v29, %v1075_v31  ;;  %v5248_v34 = vcombine.low %v1051_v29, %v1075_v31  ;;  %3100 = vrot.lane.b32.xlu0 %v5964_v41, %s7763_s19 }
 0x116   : > { %3073 = vrot.lane.b32.xlu1 %v5998_v39, %s7799_s16 }
 0x117   : > { %1571 = vmatprep.subr.bf16.mxu1 %v5249_v33  ;;  %v1113_v36 = vpop.permute.xlu1 %1112  ;;  %v1095_v43 = vsel %vm586_vm0, %v1092_v35, %v1093_v32  ;;  %v1098_v47 = vsel %vm586_vm0, %v1093_v32, %v1094_v40 }
 0x118   : > { %v1117_v37 = vrot.slane %v1113_v36, 4  ;;  %1572 = vmatpush1.bf16.msra.mxu1 %v5248_v34  ;;  %v1111_v38 = vpop.permute.xlu0 %1110  ;;  %v1097_v46 = vsel %vm1096_vm7, %v1087_v19, %v1095_v43  ;;  %v1099_v53 = vsel %vm1096_vm7, %v1089_v30, %v1098_v47  ;;  %v1686_v19 = vshrl.u32 %v1685_v18, 7 }
 0x119   : > { %v1116_v42 = vrot.slane %v1111_v38, 4 }
 0x11a   : > { %3077 = vrot.lane.b32.xlu1 %v3069_v13, %s7799_s16  ;;  %v6157_v22 = vsub.s32 0, %v1686_v19  ;;  %v1691_v23 = vsub.s32 1, %v1686_v19  ;;  %v1695_v25 = vsub.s32 2, %v1686_v19  ;;  %v1699_v26 = vsub.s32 3, %v1686_v19 }
 0x11b   : > { %v1119_v8 = vsel %vm586_vm0, %v1116_v42, %v1117_v37  ;;  %v1135_v44 = vpop.permute.xlu1 %1134 }
 0x11c   : > { %v1121_v41 = vsel %vm1120_vm6, %v1111_v38, %v1119_v8  ;;  %v1115_v45 = vpop.permute.xlu0 %1114  ;;  %v1140_v56 = vrot.slane %v1135_v44, 4  ;;  %7800 = vst [vmem:[#allocation7_spill] sm:$0xff] %v6157_v22  ;;  %v6167_v34 = vrot.slane %v570_v24, %v6157_v22  ;;  %v6169_v35 = vrot.slane %v570_v24, %v1691_v23 }
 0x11d   : > { %v1118_v48 = vrot.slane %v1115_v45, 4  ;;  %v5251_v6 = vcombine.high %v1097_v46, %v1121_v41  ;;  %v5250_v49 = vcombine.low %v1097_v46, %v1121_v41  ;;  %v6171_v38 = vrot.slane %v570_v24, %v1695_v25 }
 0x11e   : > { %3102 = vrot.lane.b32.xlu1 %v5977_v60, %s7763_s19  ;;  %7802 = vst [vmem:[#allocation9_spill] sm:$0xff] %v6167_v34  ;;  %7803 = vst [vmem:[#allocation10_spill] sm:$0xff] %v6169_v35  ;;  %v6173_v40 = vrot.slane %v570_v24, %v1699_v26 }
 0x11f   : > { %v1122_v51 = vsel %vm586_vm0, %v1117_v37, %v1118_v48  ;;  %1520 = vmatprep.subr.bf16.mxu0 %v5251_v6  ;;  %v1139_v52 = vpop.permute.xlu1 %1138  ;;  %7804 = vst [vmem:[#allocation11_spill] sm:$0xff] %v6171_v38 }
 0x120   : > { %v1142_v39 = vrot.slane %v1139_v52, 4  ;;  %1521 = vmatpush1.bf16.msra.mxu0 %v5250_v49  ;;  %v1137_v54 = vpop.permute.xlu0 %1136  ;;  %v1123_v55 = vsel %vm1120_vm6, %v1113_v36, %v1122_v51  ;;  %7805 = vst [vmem:[#allocation12_spill] sm:$0xff] %v6173_v40 }
 0x121   : > { %v1141_v4 = vrot.slane %v1137_v54, 4  ;;  %v5253_v57 = vcombine.high %v1099_v53, %v1123_v55  ;;  %v5252_v58 = vcombine.low %v1099_v53, %v1123_v55 }
 0x123   : > { %v1143_v59 = vsel %vm586_vm0, %v1140_v56, %v1141_v4  ;;  %v1146_v61 = vsel %vm586_vm0, %v1141_v4, %v1142_v39  ;;  %1573 = vmatprep.subr.bf16.mxu1 %v5253_v57 }
 0x124   : > { %v1147_v62 = vsel %vm1144_vm12, %v1137_v54, %v1146_v61  ;;  %1574 = vmatpush1.bf16.msra.mxu1 %v5252_v58  ;;  %v1145_v63 = vsel %vm1144_vm12, %v1135_v44, %v1143_v59 }
 0x125   : > { %v5257_v1 = vcombine.high %v1147_v62, %v1147_v62  ;;  %v5255_v2 = vcombine.high %v1145_v63, %v1145_v63  ;;  %v5254_v3 = vcombine.low %v1145_v63, %v1145_v63  ;;  %v5256_v5 = vcombine.low %v1147_v62, %v1147_v62 }
 0x127   : > { %5258 = vmatprep.subr.msk.bf16.mxu0 %vm586_vm0, %v5255_v2  ;;  %5261 = vmatprep.subr.msk.bf16.mxu1 %vm586_vm0, %v5257_v1  ;;  %v1487_v7 = vsel %vm586_vm0, %v5254_v3, 0  ;;  %v1493_v9 = vsel %vm586_vm0, %v5256_v5, 0 }
 0x128   : > { %1523 = vmatpush1.bf16.msra.mxu0 %v1487_v7  ;;  %1576 = vmatpush1.bf16.msra.mxu1 %v1493_v9 }
 0x12b   : > { %1531 = vmatmul.mubr.bf16.vlgmr.msra.gmra.mrb[0].mxu0 %v5571_v10  ;;  %1584 = vmatmul.mubr.bf16.vlgmr.msra.gmra.mrb[0].mxu1 %v5571_v10 }
 0x12c   : > { %5260 = vmatprep.mubr.msk.bf16.mxu0 %vm1478_vm5, %v5574_v11  ;;  %5263 = vmatprep.mubr.msk.bf16.mxu1 %vm1478_vm5, %v5574_v11 }
 0x130   : > { %v1612_v14 = vpop.permute.xlu1 %1611 }
 0x131   : > { %v1607_v17 = vpop.permute.xlu0 %1606 }
 0x133   : > { %1541 = vmatmul.mubr.bf16.gmra.mrb[4].mxu0 %v5576_v12  ;;  %1594 = vmatmul.mubr.bf16.gmra.mrb[4].mxu1 %v5576_v12 }
 0x135   : > { %v1642_v15 = vpop.permute.xlu1 %1641 }
 0x136   : > { %v1646_v21 = vpop.permute.xlu0 %1645 }
 0x13a   : > { %v6164_v27 = vpop.permute.xlu0 %5524 }
 0x13c   : > { %v6153_v16 = vpop.permute.xlu1 %1616 }
 0x13e   : > { %v6177_v59 = vpop.permute.xlu0 %5529 }
 0x141   : > { %v6155_v20 = vpop.permute.xlu1 %1649 }
 0x145   : > { %v6162_v60 = vpop.permute.xlu1 %2105 }
 0x146   : > { %7801 = vst [vmem:[#allocation8_spill] sm:$0xff] %v6162_v60 }
 0x149   : > { %v6175_v58 = vpop.permute.xlu1 %2174 }
 0x14a   : > { %7806 = vst [vmem:[#allocation13_spill] sm:$0xff] %v6175_v58 }
 0x1fe   : > { %v1532_v28 = vpop.f32.mrb[0].mxu0  ;;  %v1585_v29 = vpop.f32.mrb[0].mxu1 }
 0x1ff   : > { %v1624_v30 = vmul.f32 %v1607_v17, %v1532_v28  ;;  %v1626_v31 = vmul.f32 %v1607_v17, %v1585_v29  ;;  %v1534_v32 = vpop.f32.mrb[1].mxu0  ;;  %v1587_v33 = vpop.f32.mrb[1].mxu1 }
 0x200   : > { %v1625_v36 = vmul.f32 %v1607_v17, %v1534_v32  ;;  %v1627_v37 = vmul.f32 %v1607_v17, %v1587_v33  ;;  %v1536_v42 = vpop.f32.mrb[2].mxu0  ;;  %v1589_v43 = vpop.f32.mrb[2].mxu1 }
 0x201   : > { %v1656_v8 = vadd.f32 %v1642_v15, %v1624_v30  ;;  %v1658_v44 = vadd.f32 %v1642_v15, %v1626_v31  ;;  %v1628_v41 = vmul.f32 %v1612_v14, %v1536_v42  ;;  %v1630_v45 = vmul.f32 %v1612_v14, %v1589_v43  ;;  %v1538_v46 = vpop.f32.mrb[3].mxu0  ;;  %v1591_v47 = vpop.f32.mrb[3].mxu1 }
 0x202   : > { %v1657_v48 = vadd.f32 %v1642_v15, %v1625_v36  ;;  %v1659_v6 = vadd.f32 %v1642_v15, %v1627_v37  ;;  %v1629_v49 = vmul.f32 %v1612_v14, %v1538_v46  ;;  %v1631_v51 = vmul.f32 %v1612_v14, %v1591_v47  ;;  %v6211_v37 = vpop.permute.xlu1 %2243  ;;  %v6213_v42 = vpop.permute.xlu0 %5534 }
 0x203   : > { %v1672_v52 = vmax.f32 %v1656_v8, 0.0  ;;  %v1674_v53 = vmax.f32 %v1658_v44, 0.0  ;;  %v1660_v39 = vadd.f32 %v1646_v21, %v1628_v41  ;;  %v1662_v54 = vadd.f32 %v1646_v21, %v1630_v45  ;;  %7811 = vst [vmem:[#allocation18_spill] sm:$0xff] %v6211_v37 }
 0x204   : > { %v1673_v55 = vmax.f32 %v1657_v48, 0.0  ;;  %v1675_v56 = vmax.f32 %v1659_v6, 0.0  ;;  %v1661_v4 = vadd.f32 %v1646_v21, %v1629_v49  ;;  %v1663_v57 = vadd.f32 %v1646_v21, %v1631_v51 }
 0x205   : > { %v1705_v61 = vmul.f32 %v6167_v34, %v1672_v52  ;;  %v1707_v62 = vmul.f32 %v6171_v38, %v1674_v53  ;;  %v1676_v63 = vmax.f32 %v1660_v39, 0.0  ;;  %v1678_v1 = vmax.f32 %v1662_v54, 0.0 }
 0x206   : > { %v1706_v2 = vmul.f32 %v6169_v35, %v1673_v55  ;;  %v1708_v3 = vmul.f32 %v6173_v40, %v1675_v56  ;;  %v1677_v5 = vmax.f32 %v1661_v4, 0.0  ;;  %v1679_v7 = vmax.f32 %v1663_v57, 0.0  ;;  %v1542_v9 = vpop.f32.mrb[4].mxu0  ;;  %v1595_v10 = vpop.f32.mrb[4].mxu1 }
 0x207   : > { %v1709_v11 = vmul.f32 %v6167_v34, %v1676_v63  ;;  %v1711_v12 = vmul.f32 %v6171_v38, %v1678_v1  ;;  %v1632_v13 = vmul.f32 %v6153_v16, %v1542_v9  ;;  %v1634_v14 = vmul.f32 %v6153_v16, %v1595_v10  ;;  %v1544_v15 = vpop.f32.mrb[5].mxu0  ;;  %v1597_v17 = vpop.f32.mrb[5].mxu1 }
 0x208   : > { %v6187_v18 = vpack.c.bf16 %v1706_v2, %v1705_v61  ;;  %v6189_v19 = vpack.c.bf16 %v1708_v3, %v1707_v62  ;;  %v1710_v21 = vmul.f32 %v6169_v35, %v1677_v5  ;;  %v1712_v23 = vmul.f32 %v6173_v40, %v1679_v7  ;;  %v6193_v24 = vpop.f32.mrb[6].mxu0  ;;  %v6195_v25 = vpop.f32.mrb[6].mxu1 }
 0x209   : > { %7807 = vst [vmem:[#allocation14_spill] sm:$0xff] %v6193_v24  ;;  %7808 = vst [vmem:[#allocation15_spill] sm:$0xff] %v6195_v25  ;;  %v1664_v26 = vadd.f32 %v6155_v20, %v1632_v13  ;;  %v1666_v28 = vadd.f32 %v6155_v20, %v1634_v14  ;;  %v1633_v29 = vmul.f32 %v6153_v16, %v1544_v15  ;;  %v6201_v31 = vpop.f32.mrb[7].mxu0  ;;  %v6203_v32 = vpop.f32.mrb[7].mxu1 }
 0x20a   : > { %v1635_v30 = vmul.f32 %v6153_v16, %v1597_v17  ;;  %7809 = vst [vmem:[#allocation16_spill] sm:$0xff] %v6201_v31  ;;  %7810 = vst [vmem:[#allocation17_spill] sm:$0xff] %v6203_v32  ;;  %v6207_v33 = vpack.c.bf16 %v1710_v21, %v1709_v11  ;;  %v6209_v36 = vpack.c.bf16 %v1712_v23, %v1711_v12  ;;  %v6223_v49 = vpop.permute.xlu1 %2312  ;;  %v6225_v51 = vpop.permute.xlu0 %5539  ;;  %v3142_v32 = vld [vmem:[#allocation3 + $0x14] sm:$0xf] }
 0x20b   : > { %1777 = vst [vmem:[#allocation4 + $0x4] sm:$0xff] %v6187_v18  ;;  %1778 = vst [vmem:[#allocation4 + $0xc] sm:$0xff] %v6189_v19  ;;  %v1680_v43 = vmax.f32 %v1664_v26, 0.0  ;;  %v1682_v8 = vmax.f32 %v1666_v28, 0.0  ;;  %v1665_v16 = vadd.f32 %v6155_v20, %v1633_v29 }
 0x20c   : > { %v1667_v44 = vadd.f32 %v6155_v20, %v1635_v30  ;;  %1779 = vst [vmem:[#allocation4 + $0x1c] sm:$0xff] %v6207_v33  ;;  %1780 = vst [vmem:[#allocation4 + $0x24] sm:$0xff] %v6209_v36 }
 0x20d   : > { %v1713_v41 = vmul.f32 %v6167_v34, %v1680_v43  ;;  %v1715_v45 = vmul.f32 %v6171_v38, %v1682_v8  ;;  %v1681_v46 = vmax.f32 %v1665_v16, 0.0  ;;  %7812 = vst [vmem:[#allocation19_spill] sm:$0xff] %v6223_v49  ;;  %v3165_v34 = vld [vmem:[#allocation3 + $0x14] sm:$0xf] }
 0x20e   : > { %v1683_v47 = vmax.f32 %v1667_v44, 0.0  ;;  %v6237_v55 = vpop.permute.xlu1 %2822  ;;  %v6239_v56 = vpop.permute.xlu0 %2820 }
 0x20f   : > { %v1714_v48 = vmul.f32 %v6169_v35, %v1681_v46  ;;  %v6420_v35 = vld [vmem:[%s7669_s7] sm:$0xff] }
 0x210   : > { %v1716_v6 = vmul.f32 %v6173_v40, %v1683_v47  ;;  %7846 = vst [vmem:[#allocation48_spill] sm:$0xff] %v6420_v35  ;;  %v5271_v38 = vcombine.high %v6420_v35, %v6420_v35 }
 0x211   : > { %v6227_v53 = vpack.c.bf16 %v1714_v48, %v1713_v41 }
 0x212   : > { %v1784_v52 = vld [vmem:[#allocation4 + $0x8] sm:$0xff]  ;;  %v1783_v20 = vld [vmem:[#allocation4] sm:$0xff]  ;;  %v6229_v39 = vpack.c.bf16 %v1716_v6, %v1715_v45  ;;  %v1785_v54 = vld [vmem:[#allocation4 + $0x10] sm:$0xf]  ;;  %v6243_v57 = vpop.permute.xlu1 %2843  ;;  %v6245_v61 = vpop.permute.xlu0 %2824  ;;  %5329 = vmatprep.mubr.msk.bf16.mxu0 %vm1096_vm7, %v5271_v38  ;;  %5331 = vmatprep.mubr.msk.bf16.mxu1 %vm1096_vm7, %v5271_v38 }
 0x213   : > { %7813 = vst [vmem:[#allocation20_spill] sm:$0xff] %v6227_v53  ;;  %1803 = vrot.lane.b32.xlu1 %v1784_v52, %s7794_s27  ;;  %1801 = vrot.lane.b32.xlu0 %v1783_v20, %s7794_s27  ;;  %1781 = vst [vmem:[#allocation4 + $0x34] sm:$0xff] %v6227_v53  ;;  %v1854_v4 = vld [vmem:[#allocation4 + $0x10] sm:$0xf]  ;;  %v1787_v12 = vld [vmem:[#allocation4 + $0x20] sm:$0xff] }
 0x214   : > { %1782 = vst [vmem:[#allocation4 + $0x3c] sm:$0xff] %v6229_v39  ;;  %v1923_v62 = vld [vmem:[#allocation4 + $0x10] sm:$0xf]  ;;  %v1786_v13 = vld [vmem:[#allocation4 + $0x18] sm:$0xff]  ;;  %v1788_v17 = vld [vmem:[#allocation4 + $0x28] sm:$0xf] }
 0x215   : > { %v1992_v2 = vld [vmem:[#allocation4 + $0x10] sm:$0xf]  ;;  %v1926_v28 = vld [vmem:[#allocation4 + $0x28] sm:$0xf] }
 0x216   : > { %v6251_v63 = vpop.permute.xlu1 %2847  ;;  %v6253_v1 = vpop.permute.xlu0 %2845  ;;  %v1995_v43 = vld [vmem:[#allocation4 + $0x28] sm:$0xf] }
 0x217   : > { %1870 = vrot.lane.b32.xlu1 %v1783_v20, %s7795_s28  ;;  %1805 = vrot.lane.b32.xlu0 %v1785_v54, %s7794_s27 }
 0x21a   : > { %v6257_v3 = vpop.permute.xlu1 %2868  ;;  %v6259_v5 = vpop.permute.xlu0 %2866  ;;  %v1789_v47 = vld [vmem:[#allocation4 + $0x30] sm:$0xff] }
 0x21b   : > { %1874 = vrot.lane.b32.xlu1 %v1854_v4, %s7795_s28  ;;  %1872 = vrot.lane.b32.xlu0 %v1784_v52, %s7795_s28  ;;  %v1790_v48 = vld [vmem:[#allocation4 + $0x38] sm:$0xff]  ;;  %v1860_v54 = vld [vmem:[#allocation4 + $0x40] sm:$0xf] }
 0x21e   : > { %v6269_v7 = vpop.permute.xlu1 %2889  ;;  %v6271_v9 = vpop.permute.xlu0 %2870 }
 0x21f   : > { %1941 = vrot.lane.b32.xlu1 %v1784_v52, %s7796_s29  ;;  %1939 = vrot.lane.b32.xlu0 %v1783_v20, %s7796_s29  ;;  %7815 = vst [vmem:[#allocation21_spill] sm:$0xff] %v6269_v7 }
 0x222   : > { %v6277_v10 = vpop.permute.xlu1 %2893  ;;  %v6279_v11 = vpop.permute.xlu0 %2891 }
 0x223   : > { %2008 = vrot.lane.b32.xlu1 %v1783_v20, %s7799_s16  ;;  %1943 = vrot.lane.b32.xlu0 %v1923_v62, %s7796_s29  ;;  %v1791_v20 = vld [vmem:[#allocation4 + $0x40] sm:$0xf] }
 0x226   : > { %v6287_v14 = vpop.permute.xlu1 %2914  ;;  %v6289_v15 = vpop.permute.xlu0 %2912 }
 0x227   : > { %2012 = vrot.lane.b32.xlu1 %v1992_v2, %s7799_s16  ;;  %2010 = vrot.lane.b32.xlu0 %v1784_v52, %s7799_s16  ;;  %7818 = vst [vmem:[#allocation22_spill] sm:$0xff] %v6287_v14  ;;  %7819 = vst [vmem:[#allocation23_spill] sm:$0xff] %v6289_v15  ;;  %v1929_v2 = vld [vmem:[#allocation4 + $0x40] sm:$0xf]  ;;  %v5536_v15 = vunpack.i.l.bf16 %v6213_v42 }
 0x22a   : > { %v6293_v21 = vpop.permute.xlu1 %2935 }
 0x22b   : > { %2091 = vrot.lane.b32.xlu1 %v6189_v19, %s7763_s19  ;;  %2089 = vrot.lane.b32.xlu0 %v6187_v18, %s7763_s19  ;;  %7820 = vst [vmem:[#allocation24_spill] sm:$0xff] %v6293_v21 }
 0x22e   : > { %v6301_v23 = vpop.permute.xlu1 %2939 }
 0x22f   : > { %2160 = vrot.lane.b32.xlu1 %v6189_v19, %s7814_s22  ;;  %2158 = vrot.lane.b32.xlu0 %v6187_v18, %s7814_s22  ;;  %7822 = vst [vmem:[#allocation26_spill] sm:$0xff] %v6301_v23 }
 0x232   : > { %v6307_v29 = vpop.permute.xlu1 %2960 }
 0x233   : > { %2229 = vrot.lane.b32.xlu1 %v6189_v19, %s7816_s23  ;;  %2227 = vrot.lane.b32.xlu0 %v6187_v18, %s7816_s23  ;;  %7824 = vst [vmem:[#allocation28_spill] sm:$0xff] %v6307_v29 }
 0x236   : > { %v6317_v8 = vpop.permute.xlu1 %2981 }
 0x237   : > { %2298 = vrot.lane.b32.xlu1 %v6189_v19, %s7817_s30  ;;  %2296 = vrot.lane.b32.xlu0 %v6187_v18, %s7817_s30  ;;  %v6295_v19 = vpop.permute.xlu0 %2916  ;;  %v1857_v18 = vld [vmem:[#allocation4 + $0x28] sm:$0xf]  ;;  %7826 = vst [vmem:[#allocation30_spill] sm:$0xff] %v6317_v8 }
 0x238   : > { %7821 = vst [vmem:[#allocation25_spill] sm:$0xff] %v6295_v19  ;;  %v5537_v19 = vunpack.i.h.bf16 %v6213_v42 }
 0x23a   : > { %v6325_v44 = vpop.permute.xlu1 %2985  ;;  %v6574_v42 = vrot.slane %v5537_v19, 4  ;;  %v7868_v19 = vrot.slane %v6237_v55, 4 }
 0x23b   : > { %1809 = vrot.lane.b32.xlu0 %v1787_v12, %s7794_s27  ;;  %1807 = vrot.lane.b32.xlu1 %v1786_v13, %s7794_s27  ;;  %v6303_v26 = vpop.permute.xlu0 %2937  ;;  %7828 = vst [vmem:[#allocation32_spill] sm:$0xff] %v6325_v44 }
 0x23c   : > { %7823 = vst [vmem:[#allocation27_spill] sm:$0xff] %v6303_v26  ;;  %7866 = vst [vmem:[#allocation60_spill] sm:$0xff] %v6574_v42 }
 0x23e   : > { %v6333_v45 = vpop.permute.xlu1 %3006 }
 0x23f   : > { %1876 = vrot.lane.b32.xlu0 %v1786_v13, %s7795_s28  ;;  %1811 = vrot.lane.b32.xlu1 %v1788_v17, %s7794_s27  ;;  %v6309_v30 = vpop.permute.xlu0 %2958  ;;  %7830 = vst [vmem:[#allocation34_spill] sm:$0xff] %v6333_v45 }
 0x240   : > { %7825 = vst [vmem:[#allocation29_spill] sm:$0xff] %v6309_v30 }
 0x242   : > { %v6343_v6 = vpop.permute.xlu1 %3027 }
 0x243   : > { %1880 = vrot.lane.b32.xlu0 %v1857_v18, %s7795_s28  ;;  %1878 = vrot.lane.b32.xlu1 %v1787_v12, %s7795_s28  ;;  %v6319_v16 = vpop.permute.xlu0 %2962  ;;  %7832 = vst [vmem:[#allocation36_spill] sm:$0xff] %v6343_v6  ;;  %v3096_v18 = vld [vmem:[#allocation3 + $0x14] sm:$0xf] }
 0x244   : > { %7827 = vst [vmem:[#allocation31_spill] sm:$0xff] %v6319_v16 }
 0x247   : > { %1947 = vrot.lane.b32.xlu0 %v1787_v12, %s7796_s29  ;;  %1945 = vrot.lane.b32.xlu1 %v1786_v13, %s7796_s29  ;;  %v6327_v41 = vpop.permute.xlu0 %2983 }
 0x248   : > { %7829 = vst [vmem:[#allocation33_spill] sm:$0xff] %v6327_v41  ;;  %v3257_v41 = vld [vmem:[#allocation3 + $0x14] sm:$0xf] }
 0x24b   : > { %2014 = vrot.lane.b32.xlu0 %v1786_v13, %s7799_s16  ;;  %1949 = vrot.lane.b32.xlu1 %v1926_v28, %s7796_s29  ;;  %v6335_v46 = vpop.permute.xlu0 %3004  ;;  %v5665_v28 = vld [vmem:[#allocation3 + $0x4] sm:$0xff] }
 0x24c   : > { %7831 = vst [vmem:[#allocation35_spill] sm:$0xff] %v6335_v46 }
 0x24f   : > { %2018 = vrot.lane.b32.xlu0 %v1995_v43, %s7799_s16  ;;  %2016 = vrot.lane.b32.xlu1 %v1787_v12, %s7799_s16  ;;  %v6345_v52 = vpop.permute.xlu0 %3008  ;;  %v1998_v12 = vld [vmem:[#allocation4 + $0x40] sm:$0xf]  ;;  %v3119_v43 = vld [vmem:[#allocation3 + $0x14] sm:$0xf] }
 0x250   : > { %7833 = vst [vmem:[#allocation37_spill] sm:$0xff] %v6345_v52  ;;  %v3234_v52 = vld [vmem:[#allocation3 + $0x14] sm:$0xf] }
 0x253   : > { %2097 = vrot.lane.b32.xlu0 %v6209_v36, %s7763_s19  ;;  %2095 = vrot.lane.b32.xlu1 %v6207_v33, %s7763_s19  ;;  %v6351_v4 = vpop.permute.xlu0 %3029 }
 0x254   : > { %7835 = vst [vmem:[#allocation39_spill] sm:$0xff] %v6351_v4 }
 0x257   : > { %2166 = vrot.lane.b32.xlu0 %v6209_v36, %s7814_s22  ;;  %2164 = vrot.lane.b32.xlu1 %v6207_v33, %s7814_s22  ;;  %v6359_v62 = vpop.permute.xlu0 %3050 }
 0x258   : > { %7837 = vst [vmem:[#allocation41_spill] sm:$0xff] %v6359_v62  ;;  %v6451_v62 = vld [vmem:[#allocation3 + $0xc] sm:$0xff] }
 0x25b   : > { %2235 = vrot.lane.b32.xlu0 %v6209_v36, %s7816_s23  ;;  %2233 = vrot.lane.b32.xlu1 %v6207_v33, %s7816_s23  ;;  %v6365_v17 = vpop.permute.xlu0 %3054 }
 0x25c   : > { %7839 = vst [vmem:[#allocation43_spill] sm:$0xff] %v6365_v17 }
 0x25f   : > { %2304 = vrot.lane.b32.xlu0 %v6209_v36, %s7817_s30  ;;  %2302 = vrot.lane.b32.xlu1 %v6207_v33, %s7817_s30  ;;  %v6349_v36 = vpop.permute.xlu1 %3031 }
 0x260   : > { %7834 = vst [vmem:[#allocation38_spill] sm:$0xff] %v6349_v36 }
 0x263   : > { %1813 = vrot.lane.b32.xlu0 %v1789_v47, %s7794_s27  ;;  %1815 = vrot.lane.b32.xlu1 %v1790_v48, %s7794_s27  ;;  %v6357_v33 = vpop.permute.xlu1 %3052 }
 0x264   : > { %7836 = vst [vmem:[#allocation40_spill] sm:$0xff] %v6357_v33 }
 0x267   : > { %1817 = vrot.lane.b32.xlu0 %v1791_v20, %s7794_s27  ;;  %1882 = vrot.lane.b32.xlu1 %v1789_v47, %s7795_s28  ;;  %v6363_v13 = vpop.permute.xlu1 %3073 }
 0x268   : > { %7838 = vst [vmem:[#allocation42_spill] sm:$0xff] %v6363_v13  ;;  %v3188_v13 = vld [vmem:[#allocation3 + $0x14] sm:$0xf] }
 0x26b   : > { %1884 = vrot.lane.b32.xlu0 %v1790_v48, %s7795_s28  ;;  %1886 = vrot.lane.b32.xlu1 %v1860_v54, %s7795_s28  ;;  %v6371_v20 = vpop.permute.xlu1 %3077  ;;  %v6373_v54 = vpop.permute.xlu0 %3075 }
 0x26c   : > { %7841 = vst [vmem:[#allocation44_spill] sm:$0xff] %v6371_v20  ;;  %7842 = vst [vmem:[#allocation45_spill] sm:$0xff] %v6373_v54  ;;  %v6442_v20 = vld [vmem:[#allocation3 + $0x4] sm:$0xff] }
 0x26f   : > { %1951 = vrot.lane.b32.xlu0 %v1789_v47, %s7796_s29  ;;  %1953 = vrot.lane.b32.xlu1 %v1790_v48, %s7796_s29 }
 0x273   : > { %1955 = vrot.lane.b32.xlu0 %v1929_v2, %s7796_s29  ;;  %2020 = vrot.lane.b32.xlu1 %v1789_v47, %s7799_s16  ;;  %v5666_v47 = vld [vmem:[#allocation3 + $0xc] sm:$0xff]  ;;  %v6377_v2 = vpop.permute.xlu1 %3102 }
 0x274   : > { %7843 = vst [vmem:[#allocation46_spill] sm:$0xff] %v6377_v2 }
 0x277   : > { %2022 = vrot.lane.b32.xlu0 %v1790_v48, %s7799_s16  ;;  %2024 = vrot.lane.b32.xlu1 %v1998_v12, %s7799_s16  ;;  %v6379_v48 = vpop.permute.xlu0 %3100 }
 0x278   : > { %7844 = vst [vmem:[#allocation47_spill] sm:$0xff] %v6379_v48 }
 0x27b   : > { %3123 = vrot.lane.b32.xlu1 %v5665_v28, %s7840_s25  ;;  %3104 = vrot.lane.b32.xlu0 %v3096_v18, %s7763_s19 }
 0x27f   : > { %3127 = vrot.lane.b32.xlu1 %v3119_v43, %s7840_s25  ;;  %3125 = vrot.lane.b32.xlu0 %v5666_v47, %s7840_s25  ;;  %s7853_s25 = smov 89  }
 0x283   : > { %2101 = vrot.lane.b32.xlu1 %v6227_v53, %s7763_s19  ;;  %2103 = vrot.lane.b32.xlu0 %v6229_v39, %s7763_s19 }
 0x285   : > { %v6385_v12 = vpop.permute.xlu1 %1803  ;;  %v6387_v18 = vpop.permute.xlu0 %1801 }
 0x286   : > { %v1820_v4 = vrot.slane %v6385_v12, 4 }
 0x287   : > { %3148 = vrot.lane.b32.xlu1 %v5666_v47, %s7845_s17  ;;  %3146 = vrot.lane.b32.xlu0 %v5665_v28, %s7845_s17 }
 0x289   : > { %v6391_v43 = vpop.permute.xlu1 %1870  ;;  %v6393_v50 = vpop.permute.xlu0 %1805 }
 0x28a   : > { %v1821_v45 = vrot.slane %v6393_v50, 4 }
 0x28b   : > { %2170 = vrot.lane.b32.xlu1 %v6227_v53, %s7814_s22  ;;  %2172 = vrot.lane.b32.xlu0 %v6229_v39, %s7814_s22 }
 0x28c   : > { %v1830_v50 = vsel %vm586_vm0, %v1820_v4, %v1821_v45 }
 0x28d   : > { %v6399_v0 = vpop.permute.xlu1 %1874  ;;  %v6401_v22 = vpop.permute.xlu0 %1872 }
 0x28f   : > { %2239 = vrot.lane.b32.xlu1 %v6227_v53, %s7816_s23  ;;  %2241 = vrot.lane.b32.xlu0 %v6229_v39, %s7816_s23 }
 0x291   : > { %v6407_v25 = vpop.permute.xlu1 %1941  ;;  %v6409_v31 = vpop.permute.xlu0 %1939 }
 0x293   : > { %3169 = vrot.lane.b32.xlu1 %v5665_v28, %s7814_s22  ;;  %3150 = vrot.lane.b32.xlu0 %v3142_v32, %s7845_s17  ;;  %s7851_s17 = smov 106  }
 0x295   : > { %v6413_v24 = vpop.permute.xlu1 %2008  ;;  %v6415_v40 = vpop.permute.xlu0 %1943 }
 0x297   : > { %2308 = vrot.lane.b32.xlu1 %v6227_v53, %s7817_s30  ;;  %2310 = vrot.lane.b32.xlu0 %v6229_v39, %s7817_s30 }
 0x299   : > { %v6430_v32 = vpop.permute.xlu1 %2012  ;;  %v6432_v48 = vpop.permute.xlu0 %2010 }
 0x29b   : > { %3173 = vrot.lane.b32.xlu1 %v3165_v34, %s7814_s22  ;;  %3171 = vrot.lane.b32.xlu0 %v5666_v47, %s7814_s22  ;;  %v3211_v34 = vld [vmem:[#allocation3 + $0x14] sm:$0xf] }
 0x29d   : > { %v6436_v2 = vpop.permute.xlu1 %2091  ;;  %v6438_v54 = vpop.permute.xlu0 %2089 }
 0x29f   : > { %3194 = vrot.lane.b32.xlu1 %v5666_v47, %s7816_s23  ;;  %3192 = vrot.lane.b32.xlu0 %v5665_v28, %s7816_s23 }
 0x2a1   : > { %v6444_v38 = vpop.permute.xlu1 %2160  ;;  %v6446_v17 = vpop.permute.xlu0 %2158 }
 0x2a3   : > { %3215 = vrot.lane.b32.xlu1 %v6442_v20, %s7817_s30  ;;  %3196 = vrot.lane.b32.xlu0 %v3188_v13, %s7816_s23  ;;  %v1819_v13 = vrot.slane %v6387_v18, 4 }
 0x2a5   : > { %v6453_v33 = vpop.permute.xlu1 %2229  ;;  %v6455_v47 = vpop.permute.xlu0 %2227  ;;  %v1828_v46 = vsel %vm586_vm0, %v1819_v13, %v1820_v4 }
 0x2a6   : > { %7847 = vst [vmem:[#allocation49_spill] sm:$0xff] %v6453_v33  ;;  %7848 = vst [vmem:[#allocation50_spill] sm:$0xff] %v6455_v47  ;;  %v1829_v16 = vsel %vm732_vm8, %v6387_v18, %v1828_v46  ;;  %v3326_v18 = vld [vmem:[#allocation3 + $0x14] sm:$0xf]  ;;  %v1959_v33 = vrot.slane %v6415_v40, 4 }
 0x2a7   : > { %3219 = vrot.lane.b32.xlu1 %v3211_v34, %s7817_s30  ;;  %3217 = vrot.lane.b32.xlu0 %v6451_v62, %s7817_s30 }
 0x2a9   : > { %v6460_v28 = vpop.permute.xlu1 %2298  ;;  %v6462_v36 = vpop.permute.xlu0 %2296 }
 0x2aa   : > { %7849 = vst [vmem:[#allocation51_spill] sm:$0xff] %v6460_v28  ;;  %7850 = vst [vmem:[#allocation52_spill] sm:$0xff] %v6462_v36  ;;  %v7864_v28 = vmov 1  }
 0x2ab   : > { %3240 = vrot.lane.b32.xlu1 %v6451_v62, %s7851_s17  ;;  %3238 = vrot.lane.b32.xlu0 %v6442_v20, %s7851_s17 }
 0x2ad   : > { %v1808_v6 = vpop.permute.xlu1 %1807  ;;  %v1810_v34 = vpop.permute.xlu0 %1809 }
 0x2ae   : > { %v1822_v35 = vrot.slane %v1808_v6, 4  ;;  %v1823_v8 = vrot.slane %v1810_v34, 4 }
 0x2af   : > { %3261 = vrot.lane.b32.xlu1 %v6442_v20, %s7852_s20  ;;  %3242 = vrot.lane.b32.xlu0 %v3234_v52, %s7851_s17  ;;  %s7854_s17 = smov 88  }
 0x2b0   : > { %v1832_v44 = vsel %vm586_vm0, %v1822_v35, %v1823_v8 }
 0x2b1   : > { %v1812_v30 = vpop.permute.xlu1 %1811  ;;  %v6478_v29 = vpop.permute.xlu0 %1876  ;;  %v1833_v13 = vsel %vm732_vm8, %v1808_v6, %v1832_v44  ;;  %v1831_v44 = vsel %vm732_vm8, %v6385_v12, %v1830_v50  ;;  %v3349_v50 = vld [vmem:[#allocation3 + $0x14] sm:$0xf] }
 0x2b2   : > { %v1824_v21 = vrot.slane %v1812_v30, 4  ;;  %v5272_v26 = vcombine.low %v1829_v16, %v1833_v13  ;;  %v5273_v23 = vcombine.high %v1829_v16, %v1833_v13 }
 0x2b3   : > { %3265 = vrot.lane.b32.xlu1 %v3257_v41, %s7852_s20  ;;  %3263 = vrot.lane.b32.xlu0 %v6451_v62, %s7852_s20  ;;  %s7855_s20 = smov 87  }
 0x2b4   : > { %v1834_v35 = vsel %vm586_vm0, %v1823_v8, %v1824_v21  ;;  %2695 = vmatprep.subr.bf16.mxu0 %v5273_v23  ;;  %v3280_v21 = vld [vmem:[#allocation3 + $0x14] sm:$0xf] }
 0x2b5   : > { %v6486_v52 = vpop.permute.xlu1 %1878  ;;  %2696 = vmatpush1.bf16.msra.mxu0 %v5272_v26  ;;  %v6488_v46 = vpop.permute.xlu0 %1880  ;;  %v1835_v30 = vsel %vm732_vm8, %v1810_v34, %v1834_v35  ;;  %v3303_v8 = vld [vmem:[#allocation3 + $0x14] sm:$0xf] }
 0x2b6   : > { %v5274_v45 = vcombine.low %v1831_v44, %v1835_v30  ;;  %v5275_v16 = vcombine.high %v1831_v44, %v1835_v30  ;;  %v3371_v30 = vld [vmem:[%s7668_s6 + $0x8] sm:$0xff]  ;;  %v1893_v49 = vrot.slane %v6488_v46, 4 }
 0x2b7   : > { %3286 = vrot.lane.b32.xlu1 %v6451_v62, %s7853_s25  ;;  %3284 = vrot.lane.b32.xlu0 %v6442_v20, %s7853_s25 }
 0x2b8   : > { %2736 = vmatprep.subr.bf16.mxu1 %v5275_v16 }
 0x2b9   : > { %v6497_v23 = vpop.permute.xlu1 %1945  ;;  %2737 = vmatpush1.bf16.msra.mxu1 %v5274_v45  ;;  %v6499_v26 = vpop.permute.xlu0 %1947 }
 0x2bb   : > { %3307 = vrot.lane.b32.xlu1 %v6442_v20, %s7854_s17  ;;  %3288 = vrot.lane.b32.xlu0 %v3280_v21, %s7853_s25  ;;  %s7856_s25 = smov 86   ;;  %v5526_v21 = vunpack.i.l.bf16 %v6164_v27 }
 0x2bd   : > { %v6504_v41 = vpop.permute.xlu1 %1949  ;;  %v6506_v6 = vpop.permute.xlu0 %2014 }
 0x2bf   : > { %3311 = vrot.lane.b32.xlu1 %v3303_v8, %s7854_s17  ;;  %3309 = vrot.lane.b32.xlu0 %v6451_v62, %s7854_s17  ;;  %v5532_v8 = vunpack.i.h.bf16 %v6177_v59 }
 0x2c1   : > { %v6511_v4 = vpop.permute.xlu1 %2016  ;;  %v6513_v12 = vpop.permute.xlu0 %2018 }
 0x2c3   : > { %3332 = vrot.lane.b32.xlu1 %v6451_v62, %s7855_s20  ;;  %3330 = vrot.lane.b32.xlu0 %v6442_v20, %s7855_s20 }
 0x2c5   : > { %v6519_v34 = vpop.permute.xlu1 %2095  ;;  %v6521_v13 = vpop.permute.xlu0 %2097 }
 0x2c7   : > { %3353 = vrot.lane.b32.xlu1 %v6442_v20, %s7856_s25  ;;  %3334 = vrot.lane.b32.xlu0 %v3326_v18, %s7855_s20  ;;  %v5527_v20 = vunpack.i.h.bf16 %v6164_v27  ;;  %v5531_v18 = vunpack.i.l.bf16 %v6177_v59  ;;  %v3370_v27 = vld [vmem:[%s7668_s6] sm:$0xff]  ;;  %v1957_v59 = vrot.slane %v6409_v31, 4 }
 0x2c9   : > { %v6526_v35 = vpop.permute.xlu1 %2164  ;;  %v6528_v44 = vpop.permute.xlu0 %2166  ;;  %v6555_v36 = vrot.slane %v5527_v20, 4  ;;  %v6568_v20 = vrot.slane %v5531_v18, 4  ;;  %v1892_v18 = vrot.slane %v6486_v52, 4 }
 0x2cb   : > { %3357 = vrot.lane.b32.xlu1 %v3349_v50, %s7856_s25  ;;  %3355 = vrot.lane.b32.xlu0 %v6451_v62, %s7856_s25  ;;  %v1889_v62 = vrot.slane %v6401_v22, 4  ;;  %7861 = vst [vmem:[#allocation57_spill] sm:$0xff] %v6555_v36  ;;  %v1888_v50 = vrot.slane %v6391_v43, 4  ;;  %7865 = vst [vmem:[#allocation59_spill] sm:$0xff] %v6568_v20  ;;  %s7950_s25 = smov 127  }
 0x2cd   : > { %v6536_v45 = vpop.permute.xlu1 %2233  ;;  %v6538_v16 = vpop.permute.xlu0 %2235  ;;  %v1897_v58 = vsel %vm586_vm0, %v1888_v50, %v1889_v62  ;;  %v3372_v50 = vld [vmem:[%s7668_s6 + $0x10] sm:$0xff] }
 0x2ce   : > { %7857 = vst [vmem:[#allocation53_spill] sm:$0xff] %v6536_v45  ;;  %7858 = vst [vmem:[#allocation54_spill] sm:$0xff] %v6538_v16  ;;  %v6561_v45 = vrot.slane %v5532_v8, 4  ;;  %v7863_v16 = vmov 0   ;;  %v1898_v8 = vsel %vm756_vm9, %v6391_v43, %v1897_v58  ;;  %v1891_v43 = vrot.slane %v6478_v29, 4 }
 0x2cf   : > { %3861 = vperm.xlu0 %5520, %v3371_v30   ;;  %3827 = vperm.xlu1 %5543, %v3371_v30   ;;  %v6557_v30 = vrot.slane %v5526_v21, 4  ;;  %v1958_v21 = vrot.slane %v6407_v25, 4 }
 0x2d0   : > { %7862 = vst [vmem:[#allocation58_spill] sm:$0xff] %v6561_v45 }
 0x2d1   : > { %v6548_v14 = vpop.permute.xlu1 %2302  ;;  %v6550_v7 = vpop.permute.xlu0 %2304  ;;  %v1966_v20 = vsel %vm586_vm0, %v1957_v59, %v1958_v21 }
 0x2d2   : > { %7859 = vst [vmem:[#allocation55_spill] sm:$0xff] %v6548_v14  ;;  %7860 = vst [vmem:[#allocation56_spill] sm:$0xff] %v6550_v7  ;;  %v2828_v14 = vrot.slane %v6245_v61, 4  ;;  %v1890_v7 = vrot.slane %v6399_v0, 4  ;;  %v6576_v61 = vrot.slane %v5536_v15, 4 }
 0x2d3   : > { %5545 = vset.pattern.permute.xlu0 %v7863_v16  ;;  %5544 = vset.pattern.permute.xlu1 %v7864_v28 }
 0x2d4   : > { %3822 = vperm.xlu0 %5545, %v3370_v27   ;;  %3857 = vperm.xlu1 %5544, %v3370_v27   ;;  %7867 = vst [vmem:[#allocation61_spill] sm:$0xff] %v6576_v61  ;;  %v6588_v15 = vsel %vm586_vm0, %v7868_v19, %v2828_v14  ;;  %v1899_v0 = vsel %vm586_vm0, %v1889_v62, %v1890_v7  ;;  %v1960_v27 = vrot.slane %v6497_v23, 4  ;;  %v1961_v14 = vrot.slane %v6499_v26, 4 }
 0x2d5   : > { %v1816_v60 = vpop.permute.xlu1 %1815  ;;  %v1814_v47 = vpop.permute.xlu0 %1813  ;;  %v1962_v19 = vrot.slane %v6504_v41, 4  ;;  %v1900_v53 = vsel %vm756_vm9, %v6401_v22, %v1899_v0 }
 0x2d6   : > { %v1826_v45 = vrot.slane %v1816_v60, 4  ;;  %v1825_v36 = vrot.slane %v1814_v47, 4  ;;  %v1970_v40 = vsel %vm586_vm0, %v1960_v27, %v1961_v14 }
 0x2d8   : > { %v1836_v37 = vsel %vm586_vm0, %v1825_v36, %v1826_v45  ;;  %5546 = vset.pattern.permute.xlu1 %v7863_v16  ;;  %v2851_v36 = vrot.slane %v6251_v63, 4  ;;  %v1972_v63 = vsel %vm586_vm0, %v1961_v14, %v1962_v19  ;;  %v2027_v19 = vrot.slane %v6432_v48, 4 }
 0x2d9   : > { %v1837_v7 = vsel %vm732_vm8, %v1814_v47, %v1836_v37  ;;  %v1883_v62 = vpop.permute.xlu1 %1882  ;;  %v1818_v58 = vpop.permute.xlu0 %1817  ;;  %3832 = vperm.xlu1 %5546, %v3372_v50   ;;  %v6610_v37 = vsel %vm780_vm10, %v6409_v31, %v1966_v20  ;;  %v1903_v47 = vsel %vm586_vm0, %v1892_v18, %v1893_v49 }
 0x2da   : > { %v5276_v59 = vcombine.low %v1837_v7, %v1898_v8  ;;  %v1827_v42 = vrot.slane %v1818_v58, 4  ;;  %v5277_v46 = vcombine.high %v1837_v7, %v1898_v8  ;;  %v1901_v8 = vsel %vm586_vm0, %v1891_v43, %v1892_v18 }
 0x2db   : > { %v1894_v7 = vrot.slane %v1883_v62, 4  ;;  %v2028_v18 = vrot.slane %v6430_v32, 4  ;;  %v1902_v14 = vsel %vm756_vm9, %v6478_v29, %v1901_v8 }
 0x2dc   : > { %v1838_v41 = vsel %vm586_vm0, %v1826_v45, %v1827_v42  ;;  %2697 = vmatprep.subr.bf16.mxu0 %v5277_v46  ;;  %v2026_v45 = vrot.slane %v6413_v24, 4  ;;  %v1968_v42 = vsel %vm586_vm0, %v1958_v21, %v1959_v33  ;;  %v1971_v21 = vsel %vm780_vm10, %v6497_v23, %v1970_v40 }
 0x2dd   : > { %v1887_v58 = vpop.permute.xlu1 %1886  ;;  %2698 = vmatpush1.bf16.msra.mxu0 %v5276_v59  ;;  %v1885_v61 = vpop.permute.xlu0 %1884  ;;  %v1839_v22 = vsel %vm732_vm8, %v1816_v60, %v1838_v41  ;;  %5547 = vset.pattern.permute.xlu1 %v7864_v28  ;;  %v1904_v60 = vsel %vm756_vm9, %v6486_v52, %v1903_v47  ;;  %v1973_v52 = vsel %vm780_vm10, %v6499_v26, %v1972_v63  ;;  %v2031_v23 = vrot.slane %v6513_v12, 4 }
 0x2de   : > { %v1896_v31 = vrot.slane %v1887_v58, 4  ;;  %v1895_v20 = vrot.slane %v1885_v61, 4  ;;  %v5278_v49 = vcombine.low %v1839_v22, %v1900_v53  ;;  %v5279_v0 = vcombine.high %v1839_v22, %v1900_v53  ;;  %3865 = vperm.xlu1 %5547, %v3372_v50  }
 0x2df   : > { %v2037_v29 = vsel %vm586_vm0, %v2027_v19, %v2028_v18  ;;  %v2035_v58 = vsel %vm586_vm0, %v2026_v45, %v2027_v19  ;;  %v7869_v63 = vrot.slane %v6237_v55, 4  ;;  %v7870_v22 = vrot.slane %v6239_v56, 4 }
 0x2e0   : > { %v1907_v27 = vsel %vm586_vm0, %v1895_v20, %v1896_v31  ;;  %2738 = vmatprep.subr.bf16.mxu1 %v5279_v0  ;;  %v1905_v53 = vsel %vm586_vm0, %v1894_v7, %v1895_v20  ;;  %v1969_v7 = vsel %vm780_vm10, %v6407_v25, %v1968_v42  ;;  %v2849_v40 = vrot.slane %v6243_v57, 4 }
 0x2e1   : > { %v1908_v50 = vsel %vm756_vm9, %v1885_v61, %v1907_v27  ;;  %v1954_v43 = vpop.permute.xlu1 %1953  ;;  %2739 = vmatpush1.bf16.msra.mxu1 %v5278_v49  ;;  %v1952_v33 = vpop.permute.xlu0 %1951  ;;  %v1906_v32 = vsel %vm756_vm9, %v1883_v62, %v1905_v53  ;;  %v2030_v62 = vrot.slane %v6511_v4, 4  ;;  %v5285_v20 = vcombine.high %v6610_v37, %v1971_v21 }
 0x2e2   : > { %v5282_v59 = vcombine.low %v1904_v60, %v1908_v50  ;;  %v1964_v46 = vrot.slane %v1954_v43, 4  ;;  %v1963_v47 = vrot.slane %v1952_v33, 4  ;;  %v5280_v41 = vcombine.low %v1902_v14, %v1906_v32  ;;  %5568 = vset.pattern.permute.xlu1 %v7863_v16 }
 0x2e3   : > { %v5281_v61 = vcombine.high %v1902_v14, %v1906_v32  ;;  %v5283_v8 = vcombine.high %v1904_v60, %v1908_v50  ;;  %v6648_v16 = vsel %vm586_vm0, %v7870_v22, %v7869_v63  ;;  %v5287_v12 = vcombine.high %v1969_v7, %v1973_v52 }
 0x2e4   : > { %v1974_v26 = vsel %vm586_vm0, %v1963_v47, %v1964_v46  ;;  %v6655_v49 = vsel %vm588_vm1, %v6237_v55, %v6588_v15  ;;  %v7871_v0 = vrot.slane %v6253_v1, 4  ;;  %v2038_v19 = vsel %vm852_vm13, %v6432_v48, %v2037_v29 }
 0x2e5   : > { %2699 = vmatprep.subr.bf16.mxu0 %v5281_v61  ;;  %2740 = vmatprep.subr.bf16.mxu1 %v5283_v8  ;;  %v2021_v25 = vpop.permute.xlu1 %2020  ;;  %v1956_v31 = vpop.permute.xlu0 %1955  ;;  %v1975_v42 = vsel %vm780_vm10, %v1952_v33, %v1974_v26  ;;  %v2108_v60 = vrot.slane %v6436_v2, 4  ;;  %v2029_v27 = vrot.slane %v6506_v6, 4  ;;  %v2036_v55 = vsel %vm852_vm13, %v6413_v24, %v2035_v58 }
 0x2e6   : > { %v2854_v45 = vsel %vm586_vm0, %v7871_v0, %v2851_v36  ;;  %2700 = vmatpush1.bf16.msra.mxu0 %v5280_v41  ;;  %2741 = vmatpush1.bf16.msra.mxu1 %v5282_v59  ;;  %v1965_v18 = vrot.slane %v1956_v31, 4  ;;  %v2041_v15 = vsel %vm586_vm0, %v2030_v62, %v2031_v23  ;;  %v5284_v14 = vcombine.low %v6610_v37, %v1971_v21 }
 0x2e7   : > { %2701 = vmatprep.subr.bf16.mxu0 %v5285_v20  ;;  %2742 = vmatprep.subr.bf16.mxu1 %v5287_v12  ;;  %v5286_v53 = vcombine.low %v1969_v7, %v1973_v52  ;;  %v2032_v50 = vrot.slane %v2021_v25, 4  ;;  %v5289_v48 = vcombine.high %v1975_v42, %v2036_v55  ;;  %v2039_v47 = vsel %vm586_vm0, %v2029_v27, %v2030_v62 }
 0x2e8   : > { %v1976_v36 = vsel %vm586_vm0, %v1964_v46, %v1965_v18  ;;  %v6674_v46 = vsel %vm612_vm2, %v6253_v1, %v2854_v45  ;;  %v2873_v37 = vrot.slane %v6257_v3, 4  ;;  %v2872_v21 = vrot.slane %v6259_v5, 4 }
 0x2e9   : > { %v2025_v33 = vpop.permute.xlu1 %2024  ;;  %v2023_v32 = vpop.permute.xlu0 %2022  ;;  %v1977_v59 = vsel %vm780_vm10, %v1954_v43, %v1976_v36  ;;  %v2107_v52 = vrot.slane %v6438_v54, 4  ;;  %v2874_v43 = vrot.slane %v6271_v9, 4  ;;  %v5288_v8 = vcombine.low %v1975_v42, %v2036_v55 }
 0x2ea   : > { %v2034_v41 = vrot.slane %v2025_v33, 4  ;;  %2702 = vmatpush1.bf16.msra.mxu0 %v5284_v14  ;;  %2743 = vmatpush1.bf16.msra.mxu1 %v5286_v53  ;;  %v2033_v24 = vrot.slane %v2023_v32, 4  ;;  %v5290_v29 = vcombine.low %v1977_v59, %v2038_v19  ;;  %v5291_v61 = vcombine.high %v1977_v59, %v2038_v19  ;;  %v5579_v14 = vld [vmem:[#allocation4 + $0x10] ss:$24 sps:$4 sm:$0xff]  }
 0x2eb   : > { %2703 = vmatprep.subr.bf16.mxu0 %v5289_v48  ;;  %v2042_v23 = vsel %vm852_vm13, %v6511_v4, %v2041_v15  ;;  %v2040_v22 = vsel %vm852_vm13, %v6506_v6, %v2039_v47  ;;  %v7872_v31 = vunpack.i.h.bf16 %v6225_v51  ;;  %v2118_v12 = vsel %vm586_vm0, %v2108_v60, %v6557_v30  ;;  %v7874_v47 = vld [vmem:[#allocation49_spill] sm:$0xff] }
 0x2ec   : > { %v2045_v7 = vsel %vm586_vm0, %v2033_v24, %v2034_v41  ;;  %2744 = vmatprep.subr.bf16.mxu1 %v5291_v61  ;;  %v2043_v62 = vsel %vm586_vm0, %v2032_v50, %v2033_v24  ;;  %v2875_v45 = vsel %vm586_vm0, %v2872_v21, %v2873_v37  ;;  %v2116_v42 = vsel %vm586_vm0, %v2107_v52, %v2108_v60  ;;  %v5581_v24 = vld [vmem:[#allocation4 + $0x4] ss:$24 sps:$4 sm:$0xff]   ;;  %v7875_v61 = vld [vmem:[#allocation20_spill] sm:$0xff] }
 0x2ed   : > { %v2046_v58 = vsel %vm852_vm13, %v2023_v32, %v2045_v7  ;;  %v6685_v26 = vpop.permute.xlu1 %3123  ;;  %v6687_v63 = vpop.permute.xlu0 %3104  ;;  %v2044_v9 = vsel %vm852_vm13, %v2021_v25, %v2043_v62  ;;  %v6694_v20 = vrot.slane %v7872_v31, 4  ;;  %v6703_v6 = vsel %vm588_vm1, %v6239_v56, %v6648_v16  ;;  %v5577_v16 = vld [vmem:[#allocation4 + $0x8] ss:$24 sps:$4 sm:$0xff]   ;;  %v7876_v21 = vld [vmem:[#allocation57_spill] sm:$0xff] }
 0x2ee   : > { %v5294_v0 = vcombine.low %v2042_v23, %v2046_v58  ;;  %2704 = vmatpush1.bf16.msra.mxu0 %v5288_v8  ;;  %2745 = vmatpush1.bf16.msra.mxu1 %v5290_v29  ;;  %v5292_v4 = vcombine.low %v2040_v22, %v2044_v9  ;;  %v5293_v18 = vcombine.high %v2040_v22, %v2044_v9  ;;  %v2897_v27 = vrot.slane %v6277_v10, 4  ;;  %v5582_v29 = vld [vmem:[#allocation4 + $0xc] ss:$24 sps:$4 sm:$0xff]  }
 0x2ef   : > { %v5295_v19 = vcombine.high %v2042_v23, %v2046_v58  ;;  %v2877_v25 = vsel %vm586_vm0, %v2873_v37, %v2874_v43  ;;  %v2896_v30 = vrot.slane %v6279_v11, 4  ;;  %v5338_v55 = vcombine.low %v6655_v49, %v6674_v46  ;;  %v7877_v23 = vld [vmem:[#allocation58_spill] sm:$0xff]  ;;  %v7878_v31 = vld [vmem:[#allocation59_spill] sm:$0xff] }
 0x2f0   : > { %v2119_v15 = vsel %vm880_vm14, %v6436_v2, %v2118_v12  ;;  %v2111_v60 = vrot.slane %v6521_v13, 4  ;;  %2705 = vmatprep.subr.bf16.mxu0 %v5293_v18  ;;  %v7873_v10 = vrot.slane %v6253_v1, 4  ;;  %v6724_v50 = vsel %vm636_vm3, %v6259_v5, %v2875_v45 }
 0x2f1   : > { %2746 = vmatprep.subr.bf16.mxu1 %v5295_v19  ;;  %v6713_v36 = vpop.permute.xlu1 %3127  ;;  %v6715_v56 = vpop.permute.xlu0 %3125  ;;  %v2117_v2 = vsel %vm880_vm14, %v6438_v54, %v2116_v42  ;;  %v2110_v33 = vrot.slane %v6519_v34, 4  ;;  %v2180_v32 = vrot.slane %v6528_v44, 4  ;;  %v6732_v1 = vsel %vm636_vm3, %v6257_v3, %v2877_v25  ;;  %v7880_v42 = vld [vmem:[#allocation61_spill] sm:$0xff]  ;;  %v7881_v25 = vld [vmem:[#allocation8_spill] sm:$0xff] }
 0x2f2   : > { %v2852_v53 = vsel %vm586_vm0, %v2849_v40, %v7873_v10  ;;  %2706 = vmatpush1.bf16.msra.mxu0 %v5292_v4  ;;  %2747 = vmatpush1.bf16.msra.mxu1 %v5294_v0  ;;  %v2177_v48 = vrot.slane %v6444_v38, 4  ;;  %v2176_v40 = vrot.slane %v6446_v17, 4  ;;  %v2179_v5 = vrot.slane %v6526_v35, 4  ;;  %v7879_v4 = vld [vmem:[#allocation50_spill] sm:$0xff] }
 0x2f3   : > { %2707 = vmatprep.subr.bf16.mxu0 %v5577_v16  ;;  %2748 = vmatprep.subr.bf16.mxu1 %v5579_v14  ;;  %v2900_v54 = vsel %vm586_vm0, %v2896_v30, %v2897_v27  ;;  %v5302_v59 = vcombine.low %v6229_v39, %v2119_v15  ;;  %v2246_v41 = vrot.slane %v7874_v47, 4  ;;  %v6744_v3 = vsel %vm612_vm2, %v6243_v57, %v2852_v53 }
 0x2f4   : > { %v5300_v37 = vcombine.low %v7875_v61, %v2117_v2  ;;  %v2122_v52 = vsel %vm586_vm0, %v2111_v60, %v7876_v21  ;;  %v5301_v7 = vcombine.high %v7875_v61, %v2117_v2  ;;  %v5303_v62 = vcombine.high %v6229_v39, %v2119_v15 }
 0x2f5   : > { %v2102_v43 = vpop.permute.xlu1 %2101  ;;  %v2104_v8 = vpop.permute.xlu0 %2103  ;;  %v2191_v58 = vsel %vm586_vm0, %v2180_v32, %v7877_v23  ;;  %v2120_v57 = vsel %vm586_vm0, %v2110_v33, %v2111_v60  ;;  %v2187_v12 = vsel %vm586_vm0, %v2177_v48, %v7878_v31  ;;  %v2185_v0 = vsel %vm586_vm0, %v2176_v40, %v2177_v48 }
 0x2f6   : > { %v2113_v22 = vrot.slane %v2102_v43, 4  ;;  %2708 = vmatpush1.bf16.msra.mxu0 %v5581_v24  ;;  %2749 = vmatpush1.bf16.msra.mxu1 %v5582_v29  ;;  %v2114_v9 = vrot.slane %v2104_v8, 4  ;;  %v2245_v45 = vrot.slane %v7879_v4, 4  ;;  %v2189_v39 = vsel %vm586_vm0, %v2179_v5, %v2180_v32  ;;  %v7884_v24 = vld [vmem:[#allocation51_spill] sm:$0xff] }
 0x2f7   : > { %2709 = vmatprep.subr.bf16.mxu0 %v5301_v7  ;;  %2750 = vmatprep.subr.bf16.mxu1 %v5303_v62  ;;  %v2256_v18 = vsel %vm586_vm0, %v2246_v41, %v7880_v42  ;;  %v2123_v19 = vsel %vm880_vm14, %v6521_v13, %v2122_v52  ;;  %v7882_v27 = vrot.slane %v7881_v25, 4  ;;  %v2192_v16 = vsel %vm952_vm11, %v6528_v44, %v2191_v58 }
 0x2f8   : > { %v2124_v60 = vsel %vm586_vm0, %v2113_v22, %v2114_v9  ;;  %v2121_v2 = vsel %vm880_vm14, %v6519_v34, %v2120_v57  ;;  %v7883_v33 = vunpack.i.l.bf16 %v6225_v51  ;;  %v2190_v44 = vsel %vm952_vm11, %v6526_v35, %v2189_v39  ;;  %v7888_v57 = vld [vmem:[#allocation52_spill] sm:$0xff] }
 0x2f9   : > { %v2126_v15 = vsel %vm586_vm0, %v2114_v9, %v7882_v27  ;;  %v6770_v10 = vpop.permute.xlu1 %3148  ;;  %v6772_v53 = vpop.permute.xlu0 %3146  ;;  %v2125_v13 = vsel %vm880_vm14, %v2102_v43, %v2124_v60  ;;  %v2254_v5 = vsel %vm586_vm0, %v2245_v45, %v2246_v41  ;;  %v2315_v29 = vrot.slane %v7884_v24, 4  ;;  %v7886_v43 = vld [vmem:[#allocation53_spill] sm:$0xff]  ;;  %v7890_v39 = vld [vmem:[#allocation60_spill] sm:$0xff] }
 0x2fa   : > { %v2127_v14 = vsel %vm880_vm14, %v2104_v8, %v2126_v15  ;;  %v2316_v32 = vrot.slane %v7883_v33, 4  ;;  %2710 = vmatpush1.bf16.msra.mxu0 %v5300_v37  ;;  %2751 = vmatpush1.bf16.msra.mxu1 %v5302_v59  ;;  %v5304_v40 = vcombine.low %v2121_v2, %v2125_v13  ;;  %v5305_v61 = vcombine.high %v2121_v2, %v2125_v13  ;;  %v7885_v37 = vld [vmem:[#allocation54_spill] sm:$0xff]  ;;  %v7887_v8 = vld [vmem:[#allocation56_spill] sm:$0xff] }
 0x2fb   : > { %v5306_v48 = vcombine.low %v2123_v19, %v2127_v14  ;;  %v5307_v21 = vcombine.high %v2123_v19, %v2127_v14  ;;  %v6785_v34 = vsel %vm660_vm4, %v6279_v11, %v2900_v54  ;;  %v2188_v51 = vsel %vm952_vm11, %v6444_v38, %v2187_v12 }
 0x2fc   : > { %v2186_v59 = vsel %vm952_vm11, %v6446_v17, %v2185_v0  ;;  %v2249_v52 = vrot.slane %v7885_v37, 4  ;;  %v2248_v35 = vrot.slane %v7886_v43, 4  ;;  %v2318_v41 = vrot.slane %v7887_v8, 4  ;;  %2711 = vmatprep.subr.bf16.mxu0 %v5305_v61  ;;  %v7889_v0 = vld [vmem:[#allocation55_spill] sm:$0xff] }
 0x2fd   : > { %2752 = vmatprep.subr.bf16.mxu1 %v5307_v21  ;;  %v2171_v7 = vpop.permute.xlu1 %2170  ;;  %v2173_v62 = vpop.permute.xlu0 %2172  ;;  %v5309_v23 = vcombine.high %v2186_v59, %v2190_v44  ;;  %v5311_v58 = vcombine.high %v2188_v51, %v2192_v16  ;;  %v2257_v54 = vsel %vm976_vm15, %v7874_v47, %v2256_v18  ;;  %v2255_v38 = vsel %vm976_vm15, %v7879_v4, %v2254_v5  ;;  %v7891_v47 = vld [vmem:[#allocation13_spill] sm:$0xff]  ;;  %v7893_v21 = vld [vmem:[#allocation18_spill] sm:$0xff] }
 0x2fe   : > { %v2182_v22 = vrot.slane %v2171_v7, 4  ;;  %2712 = vmatpush1.bf16.msra.mxu0 %v5304_v40  ;;  %v2183_v17 = vrot.slane %v2173_v62, 4  ;;  %2753 = vmatpush1.bf16.msra.mxu1 %v5306_v48  ;;  %v2325_v9 = vsel %vm586_vm0, %v2315_v29, %v2316_v32  ;;  %v2314_v31 = vrot.slane %v7888_v57, 4 }
 0x2ff   : > { %v5310_v12 = vcombine.low %v2188_v51, %v2192_v16  ;;  %v2317_v45 = vrot.slane %v7889_v0, 4  ;;  %2713 = vmatprep.subr.bf16.mxu0 %v5309_v23  ;;  %2754 = vmatprep.subr.bf16.mxu1 %v5311_v58  ;;  %v2260_v42 = vsel %vm586_vm0, %v2249_v52, %v7890_v39  ;;  %v7892_v18 = vrot.slane %v7891_v47, 4 }
 0x300   : > { %v5308_v19 = vcombine.low %v2186_v59, %v2190_v44  ;;  %v2193_v25 = vsel %vm586_vm0, %v2182_v22, %v2183_v17  ;;  %v2329_v27 = vsel %vm586_vm0, %v2318_v41, %v6694_v20  ;;  %v2258_v2 = vsel %vm586_vm0, %v2248_v35, %v2249_v52 }
 0x301   : > { %v2195_v4 = vsel %vm586_vm0, %v2183_v17, %v7892_v18  ;;  %v2240_v60 = vpop.permute.xlu1 %2239  ;;  %v2242_v16 = vpop.permute.xlu0 %2241  ;;  %v2194_v14 = vsel %vm952_vm11, %v2171_v7, %v2193_v25  ;;  %v2323_v40 = vsel %vm586_vm0, %v2314_v31, %v2315_v29  ;;  %v2327_v20 = vsel %vm586_vm0, %v2317_v45, %v2318_v41  ;;  %v7895_v7 = vld [vmem:[#allocation21_spill] sm:$0xff]  ;;  %v7902_v25 = vld [vmem:[#allocation26_spill] sm:$0xff] }
 0x302   : > { %v2196_v15 = vsel %vm952_vm11, %v2173_v62, %v2195_v4  ;;  %v2251_v33 = vrot.slane %v2240_v60, 4  ;;  %2714 = vmatpush1.bf16.msra.mxu0 %v5308_v19  ;;  %v2252_v32 = vrot.slane %v2242_v16, 4  ;;  %2755 = vmatpush1.bf16.msra.mxu1 %v5310_v12  ;;  %v5312_v48 = vcombine.low %v2194_v14, %v2255_v38  ;;  %v7900_v12 = vld [vmem:[#allocation25_spill] sm:$0xff] }
 0x303   : > { %v5314_v13 = vcombine.low %v2196_v15, %v2257_v54  ;;  %v5313_v44 = vcombine.high %v2194_v14, %v2255_v38  ;;  %v5315_v5 = vcombine.high %v2196_v15, %v2257_v54  ;;  %v2261_v61 = vsel %vm976_vm15, %v7885_v37, %v2260_v42  ;;  %v7897_v54 = vld [vmem:[#allocation22_spill] sm:$0xff] }
 0x304   : > { %v7894_v51 = vrot.slane %v7893_v21, 4  ;;  %v2259_v52 = vsel %vm976_vm15, %v7886_v43, %v2258_v2  ;;  %v2262_v35 = vsel %vm586_vm0, %v2251_v33, %v2252_v32  ;;  %v2895_v62 = vrot.slane %v7895_v7, 4 }
 0x305   : > { %vm7896_vm1 = vcmask 875520   ;;  %2715 = vmatprep.subr.bf16.mxu0 %v5313_v44  ;;  %2756 = vmatprep.subr.bf16.mxu1 %v5315_v5  ;;  %v6826_v41 = vpop.permute.xlu1 %3169  ;;  %v6828_v37 = vpop.permute.xlu0 %3150  ;;  %v2263_v58 = vsel %vm976_vm15, %v2240_v60, %v2262_v35  ;;  %v2919_v38 = vrot.slane %v7897_v54, 4  ;;  %v2920_v45 = vrot.slane %v7900_v12, 4  ;;  %v7907_v35 = vld [vmem:[#allocation28_spill] sm:$0xff] }
 0x306   : > { %v2264_v59 = vsel %vm586_vm0, %v2252_v32, %v7894_v51  ;;  %v2330_v29 = vsel %vm7896_vm1, %v7887_v8, %v2329_v27  ;;  %2716 = vmatpush1.bf16.msra.mxu0 %v5312_v48  ;;  %2757 = vmatpush1.bf16.msra.mxu1 %v5314_v13  ;;  %v5316_v22 = vcombine.low %v2259_v52, %v2263_v58  ;;  %vm7898_vm2 = vmmov %vm7896_vm1  ;;  %v7899_v8 = vld [vmem:[#allocation23_spill] sm:$0xff]  ;;  %v7904_v32 = vld [vmem:[#allocation24_spill] sm:$0xff] }
 0x307   : > { %v2265_v23 = vsel %vm976_vm15, %v2242_v16, %v2264_v59  ;;  %v2328_v17 = vsel %vm7898_vm2, %v7889_v0, %v2327_v20  ;;  %v2918_v31 = vrot.slane %v7899_v8, 4  ;;  %v5317_v39 = vcombine.high %v2259_v52, %v2263_v58  ;;  %vm7901_vm3 = vmmov %vm7896_vm1  ;;  %v7903_v27 = vld [vmem:[#allocation27_spill] sm:$0xff] }
 0x308   : > { %v5318_v43 = vcombine.low %v2261_v61, %v2265_v23  ;;  %v5319_v42 = vcombine.high %v2261_v61, %v2265_v23  ;;  %v2326_v47 = vsel %vm7901_vm3, %v7884_v24, %v2325_v9  ;;  %v2324_v18 = vsel %vm7896_vm1, %v7888_v57, %v2323_v40  ;;  %v7905_v61 = vld [vmem:[#allocation19_spill] sm:$0xff]  ;;  %vm7908_vm2 = vmmov %vm7896_vm1 }
 0x309   : > { %v5336_v4 = vcombine.low %v6703_v6, %v6744_v3  ;;  %v5337_v19 = vcombine.high %v6703_v6, %v6744_v3  ;;  %v2943_v0 = vrot.slane %v7902_v25, 4  ;;  %v2942_v15 = vrot.slane %v7903_v27, 4  ;;  %2717 = vmatprep.subr.bf16.mxu0 %v5317_v39  ;;  %v2309_v60 = vpop.permute.xlu1 %2308  ;;  %v2311_v16 = vpop.permute.xlu0 %2310  ;;  %vm7909_vm3 = vmmov %vm7896_vm1  ;;  %v7914_v25 = vld [vmem:[#allocation33_spill] sm:$0xff] }
 0x30a   : > { %2758 = vmatprep.subr.bf16.mxu1 %v5319_v42  ;;  %v5321_v14 = vcombine.high %v2324_v18, %v2328_v17  ;;  %v5323_v2 = vcombine.high %v2326_v47, %v2330_v29  ;;  %v5342_v24 = vcombine.low %v6732_v1, %v6785_v34  ;;  %v2320_v9 = vrot.slane %v2309_v60, 4  ;;  %2718 = vmatpush1.bf16.msra.mxu0 %v5316_v22  ;;  %v7927_v3 = vld [vmem:[#allocation41_spill] sm:$0xff] }
 0x30b   : > { %v2321_v57 = vrot.slane %v2311_v16, 4  ;;  %2759 = vmatpush1.bf16.msra.mxu1 %v5318_v43  ;;  %v5339_v13 = vcombine.high %v6655_v49, %v6674_v46  ;;  %v2921_v33 = vsel %vm586_vm0, %v2918_v31, %v2919_v38  ;;  %v2941_v48 = vrot.slane %v7904_v32, 4 }
 0x30c   : > { %v2923_v40 = vsel %vm586_vm0, %v2919_v38, %v2920_v45  ;;  %2719 = vmatprep.subr.bf16.mxu0 %v5321_v14  ;;  %2760 = vmatprep.subr.bf16.mxu1 %v5323_v2  ;;  %v2898_v44 = vsel %vm586_vm0, %v2895_v62, %v2896_v30  ;;  %v5322_v5 = vcombine.low %v2326_v47, %v2330_v29  ;;  %v7906_v21 = vrot.slane %v7905_v61, 4  ;;  %v7910_v30 = vld [vmem:[#allocation29_spill] sm:$0xff]  ;;  %v7911_v29 = vld [vmem:[#allocation31_spill] sm:$0xff]  ;;  %v7913_v47 = vld [vmem:[#allocation32_spill] sm:$0xff] }
 0x30d   : > { %v2331_v20 = vsel %vm586_vm0, %v2320_v9, %v2321_v57  ;;  %v5320_v59 = vcombine.low %v2324_v18, %v2328_v17  ;;  %v2946_v52 = vsel %vm586_vm0, %v2942_v15, %v2943_v0  ;;  %v2965_v23 = vrot.slane %v7907_v35, 4  ;;  %v6863_v38 = vpop.permute.xlu1 %3173  ;;  %v6865_v43 = vpop.permute.xlu0 %3171  ;;  %v7916_v14 = vld [vmem:[#allocation30_spill] sm:$0xff]  ;;  %v7920_v61 = vld [vmem:[#allocation35_spill] sm:$0xff] }
 0x30e   : > { %v2333_v51 = vsel %vm586_vm0, %v2321_v57, %v7906_v21  ;;  %v2332_v11 = vsel %vm7909_vm3, %v2309_v60, %v2331_v20  ;;  %v2964_v62 = vrot.slane %v7910_v30, 4  ;;  %v2966_v22 = vrot.slane %v7911_v29, 4 }
 0x30f   : > { %v2334_v58 = vsel %vm7908_vm2, %v2311_v16, %v2333_v51  ;;  %2720 = vmatpush1.bf16.msra.mxu0 %v5320_v59  ;;  %2761 = vmatpush1.bf16.msra.mxu1 %v5322_v5  ;;  %vm7912_vm1 = vcmask 310272   ;;  %v5325_v45 = vcombine.high %v2332_v11, %v2332_v11  ;;  %v5324_v39 = vcombine.low %v2332_v11, %v2332_v11  ;;  %v7919_v5 = vld [vmem:[#allocation34_spill] sm:$0xff] }
 0x310   : > { %v5326_v31 = vcombine.low %v2334_v58, %v2334_v58  ;;  %v5327_v12 = vcombine.high %v2334_v58, %v2334_v58  ;;  %v6872_v17 = vsel %vm7912_vm1, %v7897_v54, %v2923_v40  ;;  %v6876_v42 = vsel %vm660_vm4, %v7895_v7, %v2898_v44  ;;  %v7917_v40 = vld [vmem:[#allocation48_spill] sm:$0xff]  ;;  %vm7918_vm4 = vmmov %vm7912_vm1 }
 0x311   : > { %v2989_v18 = vrot.slane %v7913_v47, 4  ;;  %v2988_v0 = vrot.slane %v7914_v25, 4  ;;  %v2944_v16 = vsel %vm586_vm0, %v2941_v48, %v2942_v15  ;;  %vm7915_vm2 = vcmask 179200   ;;  %5328 = vmatprep.subr.msk.bf16.mxu0 %vm586_vm0, %v5325_v45  ;;  %v6889_v7 = vpop.permute.xlu1 %3194  ;;  %v6892_v57 = vpop.permute.xlu0 %3192 }
 0x312   : > { %5330 = vmatprep.subr.msk.bf16.mxu1 %vm586_vm0, %v5327_v12  ;;  %v2690_v60 = vsel %vm586_vm0, %v5326_v31, 0  ;;  %v6885_v54 = vsel %vm7915_vm2, %v7903_v27, %v2946_v52  ;;  %v2987_v2 = vrot.slane %v7916_v14, 4  ;;  %v2684_v9 = vsel %vm586_vm0, %v5324_v39, 0  ;;  %vm7921_vm3 = vmmov %vm7915_vm2  ;;  %v7924_v12 = vld [vmem:[#allocation39_spill] sm:$0xff] }
 0x313   : > { %v5270_v44 = vcombine.low %v7917_v40, %v7917_v40  ;;  %v6898_v15 = vsel %vm7918_vm4, %v7899_v8, %v2921_v33  ;;  %v2967_v27 = vsel %vm586_vm0, %v2964_v62, %v2965_v23  ;;  %v2969_v48 = vsel %vm586_vm0, %v2965_v23, %v2966_v22  ;;  %2722 = vmatpush1.bf16.msra.mxu0 %v2684_v9  ;;  %v7922_v62 = vld [vmem:[#allocation36_spill] sm:$0xff]  ;;  %v7923_v22 = vld [vmem:[#allocation37_spill] sm:$0xff] }
 0x314   : > { %2763 = vmatpush1.bf16.msra.mxu1 %v2690_v60  ;;  %v3011_v20 = vrot.slane %v7919_v5, 4  ;;  %v3010_v21 = vrot.slane %v7920_v61, 4  ;;  %3714 = vmatprep.subr.bf16.mxu0 %v5337_v19  ;;  %v5340_v51 = vcombine.low %v6724_v50, %v6876_v42  ;;  %v2945_v59 = vsel %vm7921_vm3, %v7904_v32, %v2944_v16  ;;  %v5585_v19 = vld [vmem:[%s7666_s4 + $0x4] ss:$8 sps:$4 sm:$0xff]   ;;  %v7928_v60 = vld [vmem:[#allocation43_spill] sm:$0xff] }
 0x315   : > { %3767 = vmatprep.subr.bf16.mxu1 %v5339_v13  ;;  %v5346_v8 = vcombine.low %v6872_v17, %v6885_v54  ;;  %v2992_v33 = vsel %vm586_vm0, %v2988_v0, %v2989_v18  ;;  %v5341_v52 = vcombine.high %v6724_v50, %v6876_v42  ;;  %v5343_v23 = vcombine.high %v6732_v1, %v6785_v34  ;;  %v6926_v58 = vpop.permute.xlu1 %3215  ;;  %v6928_v50 = vpop.permute.xlu0 %3196  ;;  %v7925_v42 = vld [vmem:[#allocation38_spill] sm:$0xff]  ;;  %v7930_v16 = vld [vmem:[#allocation44_spill] sm:$0xff]  ;;  %v7931_v9 = vld [vmem:[#allocation45_spill] sm:$0xff] }
 0x316   : > { %v6920_v13 = vsel %vm732_vm8, %v7910_v30, %v2967_v27  ;;  %v6924_v32 = vsel %vm732_vm8, %v7907_v35, %v2969_v48  ;;  %2728 = vmatmul.mubr.bf16.vlgmr.msra.gmra.mrb[8].mxu0 %v5270_v44  ;;  %v2990_v11 = vsel %vm586_vm0, %v2987_v2, %v2988_v0  ;;  %v3033_v29 = vrot.slane %v7922_v62, 4  ;;  %v7926_v0 = vld [vmem:[#allocation40_spill] sm:$0xff] }
 0x317   : > { %2769 = vmatmul.mubr.bf16.vlgmr.msra.gmra.mrb[8].mxu1 %v5270_v44  ;;  %v3012_v31 = vrot.slane %v7923_v22, 4  ;;  %v3034_v45 = vrot.slane %v7924_v12, 4  ;;  %3715 = vmatpush1.bf16.msra.mxu0 %v5336_v4  ;;  %v5344_v35 = vcombine.low %v6898_v15, %v2945_v59  ;;  %v2993_v30 = vsel %vm756_vm9, %v7914_v25, %v2992_v33 }
 0x318   : > { %3768 = vmatpush1.bf16.msra.mxu1 %v5338_v55  ;;  %v3013_v39 = vsel %vm586_vm0, %v3010_v21, %v3011_v20  ;;  %v3035_v47 = vrot.slane %v7925_v42, 4  ;;  %3716 = vmatprep.subr.bf16.mxu0 %v5341_v52  ;;  %v5345_v18 = vcombine.high %v6898_v15, %v2945_v59  ;;  %v3057_v6 = vrot.slane %v7926_v0, 4  ;;  %v7929_v55 = vld [vmem:[#allocation42_spill] sm:$0xff]  ;;  %v7933_v52 = vld [vmem:[#allocation47_spill] sm:$0xff] }
 0x319   : > { %3769 = vmatprep.subr.bf16.mxu1 %v5343_v23  ;;  %v3056_v4 = vrot.slane %v7927_v3, 4  ;;  %v3058_v49 = vrot.slane %v7928_v60, 4  ;;  %v2991_v46 = vsel %vm756_vm9, %v7916_v14, %v2990_v11  ;;  %5389 = vmatprep.mubr.msk.bf16.mxu0 %vm1478_vm5, %v5585_v19  ;;  %v3079_v25 = vrot.slane %v7929_v55, 4  ;;  %v6956_v44 = vpop.permute.xlu1 %3219  ;;  %v6958_v15 = vpop.permute.xlu0 %3217 }
 0x31a   : > { %5392 = vmatprep.mubr.msk.bf16.mxu1 %vm1478_vm5, %v5585_v19  ;;  %v3081_v2 = vrot.slane %v7930_v16, 4  ;;  %v3080_v40 = vrot.slane %v7931_v9, 4  ;;  %v5347_v27 = vcombine.high %v6872_v17, %v6885_v54  ;;  %v6964_v14 = vsel %vm780_vm10, %v7920_v61, %v3013_v39 }
 0x31b   : > { %v3015_v48 = vsel %vm586_vm0, %v3011_v20, %v3012_v31  ;;  %3717 = vmatpush1.bf16.msra.mxu0 %v5340_v51  ;;  %v3036_v21 = vsel %vm586_vm0, %v3033_v29, %v3034_v45  ;;  %v3038_v59 = vsel %vm586_vm0, %v3034_v45, %v3035_v47  ;;  %v5349_v33 = vcombine.high %v6920_v13, %v2991_v46  ;;  %v7932_v20 = vld [vmem:[#allocation46_spill] sm:$0xff] }
 0x31c   : > { %3770 = vmatpush1.bf16.msra.mxu1 %v5342_v24  ;;  %3718 = vmatprep.subr.bf16.mxu0 %v5345_v18  ;;  %v5351_v17 = vcombine.high %v6924_v32, %v2993_v30  ;;  %v3059_v54 = vsel %vm586_vm0, %v3056_v4, %v3057_v6  ;;  %v3061_v61 = vsel %vm586_vm0, %v3057_v6, %v3058_v49  ;;  %v3107_v51 = vrot.slane %v7932_v20, 4 }
 0x31d   : > { %3771 = vmatprep.subr.bf16.mxu1 %v5347_v27  ;;  %v3106_v23 = vrot.slane %v7933_v52, 4  ;;  %v3084_v1 = vsel %vm586_vm0, %v3080_v40, %v3081_v2  ;;  %v3108_v34 = vrot.slane %v6687_v63, 4  ;;  %v6980_v24 = vpop.permute.xlu1 %3240  ;;  %v6982_v19 = vpop.permute.xlu0 %3238  ;;  %vm7934_vm1 = vcmask 146432  }
 0x31e   : > { %v3037_v11 = vsel %vm7934_vm1, %v7922_v62, %v3036_v21  ;;  %v3082_v29 = vsel %vm586_vm0, %v3079_v25, %v3080_v40  ;;  %v5350_v22 = vcombine.low %v6924_v32, %v2993_v30  ;;  %v3016_v31 = vsel %vm780_vm10, %v7919_v5, %v3015_v48  ;;  %vm7935_vm2 = vmmov %vm7934_vm1  ;;  %v5667_v21 = vld [vmem:[#allocation3 + $0x4] sm:$0xff] }
 0x31f   : > { %v3039_v45 = vsel %vm7935_vm2, %v7924_v12, %v3038_v59  ;;  %3719 = vmatpush1.bf16.msra.mxu0 %v5344_v35  ;;  %vm7936_vm4 = vcmask 15360   ;;  %v5348_v62 = vcombine.low %v6920_v13, %v2991_v46  ;;  %v3085_v5 = vsel %vm852_vm13, %v7931_v9, %v3084_v1 }
 0x320   : > { %3772 = vmatpush1.bf16.msra.mxu1 %v5346_v8  ;;  %v6994_v63 = vsel %vm7936_vm4, %v7927_v3, %v3059_v54  ;;  %vm7937_vm3 = vmmov %vm7936_vm4  ;;  %3720 = vmatprep.subr.bf16.mxu0 %v5349_v33  ;;  %v3109_v32 = vsel %vm586_vm0, %v3106_v23, %v3107_v51  ;;  %v5353_v12 = vcombine.high %v6964_v14, %v3037_v11  ;;  %v3153_v30 = vrot.slane %v6770_v10, 4 }
 0x321   : > { %v6998_v39 = vsel %vm7937_vm3, %v7926_v0, %v3061_v61  ;;  %3773 = vmatprep.subr.bf16.mxu1 %v5351_v17  ;;  %v3083_v8 = vsel %vm852_vm13, %v7929_v55, %v3082_v29  ;;  %v3111_v35 = vsel %vm586_vm0, %v3107_v51, %v3108_v34  ;;  %v3152_v42 = vrot.slane %v6772_v53, 4  ;;  %v7010_v47 = vpop.permute.xlu1 %3261  ;;  %v7012_v13 = vpop.permute.xlu0 %3242  ;;  %v5668_v61 = vld [vmem:[#allocation3 + $0xc] sm:$0xff] }
 0x322   : > { %v5355_v18 = vcombine.high %v3016_v31, %v3039_v45  ;;  %v5354_v0 = vcombine.low %v3016_v31, %v3039_v45  ;;  %v3130_v6 = vrot.slane %v6715_v56, 4  ;;  %v3154_v3 = vrot.slane %v6828_v37, 4 }
 0x323   : > { %3721 = vmatpush1.bf16.msra.mxu0 %v5348_v62  ;;  %v5352_v4 = vcombine.low %v6964_v14, %v3037_v11  ;;  %v5358_v60 = vcombine.low %v6998_v39, %v3085_v5  ;;  %v3110_v49 = vsel %vm880_vm14, %v7933_v52, %v3109_v32  ;;  %v5356_v46 = vcombine.low %v6994_v63, %v3083_v8 }
 0x324   : > { %3774 = vmatpush1.bf16.msra.mxu1 %v5350_v22  ;;  %3722 = vmatprep.subr.bf16.mxu0 %v5353_v12  ;;  %v3129_v55 = vrot.slane %v6685_v26, 4  ;;  %v3131_v25 = vrot.slane %v6713_v36, 4  ;;  %v5357_v16 = vcombine.high %v6994_v63, %v3083_v8  ;;  %v3112_v37 = vsel %vm880_vm14, %v7932_v20, %v3111_v35 }
 0x325   : > { %3775 = vmatprep.subr.bf16.mxu1 %v5355_v18  ;;  %v3155_v2 = vsel %vm586_vm0, %v3152_v42, %v3153_v30  ;;  %v3199_v9 = vrot.slane %v6889_v7, 4  ;;  %v3198_v40 = vrot.slane %v6892_v57, 4  ;;  %v7029_v27 = vpop.permute.xlu1 %3265  ;;  %v7031_v14 = vpop.permute.xlu0 %3263  ;;  %v5359_v48 = vcombine.high %v6998_v39, %v3085_v5 }
 0x326   : > { %v5360_v59 = vcombine.low %v5667_v21, %v3110_v49  ;;  %v3132_v36 = vsel %vm586_vm0, %v3129_v55, %v3130_v6  ;;  %v3157_v33 = vsel %vm586_vm0, %v3153_v30, %v3154_v3  ;;  %v3200_v17 = vrot.slane %v6928_v50, 4 }
 0x327   : > { %3723 = vmatpush1.bf16.msra.mxu0 %v5352_v4  ;;  %v5361_v54 = vcombine.high %v5667_v21, %v3110_v49  ;;  %v5362_v20 = vcombine.low %v5668_v61, %v3112_v37  ;;  %v5363_v51 = vcombine.high %v5668_v61, %v3112_v37  ;;  %v3134_v52 = vsel %vm586_vm0, %v3130_v6, %v3131_v25 }
 0x328   : > { %3776 = vmatpush1.bf16.msra.mxu1 %v5354_v0  ;;  %3724 = vmatprep.subr.bf16.mxu0 %v5357_v16  ;;  %vm7938_vm1 = vcmask 900096   ;;  %v3177_v1 = vrot.slane %v6863_v38, 4  ;;  %v3176_v34 = vrot.slane %v6865_v43, 4  ;;  %vm7939_vm2 = vcmask 1031168  }
 0x329   : > { %3777 = vmatprep.subr.bf16.mxu1 %v5359_v48  ;;  %v3156_v23 = vsel %vm7938_vm1, %v6772_v53, %v3155_v2  ;;  %v3133_v50 = vsel %vm7939_vm2, %v6685_v26, %v3132_v36  ;;  %v3175_v11 = vrot.slane %v6826_v41, 4  ;;  %v3201_v29 = vsel %vm586_vm0, %v3198_v40, %v3199_v9  ;;  %v7046_v22 = vpop.permute.xlu1 %3286  ;;  %v3285_v31 = vpop.permute.xlu0 %3284  ;;  %vm7940_vm4 = vmmov %vm7938_vm1 }
 0x32a   : > { %v3158_v45 = vsel %vm7940_vm4, %v6770_v10, %v3157_v33  ;;  %v3203_v63 = vsel %vm586_vm0, %v3199_v9, %v3200_v17  ;;  %v3245_v53 = vrot.slane %v6980_v24, 4  ;;  %v3244_v38 = vrot.slane %v6982_v19, 4  ;;  %vm7941_vm3 = vmmov %vm7939_vm2 }
 0x32b   : > { %v3246_v39 = vrot.slane %v7012_v13, 4  ;;  %3725 = vmatpush1.bf16.msra.mxu0 %v5356_v46  ;;  %v3135_v26 = vsel %vm7941_vm3, %v6715_v56, %v3134_v52  ;;  %v5364_v62 = vcombine.low %v3133_v50, %v3156_v23  ;;  %v5365_v5 = vcombine.high %v3133_v50, %v3156_v23 }
 0x32c   : > { %3778 = vmatpush1.bf16.msra.mxu1 %v5358_v60  ;;  %3726 = vmatprep.subr.bf16.mxu0 %v5361_v54  ;;  %v3180_v32 = vsel %vm586_vm0, %v3176_v34, %v3177_v1  ;;  %v3178_v10 = vsel %vm586_vm0, %v3175_v11, %v3176_v34  ;;  %v3223_v12 = vrot.slane %v6956_v44, 4  ;;  %v3222_v8 = vrot.slane %v6958_v15, 4 }
 0x32d   : > { %3779 = vmatprep.subr.bf16.mxu1 %v5363_v51  ;;  %v3202_v35 = vsel %vm976_vm15, %v6892_v57, %v3201_v29  ;;  %v3221_v30 = vrot.slane %v6926_v58, 4  ;;  %v7063_v42 = vpop.permute.xlu1 %3307  ;;  %v3289_v56 = vpop.permute.xlu0 %3288  ;;  %v5367_v13 = vcombine.high %v3135_v26, %v3158_v45  ;;  %v3204_v18 = vsel %vm976_vm15, %v6889_v7, %v3203_v63 }
 0x32e   : > { %v3247_v0 = vsel %vm586_vm0, %v3244_v38, %v3245_v53  ;;  %v3249_v6 = vsel %vm586_vm0, %v3245_v53, %v3246_v39  ;;  %v3291_v44 = vrot.slane %v7046_v22, 4  ;;  %v3290_v3 = vrot.slane %v3285_v31, 4 }
 0x32f   : > { %3727 = vmatpush1.bf16.msra.mxu0 %v5360_v59  ;;  %v3181_v57 = vsel %vm952_vm11, %v6865_v43, %v3180_v32  ;;  %v3179_v4 = vsel %vm952_vm11, %v6826_v41, %v3178_v10  ;;  %v3292_v60 = vrot.slane %v3289_v56, 4  ;;  %v5366_v49 = vcombine.low %v3135_v26, %v3158_v45 }
 0x330   : > { %3780 = vmatpush1.bf16.msra.mxu1 %v5362_v20  ;;  %3728 = vmatprep.subr.bf16.mxu0 %v5365_v5  ;;  %v3226_v7 = vsel %vm586_vm0, %v3222_v8, %v3223_v12  ;;  %v3224_v46 = vsel %vm586_vm0, %v3221_v30, %v3222_v8  ;;  %v5369_v55 = vcombine.high %v3179_v4, %v3202_v35  ;;  %vm7942_vm1 = vcmask 867328  }
 0x331   : > { %3781 = vmatprep.subr.bf16.mxu1 %v5367_v13  ;;  %v5371_v25 = vcombine.high %v3181_v57, %v3204_v18  ;;  %v3248_v16 = vsel %vm7942_vm1, %v6982_v19, %v3247_v0  ;;  %v3269_v37 = vrot.slane %v7029_v27, 4  ;;  %v3268_v43 = vrot.slane %v7031_v14, 4  ;;  %v3312_v2 = vpop.permute.xlu1 %3311  ;;  %v3310_v9 = vpop.permute.xlu0 %3309  ;;  %vm7943_vm2 = vmmov %vm7942_vm1 }
 0x332   : > { %v3250_v41 = vsel %vm7943_vm2, %v6980_v24, %v3249_v6  ;;  %v3293_v40 = vsel %vm586_vm0, %v3290_v3, %v3291_v44  ;;  %vm7944_vm4 = vcmask 875520   ;;  %v3267_v19 = vrot.slane %v7010_v47, 4 }
 0x333   : > { %3729 = vmatpush1.bf16.msra.mxu0 %v5364_v62  ;;  %v3227_v48 = vsel %vm7944_vm4, %v6958_v15, %v3226_v7  ;;  %vm7945_vm3 = vmmov %vm7944_vm4  ;;  %v3295_v27 = vsel %vm586_vm0, %v3291_v44, %v3292_v60  ;;  %v5368_v59 = vcombine.low %v3179_v4, %v3202_v35  ;;  %v5370_v36 = vcombine.low %v3181_v57, %v3204_v18 }
 0x334   : > { %3782 = vmatpush1.bf16.msra.mxu1 %v5366_v49  ;;  %v3225_v21 = vsel %vm7945_vm3, %v6926_v58, %v3224_v46  ;;  %3730 = vmatprep.subr.bf16.mxu0 %v5369_v55  ;;  %v5375_v24 = vcombine.high %v3227_v48, %v3250_v41  ;;  %v3272_v17 = vsel %vm586_vm0, %v3268_v43, %v3269_v37  ;;  %vm7946_vm1 = vcmask 728064   ;;  %v5587_v37 = vld [vmem:[%s7666_s4] ss:$8 sps:$4 sm:$0xff]  }
 0x335   : > { %3783 = vmatprep.subr.bf16.mxu1 %v5371_v25  ;;  %v5373_v33 = vcombine.high %v3225_v21, %v3248_v16  ;;  %v3270_v54 = vsel %vm586_vm0, %v3267_v19, %v3268_v43  ;;  %v3294_v61 = vsel %vm7946_vm1, %v3285_v31, %v3293_v40  ;;  %v3314_v15 = vrot.slane %v3310_v9, 4  ;;  %v3333_v20 = vpop.permute.xlu1 %3332  ;;  %v3331_v51 = vpop.permute.xlu0 %3330  ;;  %vm7947_vm2 = vmmov %vm7946_vm1  ;;  %v5588_v43 = vld [vmem:[%s7666_s4 + $0x14] ss:$8 sps:$4 sm:$0xff]  }
 0x336   : > { %v3315_v58 = vrot.slane %v3312_v2, 4  ;;  %v3337_v52 = vrot.slane %v3333_v20, 4  ;;  %v3336_v23 = vrot.slane %v3331_v51, 4  ;;  %v3296_v1 = vsel %vm7947_vm2, %v7046_v22, %v3295_v27  ;;  %v5590_v2 = vld [vmem:[%s7666_s4 + $0x10] ss:$8 sps:$4 sm:$0xff]  }
 0x337   : > { %3731 = vmatpush1.bf16.msra.mxu0 %v5368_v59  ;;  %v5372_v34 = vcombine.low %v3225_v21, %v3248_v16  ;;  %v3313_v50 = vrot.slane %v7063_v42, 4  ;;  %vm7948_vm4 = vcmask 736256   ;;  %v5374_v45 = vcombine.low %v3227_v48, %v3250_v41  ;;  %v4324_v41 = vld [vmem:[#allocation4 + $0x2c] sm:$0xf]  ;;  %v4390_v48 = vld [vmem:[#allocation4 + $0x14] sm:$0xf] }
 0x338   : > { %3784 = vmatpush1.bf16.msra.mxu1 %v5370_v36  ;;  %3732 = vmatprep.subr.bf16.mxu0 %v5373_v33  ;;  %v3273_v11 = vsel %vm7948_vm4, %v7031_v14, %v3272_v17  ;;  %vm7949_vm3 = vmmov %vm7948_vm4  ;;  %v3339_v31 = vsel %vm586_vm0, %v3336_v23, %v3337_v52  ;;  %v3318_v26 = vsel %vm586_vm0, %v3314_v15, %v3315_v58  ;;  %v4393_v21 = vld [vmem:[#allocation4 + $0x2c] sm:$0xf]  ;;  %v4327_v19 = vld [vmem:[#allocation4 + $0x44] sm:$0xf] }
 0x339   : > { %3785 = vmatprep.subr.bf16.mxu1 %v5375_v24  ;;  %v3271_v29 = vsel %vm7949_vm3, %v7010_v47, %v3270_v54  ;;  %v3316_v53 = vsel %vm586_vm0, %v3313_v50, %v3314_v15  ;;  %v3354_v38 = vpop.permute.xlu1 %3353  ;;  %v3335_v39 = vpop.permute.xlu0 %3334  ;;  %v5379_v22 = vcombine.high %v3273_v11, %v3296_v1  ;;  %v3340_v62 = vsel %vm1120_vm6, %v3331_v51, %v3339_v31  ;;  %v4459_v59 = vld [vmem:[#allocation4 + $0x14] sm:$0xf]  ;;  %v4462_v36 = vld [vmem:[#allocation4 + $0x2c] sm:$0xf]  ;;  %v4396_v33 = vld [vmem:[#allocation4 + $0x44] sm:$0xf] }
 0x33a   : > { %v5377_v63 = vcombine.high %v3271_v29, %v3294_v61  ;;  %v3338_v5 = vrot.slane %v3335_v39, 4  ;;  %v5376_v14 = vcombine.low %v3271_v29, %v3294_v61  ;;  %v3317_v47 = vsel %vm1096_vm7, %v7063_v42, %v3316_v53  ;;  %4353 = vrot.lane.b32.xlu1 %v4327_v19, %s7950_s25 }
 0x33b   : > { %3733 = vmatpush1.bf16.msra.mxu0 %v5372_v34  ;;  %v5378_v10 = vcombine.low %v3273_v11, %v3296_v1  ;;  %v3319_v12 = vsel %vm1096_vm7, %v3310_v9, %v3318_v26  ;;  %v5381_v8 = vcombine.high %v3317_v47, %v3340_v62  ;;  %v3359_v35 = vrot.slane %v3354_v38, 4  ;;  %v4321_v9 = vld [vmem:[#allocation4 + $0x14] sm:$0xf] }
 0x33c   : > { %3786 = vmatpush1.bf16.msra.mxu1 %v5374_v45  ;;  %3734 = vmatprep.subr.bf16.mxu0 %v5377_v63  ;;  %v3341_v32 = vsel %vm586_vm0, %v3337_v52, %v3338_v5  ;;  %v5380_v3 = vcombine.low %v3317_v47, %v3340_v62  ;;  %v5548_v40 = vpack.i.bf16 %v4324_v41, %v4321_v9 }
 0x33d   : > { %3787 = vmatprep.subr.bf16.mxu1 %v5379_v22  ;;  %v3358_v30 = vpop.permute.xlu1 %3357  ;;  %v3356_v56 = vpop.permute.xlu0 %3355  ;;  %v3342_v13 = vsel %vm1120_vm6, %v3333_v20, %v3341_v32  ;;  %v5553_v27 = vpack.i.bf16 %v4393_v21, %v4390_v48  ;;  %v5558_v24 = vpack.i.bf16 %v4462_v36, %v4459_v59 }
 0x33e   : > { %v3361_v18 = vrot.slane %v3358_v30, 4  ;;  %v3360_v0 = vrot.slane %v3356_v56, 4  ;;  %v5382_v6 = vcombine.low %v3319_v12, %v3342_v13  ;;  %v5383_v44 = vcombine.high %v3319_v12, %v3342_v13  ;;  %5549 = vrot.lane.b32.xlu0 %v5548_v40, %s7950_s25  ;;  %4422 = vrot.lane.b32.xlu1 %v4396_v33, %s7814_s22 }
 0x33f   : > { %3735 = vmatpush1.bf16.msra.mxu0 %v5376_v14 }
 0x340   : > { %3788 = vmatpush1.bf16.msra.mxu1 %v5378_v10  ;;  %3736 = vmatprep.subr.bf16.mxu0 %v5381_v8  ;;  %v3362_v42 = vsel %vm586_vm0, %v3359_v35, %v3360_v0  ;;  %v3364_v57 = vsel %vm586_vm0, %v3360_v0, %v3361_v18 }
 0x341   : > { %3789 = vmatprep.subr.bf16.mxu1 %v5383_v44  ;;  %v3365_v4 = vsel %vm1144_vm12, %v3356_v56, %v3364_v57  ;;  %v3363_v60 = vsel %vm1144_vm12, %v3354_v38, %v3362_v42 }
 0x342   : > { %v5386_v49 = vcombine.low %v3365_v4, %v3365_v4  ;;  %v5387_v7 = vcombine.high %v3365_v4, %v3365_v4  ;;  %v5385_v46 = vcombine.high %v3363_v60, %v3363_v60  ;;  %v5384_v55 = vcombine.low %v3363_v60, %v3363_v60  ;;  %5554 = vrot.lane.b32.xlu0 %v5553_v27, %s7814_s22  ;;  %v7955_v4 = vld [vmem:[#allocation9_spill] sm:$0xff] }
 0x343   : > { %3737 = vmatpush1.bf16.msra.mxu0 %v5380_v3 }
 0x344   : > { %3790 = vmatpush1.bf16.msra.mxu1 %v5382_v6  ;;  %5388 = vmatprep.subr.msk.bf16.mxu0 %vm586_vm0, %v5385_v46  ;;  %v3709_v25 = vsel %vm586_vm0, %v5386_v49, 0  ;;  %v3703_v16 = vsel %vm586_vm0, %v5384_v55, 0  ;;  %v7956_v49 = vld [vmem:[#allocation11_spill] sm:$0xff] }
 0x345   : > { %5391 = vmatprep.subr.msk.bf16.mxu1 %vm586_vm0, %v5387_v7 }
 0x346   : > { %5559 = vrot.lane.b32.xlu0 %v5558_v24, %s7816_s23 }
 0x347   : > { %3739 = vmatpush1.bf16.msra.mxu0 %v3703_v16  ;;  %v7957_v16 = vld [vmem:[#allocation10_spill] sm:$0xff] }
 0x348   : > { %3792 = vmatpush1.bf16.msra.mxu1 %v3709_v25 }
 0x34a   : > { %3747 = vmatmul.mubr.bf16.vlgmr.msra.gmra.mrb[12].mxu0 %v5587_v37 }
 0x34b   : > { %3800 = vmatmul.mubr.bf16.vlgmr.msra.gmra.mrb[12].mxu1 %v5587_v37  ;;  %5390 = vmatprep.mubr.msk.bf16.mxu0 %vm1478_vm5, %v5588_v43 }
 0x34c   : > { %5393 = vmatprep.mubr.msk.bf16.mxu1 %vm1478_vm5, %v5588_v43  ;;  %v7958_v43 = vld [vmem:[#allocation12_spill] sm:$0xff]  ;;  %vm7967_vm5 = vcmask 875520  }
 0x34d   : > { %vm7968_vm6 = vmmov %vm7967_vm5 }
 0x34e   : > { %v3828_v23 = vpop.permute.xlu1 %3827  ;;  %v3862_v1 = vpop.permute.xlu0 %3861 }
 0x352   : > { %3757 = vmatmul.mubr.bf16.gmra.mrb[16].mxu0 %v5590_v2 }
 0x353   : > { %3810 = vmatmul.mubr.bf16.gmra.mrb[16].mxu1 %v5590_v2  ;;  %v3858_v34 = vpop.permute.xlu1 %3857  ;;  %v3823_v50 = vpop.permute.xlu0 %3822 }
 0x358   : > { %v3833_v11 = vpop.permute.xlu1 %3832 }
 0x35d   : > { %v3866_v25 = vpop.permute.xlu1 %3865 }
 0x3e9   : > { %v7132_v17 = vpop.f32.mrb[8].mxu0 }
 0x3ea   : > { %7951 = vst [vmem:[#allocation49_spill] sm:$0xff] %v7132_v17  ;;  %v7134_v54 = vpop.f32.mrb[8].mxu1  ;;  %v7136_v61 = vpop.f32.mrb[9].mxu0 }
 0x3eb   : > { %7952 = vst [vmem:[#allocation20_spill] sm:$0xff] %v7134_v54  ;;  %7953 = vst [vmem:[#allocation57_spill] sm:$0xff] %v7136_v61  ;;  %v7138_v15 = vpop.f32.mrb[9].mxu1  ;;  %v2733_v20 = vpop.f32.mrb[10].mxu0 }
 0x3ec   : > { %7954 = vst [vmem:[#allocation58_spill] sm:$0xff] %v7138_v15  ;;  %v2774_v51 = vpop.f32.mrb[10].mxu1  ;;  %v2734_v58 = vpop.f32.mrb[11].mxu0 }
 0x3ed   : > { %v2775_v52 = vpop.f32.mrb[11].mxu1 }
 0x41d   : > { %v3748_v29 = vpop.f32.mrb[12].mxu0 }
 0x41e   : > { %v3801_v31 = vpop.f32.mrb[12].mxu1  ;;  %v3840_v45 = vmul.f32 %v3823_v50, %v3748_v29  ;;  %v3750_v53 = vpop.f32.mrb[13].mxu0 }
 0x41f   : > { %v3842_v63 = vmul.f32 %v3823_v50, %v3801_v31  ;;  %v3803_v38 = vpop.f32.mrb[13].mxu1  ;;  %v3841_v39 = vmul.f32 %v3823_v50, %v3750_v53  ;;  %v3752_v26 = vpop.f32.mrb[14].mxu0 }
 0x420   : > { %v3843_v22 = vmul.f32 %v3823_v50, %v3803_v38  ;;  %v3805_v62 = vpop.f32.mrb[14].mxu1  ;;  %v3872_v5 = vadd.f32 %v3858_v34, %v3840_v45  ;;  %v3844_v47 = vmul.f32 %v3828_v23, %v3752_v26  ;;  %v3754_v10 = vpop.f32.mrb[15].mxu0 }
 0x421   : > { %v3874_v14 = vadd.f32 %v3858_v34, %v3842_v63  ;;  %v3846_v32 = vmul.f32 %v3828_v23, %v3805_v62  ;;  %v3807_v12 = vpop.f32.mrb[15].mxu1  ;;  %v3873_v8 = vadd.f32 %v3858_v34, %v3841_v39  ;;  %v3845_v30 = vmul.f32 %v3828_v23, %v3754_v10 }
 0x422   : > { %v3875_v35 = vadd.f32 %v3858_v34, %v3843_v22  ;;  %v3847_v56 = vmul.f32 %v3828_v23, %v3807_v12  ;;  %v3888_v13 = vmax.f32 %v3872_v5, 0.0  ;;  %v3876_v0 = vadd.f32 %v3862_v1, %v3844_v47 }
 0x423   : > { %v3890_v18 = vmax.f32 %v3874_v14, 0.0  ;;  %v3878_v6 = vadd.f32 %v3862_v1, %v3846_v32  ;;  %v3889_v44 = vmax.f32 %v3873_v8, 0.0  ;;  %v3877_v42 = vadd.f32 %v3862_v1, %v3845_v30 }
 0x424   : > { %v3891_v3 = vmax.f32 %v3875_v35, 0.0  ;;  %v3879_v57 = vadd.f32 %v3862_v1, %v3847_v56  ;;  %v7141_v60 = vmul.f32 %v3888_v13, %v7955_v4  ;;  %v3892_v46 = vmax.f32 %v3876_v0, 0.0 }
 0x425   : > { %v7144_v7 = vmul.f32 %v3890_v18, %v7956_v49  ;;  %v3894_v55 = vmax.f32 %v3878_v6, 0.0  ;;  %v7147_v37 = vmul.f32 %v3889_v44, %v7957_v16  ;;  %v3893_v9 = vmax.f32 %v3877_v42, 0.0  ;;  %v3758_v40 = vpop.f32.mrb[16].mxu0 }
 0x426   : > { %v7150_v2 = vmul.f32 %v3891_v3, %v7958_v43  ;;  %v3895_v41 = vmax.f32 %v3879_v57, 0.0  ;;  %v3811_v48 = vpop.f32.mrb[16].mxu1  ;;  %v7153_v21 = vmul.f32 %v3892_v46, %v7955_v4  ;;  %v3848_v27 = vmul.f32 %v3833_v11, %v3758_v40  ;;  %v3760_v36 = vpop.f32.mrb[17].mxu0 }
 0x427   : > { %v7156_v19 = vmul.f32 %v3894_v55, %v7956_v49  ;;  %v3850_v59 = vmul.f32 %v3833_v11, %v3811_v48  ;;  %v3813_v33 = vpop.f32.mrb[17].mxu1  ;;  %v7160_v24 = vpack.c.bf16 %v7147_v37, %v7141_v60  ;;  %v7167_v51 = vmul.f32 %v3893_v9, %v7957_v16  ;;  %v7172_v52 = vpop.f32.mrb[18].mxu0 }
 0x428   : > { %v7164_v20 = vpack.c.bf16 %v7150_v2, %v7144_v7  ;;  %v7170_v58 = vmul.f32 %v3895_v41, %v7958_v43  ;;  %7959 = vst [vmem:[#allocation59_spill] sm:$0xff] %v7172_v52  ;;  %v7174_v23 = vpop.f32.mrb[18].mxu1  ;;  %v3849_v1 = vmul.f32 %v3833_v11, %v3760_v36  ;;  %v3851_v34 = vmul.f32 %v3833_v11, %v3813_v33  ;;  %v7176_v31 = vpop.f32.mrb[19].mxu0  ;;  %v4531_v36 = vld [vmem:[#allocation4 + $0x2c] sm:$0xf] }
 0x429   : > { %7960 = vst [vmem:[#allocation50_spill] sm:$0xff] %v7174_v23  ;;  %v3880_v50 = vadd.f32 %v3866_v25, %v3848_v27  ;;  %v3882_v29 = vadd.f32 %v3866_v25, %v3850_v59  ;;  %7961 = vst [vmem:[#allocation61_spill] sm:$0xff] %v7176_v31  ;;  %v7178_v45 = vpop.f32.mrb[19].mxu1  ;;  %v7184_v63 = vpack.c.bf16 %v7167_v51, %v7153_v21  ;;  %v7265_v9 = vpop.permute.xlu0 %5549  ;;  %v4528_v59 = vld [vmem:[#allocation4 + $0x14] sm:$0xf] }
 0x42a   : > { %7962 = vst [vmem:[#allocation8_spill] sm:$0xff] %v7178_v45  ;;  %4025 = vst [vmem:[#allocation4 + $0x4] sm:$0xff] %v7160_v24  ;;  %v7188_v53 = vpack.c.bf16 %v7170_v58, %v7156_v19  ;;  %v3881_v38 = vadd.f32 %v3866_v25, %v3849_v1  ;;  %v3883_v11 = vadd.f32 %v3866_v25, %v3851_v34  ;;  %v7271_v41 = vpop.permute.xlu1 %4353  ;;  %v7301_v1 = vld [vmem:[%s7670_s8] sm:$0xff] }
 0x42b   : > { %4026 = vst [vmem:[#allocation4 + $0xc] sm:$0xff] %v7164_v20  ;;  %v3896_v39 = vmax.f32 %v3880_v50, 0.0  ;;  %v3898_v22 = vmax.f32 %v3882_v29, 0.0  ;;  %4027 = vst [vmem:[#allocation4 + $0x1c] sm:$0xff] %v7184_v63  ;;  %v5563_v33 = vpack.i.bf16 %v4531_v36, %v4528_v59  ;;  %v5401_v34 = vcombine.high %v7301_v1, %v7301_v1 }
 0x42c   : > { %4028 = vst [vmem:[#allocation4 + $0x24] sm:$0xff] %v7188_v53  ;;  %v3897_v26 = vmax.f32 %v3881_v38, 0.0  ;;  %v3899_v62 = vmax.f32 %v3883_v11, 0.0 }
 0x42d   : > { %v3908_v5 = vmul.f32 %v3896_v39, %v7955_v4  ;;  %v3910_v14 = vmul.f32 %v3898_v22, %v7956_v49  ;;  %v7273_v40 = vpop.permute.xlu0 %5554  ;;  %5459 = vmatprep.mubr.msk.bf16.mxu0 %vm1096_vm7, %v5401_v34  ;;  %5461 = vmatprep.mubr.msk.bf16.mxu1 %vm1096_vm7, %v5401_v34  ;;  %vm7969_vm7 = vmmov %vm7967_vm5 }
 0x42e   : > { %v3909_v47 = vmul.f32 %v3897_v26, %v7957_v16  ;;  %v3911_v32 = vmul.f32 %v3899_v62, %v7958_v43  ;;  %v4465_v43 = vld [vmem:[#allocation4 + $0x44] sm:$0xf]  ;;  %v7283_v48 = vpop.permute.xlu1 %4422 }
 0x430   : > { %v7196_v8 = vpack.c.bf16 %v3909_v47, %v3908_v5  ;;  %v7198_v35 = vpack.c.bf16 %v3911_v32, %v3910_v14  ;;  %v4595_v14 = vld [vmem:[%s7672_s10] sm:$0xff] }
 0x431   : > { %v4031_v10 = vld [vmem:[#allocation4] sm:$0xff]  ;;  %v7285_v27 = vpop.permute.xlu0 %5559  ;;  %v2347_v47 = vld [vmem:[%s7671_s9] sm:$0xff] }
 0x432   : > { %v4032_v12 = vld [vmem:[#allocation4 + $0x8] sm:$0xff]  ;;  %4049 = vrot.lane.b32.xlu0 %v4031_v10, %s7794_s27  ;;  %4029 = vst [vmem:[#allocation4 + $0x34] sm:$0xff] %v7196_v8  ;;  %4030 = vst [vmem:[#allocation4 + $0x3c] sm:$0xff] %v7198_v35  ;;  %v4033_v30 = vld [vmem:[#allocation4 + $0x10] sm:$0xf] }
 0x433   : > { %4051 = vrot.lane.b32.xlu1 %v4032_v12, %s7794_s27  ;;  %v4102_v56 = vld [vmem:[#allocation4 + $0x10] sm:$0xf]  ;;  %v4034_v0 = vld [vmem:[#allocation4 + $0x18] sm:$0xff]  ;;  %v4035_v6 = vld [vmem:[#allocation4 + $0x20] sm:$0xff] }
 0x434   : > { %v4171_v13 = vld [vmem:[#allocation4 + $0x10] sm:$0xf]  ;;  %v4036_v44 = vld [vmem:[#allocation4 + $0x28] sm:$0xf] }
 0x435   : > { %v4240_v18 = vld [vmem:[#allocation4 + $0x10] sm:$0xf]  ;;  %v4105_v3 = vld [vmem:[#allocation4 + $0x28] sm:$0xf] }
 0x436   : > { %4053 = vrot.lane.b32.xlu0 %v4033_v30, %s7794_s27  ;;  %v4174_v42 = vld [vmem:[#allocation4 + $0x28] sm:$0xf] }
 0x437   : > { %4120 = vrot.lane.b32.xlu1 %v4032_v12, %s7795_s28  ;;  %v4243_v57 = vld [vmem:[#allocation4 + $0x28] sm:$0xf] }
 0x439   : > { %v4037_v4 = vld [vmem:[#allocation4 + $0x30] sm:$0xff]  ;;  %v4039_v49 = vld [vmem:[#allocation4 + $0x40] sm:$0xf]  ;;  %v4038_v46 = vld [vmem:[#allocation4 + $0x38] sm:$0xff] }
 0x43a   : > { %4118 = vrot.lane.b32.xlu0 %v4031_v10, %s7795_s28  ;;  %v4108_v55 = vld [vmem:[#allocation4 + $0x40] sm:$0xf] }
 0x43b   : > { %4122 = vrot.lane.b32.xlu1 %v4102_v56, %s7795_s28  ;;  %v4177_v25 = vld [vmem:[#allocation4 + $0x40] sm:$0xf] }
 0x43c   : > { %v4246_v16 = vld [vmem:[#allocation4 + $0x40] sm:$0xf] }
 0x43e   : > { %4187 = vrot.lane.b32.xlu0 %v4031_v10, %s7796_s29 }
 0x43f   : > { %4189 = vrot.lane.b32.xlu1 %v4032_v12, %s7796_s29 }
 0x442   : > { %4191 = vrot.lane.b32.xlu0 %v4171_v13, %s7796_s29 }
 0x443   : > { %4258 = vrot.lane.b32.xlu1 %v4032_v12, %s7799_s16 }
 0x446   : > { %4256 = vrot.lane.b32.xlu0 %v4031_v10, %s7799_s16 }
 0x447   : > { %4260 = vrot.lane.b32.xlu1 %v4240_v18, %s7799_s16 }
 0x44a   : > { %4337 = vrot.lane.b32.xlu0 %v7160_v24, %s7950_s25 }
 0x44b   : > { %4339 = vrot.lane.b32.xlu1 %v7164_v20, %s7950_s25 }
 0x44e   : > { %4406 = vrot.lane.b32.xlu0 %v7160_v24, %s7814_s22 }
 0x44f   : > { %4408 = vrot.lane.b32.xlu1 %v7164_v20, %s7814_s22 }
 0x452   : > { %4477 = vrot.lane.b32.xlu0 %v7164_v20, %s7816_s23 }
 0x453   : > { %4475 = vrot.lane.b32.xlu1 %v7160_v24, %s7816_s23 }
 0x456   : > { %4055 = vrot.lane.b32.xlu0 %v4034_v0, %s7794_s27 }
 0x457   : > { %4057 = vrot.lane.b32.xlu1 %v4035_v6, %s7794_s27 }
 0x45a   : > { %4124 = vrot.lane.b32.xlu0 %v4034_v0, %s7795_s28 }
 0x45b   : > { %4059 = vrot.lane.b32.xlu1 %v4036_v44, %s7794_s27 }
 0x45e   : > { %4128 = vrot.lane.b32.xlu0 %v4105_v3, %s7795_s28 }
 0x45f   : > { %4126 = vrot.lane.b32.xlu1 %v4035_v6, %s7795_s28 }
 0x462   : > { %4193 = vrot.lane.b32.xlu0 %v4034_v0, %s7796_s29 }
 0x463   : > { %4195 = vrot.lane.b32.xlu1 %v4035_v6, %s7796_s29 }
 0x466   : > { %4262 = vrot.lane.b32.xlu0 %v4034_v0, %s7799_s16  ;;  %v3373_v0 = vld [vmem:[%s7668_s6 + $0x18] sm:$0xff] }
 0x467   : > { %4197 = vrot.lane.b32.xlu1 %v4174_v42, %s7796_s29 }
 0x46a   : > { %4266 = vrot.lane.b32.xlu0 %v4243_v57, %s7799_s16 }
 0x46b   : > { %4264 = vrot.lane.b32.xlu1 %v4035_v6, %s7799_s16 }
 0x46e   : > { %4345 = vrot.lane.b32.xlu0 %v7188_v53, %s7950_s25 }
 0x46f   : > { %4343 = vrot.lane.b32.xlu1 %v7184_v63, %s7950_s25 }
 0x472   : > { %4412 = vrot.lane.b32.xlu0 %v7184_v63, %s7814_s22 }
 0x473   : > { %4414 = vrot.lane.b32.xlu1 %v7188_v53, %s7814_s22 }
 0x476   : > { %4061 = vrot.lane.b32.xlu0 %v4037_v4, %s7794_s27 }
 0x477   : > { %4481 = vrot.lane.b32.xlu1 %v7184_v63, %s7816_s23 }
 0x47a   : > { %4065 = vrot.lane.b32.xlu0 %v4039_v49, %s7794_s27 }
 0x47b   : > { %4063 = vrot.lane.b32.xlu1 %v4038_v46, %s7794_s27 }
 0x47e   : > { %4130 = vrot.lane.b32.xlu0 %v4037_v4, %s7795_s28 }
 0x47f   : > { %4132 = vrot.lane.b32.xlu1 %v4038_v46, %s7795_s28 }
 0x482   : > { %4199 = vrot.lane.b32.xlu0 %v4037_v4, %s7796_s29 }
 0x483   : > { %4134 = vrot.lane.b32.xlu1 %v4108_v55, %s7795_s28  ;;  %v5551_v55 = vunpack.i.l.bf16 %v7265_v9 }
 0x486   : > { %4203 = vrot.lane.b32.xlu0 %v4177_v25, %s7796_s29 }
 0x487   : > { %4201 = vrot.lane.b32.xlu1 %v4038_v46, %s7796_s29 }
 0x48a   : > { %4268 = vrot.lane.b32.xlu0 %v4037_v4, %s7799_s16 }
 0x48b   : > { %4270 = vrot.lane.b32.xlu1 %v4038_v46, %s7799_s16 }
 0x48e   : > { %4483 = vrot.lane.b32.xlu0 %v7188_v53, %s7816_s23 }
 0x48f   : > { %4272 = vrot.lane.b32.xlu1 %v4246_v16, %s7799_s16  ;;  %s514_s16 = scalar_lea.vmem %s7677_s15, %s5813_s21 }
 0x492   : > { %4544 = vrot.lane.b32.xlu0 %v7160_v24, %s7817_s30 }
 0x493   : > { %4491 = vrot.lane.b32.xlu1 %v4465_v43, %s7816_s23 }
 0x496   : > { %4351 = vrot.lane.b32.xlu0 %v7198_v35, %s7950_s25 }
 0x497   : > { %4349 = vrot.lane.b32.xlu1 %v7196_v8, %s7950_s25 }
 0x49a   : > { %4550 = vrot.lane.b32.xlu0 %v7184_v63, %s7817_s30  ;;  %v1155_v63 = vld [vmem:[%s7667_s5 + $0x18] sm:$0xff] }
 0x49b   : > { %4546 = vrot.lane.b32.xlu1 %v7164_v20, %s7817_s30 }
 0x49e   : > { %4420 = vrot.lane.b32.xlu0 %v7198_v35, %s7814_s22 }
 0x49f   : > { %4418 = vrot.lane.b32.xlu1 %v7196_v8, %s7814_s22 }
 0x4a2   : > { %4489 = vrot.lane.b32.xlu0 %v7198_v35, %s7816_s23 }
 0x4a3   : > { %4487 = vrot.lane.b32.xlu1 %v7196_v8, %s7816_s23 }
 0x4a4   : > { %v7291_v24 = vpop.permute.xlu0 %4049 }
 0x4a5   : > { %v7293_v20 = vpop.permute.xlu1 %4051 }
 0x4a6   : > { %5564 = vrot.lane.b32.xlu0 %v5563_v33, %s7817_s30 }
 0x4a7   : > { %4552 = vrot.lane.b32.xlu1 %v7188_v53, %s7817_s30  ;;  %v4534_v53 = vld [vmem:[#allocation4 + $0x44] sm:$0xf] }
 0x4a8   : > { %v7305_v50 = vpop.permute.xlu0 %4053 }
 0x4a9   : > { %v4121_v29 = vpop.permute.xlu1 %4120 }
 0x4aa   : > { %4558 = vrot.lane.b32.xlu0 %v7198_v35, %s7817_s30  ;;  %v4137_v39 = vrot.slane %v4121_v29, 4 }
 0x4ab   : > { %4556 = vrot.lane.b32.xlu1 %v7196_v8, %s7817_s30 }
 0x4ac   : > { %v4119_v38 = vpop.permute.xlu0 %4118 }
 0x4ad   : > { %v4123_v11 = vpop.permute.xlu1 %4122  ;;  %v4136_v22 = vrot.slane %v4119_v38, 4 }
 0x4ae   : > { %v4138_v26 = vrot.slane %v4123_v11, 4  ;;  %1621 = vperm.xlu0 %5545, %v1155_v63   ;;  %v5556_v11 = vunpack.i.l.bf16 %v7273_v40 }
 0x4af   : > { %4560 = vrot.lane.b32.xlu1 %v4534_v53, %s7817_s30  ;;  %v4145_v62 = vsel %vm586_vm0, %v4136_v22, %v4137_v39 }
 0x4b0   : > { %v4147_v5 = vsel %vm586_vm0, %v4137_v39, %v4138_v26  ;;  %v7326_v32 = vsel %vm756_vm9, %v4119_v38, %v4145_v62  ;;  %v4188_v10 = vpop.permute.xlu0 %4187  ;;  %v4357_v38 = vrot.slane %v5551_v55, 4 }
 0x4b1   : > { %v4190_v12 = vpop.permute.xlu1 %4189  ;;  %v7329_v30 = vsel %vm756_vm9, %v4121_v29, %v4147_v5  ;;  %v4205_v56 = vrot.slane %v4188_v10, 4 }
 0x4b2   : > { %v4206_v13 = vrot.slane %v4190_v12, 4  ;;  %5026 = vperm.xlu0 %5545, %v4595_v14  }
 0x4b3   : > { %2779 = vperm.xlu1 %5568, %v2347_v47  }
 0x4b4   : > { %v4214_v18 = vsel %vm586_vm0, %v4205_v56, %v4206_v13  ;;  %v4192_v6 = vpop.permute.xlu0 %4191 }
 0x4b5   : > { %v4259_v44 = vpop.permute.xlu1 %4258  ;;  %v7336_v3 = vsel %vm780_vm10, %v4188_v10, %v4214_v18  ;;  %v4207_v42 = vrot.slane %v4192_v6, 4  ;;  %v4426_v10 = vrot.slane %v5556_v11, 4 }
 0x4b6   : > { %5570 = vset.pattern.permute.xlu0 %v7864_v28  ;;  %v4275_v25 = vrot.slane %v4259_v44, 4 }
 0x4b7   : > { %3837 = vperm.xlu1 %5568, %v3373_v0   ;;  %v4216_v57 = vsel %vm586_vm0, %v4206_v13, %v4207_v42  ;;  %2787 = vperm.xlu0 %5570, %v2347_v47  }
 0x4b8   : > { %v4257_v4 = vpop.permute.xlu0 %4256  ;;  %v7341_v46 = vsel %vm780_vm10, %v4190_v12, %v4216_v57  ;;  %v4067_v57 = vrot.slane %v7291_v24, 4 }
 0x4b9   : > { %v4261_v49 = vpop.permute.xlu1 %4260  ;;  %v4274_v16 = vrot.slane %v4257_v4, 4 }
 0x4ba   : > { %v4276_v43 = vrot.slane %v4261_v49, 4 }
 0x4bb   : > { %5569 = vset.pattern.permute.xlu1 %v7864_v28  ;;  %v4283_v59 = vsel %vm586_vm0, %v4274_v16, %v4275_v25 }
 0x4bc   : > { %v4285_v36 = vsel %vm586_vm0, %v4275_v25, %v4276_v43  ;;  %1653 = vperm.xlu1 %5569, %v1155_v63   ;;  %v7348_v33 = vsel %vm852_vm13, %v4257_v4, %v4283_v59  ;;  %v4338_v34 = vpop.permute.xlu0 %4337  ;;  %v4068_v4 = vrot.slane %v7293_v20, 4 }
 0x4bd   : > { %v4340_v29 = vpop.permute.xlu1 %4339  ;;  %v7351_v53 = vsel %vm852_vm13, %v4259_v44, %v4285_v36  ;;  %v4355_v39 = vrot.slane %v4338_v34, 4  ;;  %v4069_v36 = vrot.slane %v7305_v50, 4 }
 0x4be   : > { %v4356_v22 = vrot.slane %v4340_v29, 4  ;;  %v4076_v59 = vsel %vm586_vm0, %v4067_v57, %v4068_v4 }
 0x4c0   : > { %v4364_v28 = vsel %vm586_vm0, %v4355_v39, %v4356_v22  ;;  %v4366_v26 = vsel %vm586_vm0, %v4356_v22, %v4357_v38  ;;  %3869 = vperm.xlu1 %5569, %v3373_v0   ;;  %v4407_v62 = vpop.permute.xlu0 %4406  ;;  %v4077_v22 = vsel %vm732_vm8, %v7291_v24, %v4076_v59 }
 0x4c1   : > { %v7357_v63 = vsel %vm880_vm14, %v4340_v29, %v4366_v26  ;;  %v4409_v5 = vpop.permute.xlu1 %4408  ;;  %v7360_v47 = vsel %vm880_vm14, %v4338_v34, %v4364_v28  ;;  %v4424_v12 = vrot.slane %v4407_v62, 4  ;;  %v4078_v26 = vsel %vm586_vm0, %v4068_v4, %v4069_v36 }
 0x4c2   : > { %v4425_v56 = vrot.slane %v4409_v5, 4 }
 0x4c4   : > { %v4433_v13 = vsel %vm586_vm0, %v4424_v12, %v4425_v56  ;;  %v4435_v18 = vsel %vm586_vm0, %v4425_v56, %v4426_v10  ;;  %5034 = vperm.xlu1 %5569, %v4595_v14   ;;  %v7367_v0 = vpop.permute.xlu0 %4477 }
 0x4c5   : > { %v7365_v6 = vsel %vm952_vm11, %v4409_v5, %v4435_v18  ;;  %v4476_v44 = vpop.permute.xlu1 %4475  ;;  %v7370_v42 = vsel %vm952_vm11, %v4407_v62, %v4433_v13  ;;  %v7782_v49 = vrot.slane %v7367_v0, 4  ;;  %v4079_v13 = vsel %vm732_vm8, %v7293_v20, %v4078_v26 }
 0x4c6   : > { %v4493_v55 = vrot.slane %v4476_v44, 4  ;;  %v5557_v20 = vunpack.i.h.bf16 %v7273_v40 }
 0x4c8   : > { %v4502_v14 = vsel %vm586_vm0, %v4493_v55, %v7782_v49  ;;  %v4056_v16 = vpop.permute.xlu0 %4055 }
 0x4c9   : > { %v7379_v25 = vsel %vm976_vm15, %v4476_v44, %v4502_v14  ;;  %v4058_v43 = vpop.permute.xlu1 %4057  ;;  %v4070_v34 = vrot.slane %v4056_v16, 4 }
 0x4ca   : > { %v4071_v29 = vrot.slane %v4058_v43, 4 }
 0x4cc   : > { %v4080_v38 = vsel %vm586_vm0, %v4070_v34, %v4071_v29  ;;  %v7384_v11 = vpop.permute.xlu0 %4124 }
 0x4cd   : > { %v4060_v39 = vpop.permute.xlu1 %4059  ;;  %v4081_v28 = vsel %vm732_vm8, %v4056_v16, %v4080_v38  ;;  %v4429_v38 = vrot.slane %v5557_v20, 4 }
 0x4ce   : > { %v4072_v62 = vrot.slane %v4060_v39, 4  ;;  %v5402_v5 = vcombine.low %v4077_v22, %v4081_v28  ;;  %v5403_v10 = vcombine.high %v4077_v22, %v4081_v28 }
 0x4d0   : > { %v4082_v12 = vsel %vm586_vm0, %v4071_v29, %v4072_v62  ;;  %4942 = vmatprep.subr.bf16.mxu0 %v5403_v10  ;;  %v4129_v50 = vpop.permute.xlu0 %4128 }
 0x4d1   : > { %4943 = vmatpush1.bf16.msra.mxu0 %v5402_v5  ;;  %v7391_v56 = vpop.permute.xlu1 %4126  ;;  %v4083_v18 = vsel %vm732_vm8, %v4058_v43, %v4082_v12  ;;  %v4141_v49 = vrot.slane %v4129_v50, 4 }
 0x4d2   : > { %v5404_v24 = vcombine.low %v4079_v13, %v4083_v18  ;;  %v5405_v44 = vcombine.high %v4079_v13, %v4083_v18  ;;  %v4140_v10 = vrot.slane %v7391_v56, 4 }
 0x4d4   : > { %4983 = vmatprep.subr.bf16.mxu1 %v5405_v44  ;;  %v4194_v57 = vpop.permute.xlu0 %4193  ;;  %v4139_v44 = vrot.slane %v7384_v11, 4 }
 0x4d5   : > { %4984 = vmatpush1.bf16.msra.mxu1 %v5404_v24  ;;  %v7396_v4 = vpop.permute.xlu1 %4195  ;;  %v4208_v12 = vrot.slane %v4194_v57, 4 }
 0x4d6   : > { %v4209_v13 = vrot.slane %v7396_v4, 4 }
 0x4d8   : > { %v7398_v55 = vpop.permute.xlu0 %4262  ;;  %v4218_v5 = vsel %vm586_vm0, %v4208_v12, %v4209_v13 }
 0x4d9   : > { %v4198_v14 = vpop.permute.xlu1 %4197 }
 0x4da   : > { %v4210_v23 = vrot.slane %v4198_v14, 4 }
 0x4dc   : > { %v7400_v16 = vpop.permute.xlu0 %4266 }
 0x4dd   : > { %v7402_v59 = vpop.permute.xlu1 %4264 }
 0x4e0   : > { %v7404_v36 = vpop.permute.xlu0 %4345 }
 0x4e1   : > { %v7406_v34 = vpop.permute.xlu1 %4343 }
 0x4e4   : > { %v7409_v43 = vpop.permute.xlu0 %4412 }
 0x4e5   : > { %v7411_v29 = vpop.permute.xlu1 %4414 }
 0x4e6   : > { %v7783_v39 = vrot.slane %v7411_v29, 4 }
 0x4e8   : > { %v4439_v22 = vsel %vm586_vm0, %v7783_v39, %v4429_v38  ;;  %v4062_v26 = vpop.permute.xlu0 %4061  ;;  %v4149_v39 = vsel %vm586_vm0, %v4139_v44, %v4140_v10 }
 0x4e9   : > { %v7419_v28 = vsel %vm952_vm11, %v7411_v29, %v4439_v22  ;;  %v7421_v62 = vpop.permute.xlu1 %4481  ;;  %v4073_v20 = vrot.slane %v4062_v26, 4 }
 0x4ec   : > { %v4066_v18 = vpop.permute.xlu0 %4065 }
 0x4ed   : > { %v4064_v24 = vpop.permute.xlu1 %4063  ;;  %v4075_v38 = vrot.slane %v4066_v18, 4 }
 0x4ee   : > { %v4074_v22 = vrot.slane %v4064_v24, 4 }
 0x4f0   : > { %v4084_v40 = vsel %vm586_vm0, %v4073_v20, %v4074_v22  ;;  %v4086_v45 = vsel %vm586_vm0, %v4074_v22, %v4075_v38  ;;  %v4131_v52 = vpop.permute.xlu0 %4130  ;;  %v4151_v38 = vsel %vm586_vm0, %v4140_v10, %v4141_v49 }
 0x4f1   : > { %v4087_v31 = vsel %vm732_vm8, %v4064_v24, %v4086_v45  ;;  %v4133_v15 = vpop.permute.xlu1 %4132  ;;  %v4085_v54 = vsel %vm732_vm8, %v4062_v26, %v4084_v40  ;;  %v4142_v50 = vrot.slane %v4131_v52, 4  ;;  %v4150_v26 = vsel %vm756_vm9, %v7384_v11, %v4149_v39  ;;  %vm7970_vm8 = vmmov %vm7967_vm5 }
 0x4f2   : > { %v5408_v61 = vcombine.low %v4087_v31, %v7329_v30  ;;  %v5409_v18 = vcombine.high %v4087_v31, %v7329_v30  ;;  %v4143_v17 = vrot.slane %v4133_v15, 4  ;;  %v5406_v44 = vcombine.low %v4085_v54, %v7326_v32 }
 0x4f3   : > { %v5407_v20 = vcombine.high %v4085_v54, %v7326_v32  ;;  %v4219_v30 = vsel %vm780_vm10, %v4194_v57, %v4218_v5  ;;  %v4220_v40 = vsel %vm586_vm0, %v4209_v13, %v4210_v23  ;;  %v4152_v10 = vsel %vm756_vm9, %v7391_v56, %v4151_v38 }
 0x4f4   : > { %v4153_v14 = vsel %vm586_vm0, %v4142_v50, %v4143_v17  ;;  %4985 = vmatprep.subr.bf16.mxu1 %v5409_v18  ;;  %v4200_v45 = vpop.permute.xlu0 %4199  ;;  %v4278_v11 = vrot.slane %v7402_v59, 4  ;;  %v4221_v23 = vsel %vm780_vm10, %v7396_v4, %v4220_v40 }
 0x4f5   : > { %4944 = vmatprep.subr.bf16.mxu0 %v5407_v20  ;;  %4986 = vmatpush1.bf16.msra.mxu1 %v5408_v61  ;;  %v4135_v12 = vpop.permute.xlu1 %4134  ;;  %v4154_v31 = vsel %vm756_vm9, %v4131_v52, %v4153_v14  ;;  %v5415_v61 = vcombine.high %v7336_v3, %v4219_v30  ;;  %v4211_v39 = vrot.slane %v4200_v45, 4  ;;  %v5414_v20 = vcombine.low %v7336_v3, %v4219_v30 }
 0x4f6   : > { %4945 = vmatpush1.bf16.msra.mxu0 %v5406_v44  ;;  %v4144_v54 = vrot.slane %v4135_v12, 4  ;;  %v5410_v32 = vcombine.low %v4150_v26, %v4154_v31  ;;  %v5411_v49 = vcombine.high %v4150_v26, %v4154_v31  ;;  %v4279_v26 = vrot.slane %v7400_v16, 4 }
 0x4f7   : > { %v5416_v3 = vcombine.low %v7341_v46, %v4221_v23 }
 0x4f8   : > { %v4155_v24 = vsel %vm586_vm0, %v4143_v17, %v4144_v54  ;;  %4946 = vmatprep.subr.bf16.mxu0 %v5411_v49  ;;  %v4204_v52 = vpop.permute.xlu0 %4203  ;;  %v4277_v17 = vrot.slane %v7398_v55, 4 }
 0x4f9   : > { %v4202_v22 = vpop.permute.xlu1 %4201  ;;  %v4156_v57 = vsel %vm756_vm9, %v4133_v15, %v4155_v24  ;;  %v4213_v5 = vrot.slane %v4204_v52, 4  ;;  %v5417_v15 = vcombine.high %v7341_v46, %v4221_v23  ;;  %v4289_v46 = vsel %vm586_vm0, %v4278_v11, %v4279_v26  ;;  %vm7971_vm9 = vmmov %vm7967_vm5 }
 0x4fa   : > { %4947 = vmatpush1.bf16.msra.mxu0 %v5410_v32  ;;  %v4212_v13 = vrot.slane %v4202_v22, 4  ;;  %v5412_v18 = vcombine.low %v4152_v10, %v4156_v57  ;;  %v5413_v56 = vcombine.high %v4152_v10, %v4156_v57  ;;  %v4287_v31 = vsel %vm586_vm0, %v4277_v17, %v4278_v11 }
 0x4fb   : > { %4948 = vmatprep.subr.bf16.mxu0 %v5415_v61  ;;  %v4288_v24 = vsel %vm852_vm13, %v7398_v55, %v4287_v31  ;;  %v4359_v55 = vrot.slane %v7404_v36, 4 }
 0x4fc   : > { %v4222_v50 = vsel %vm586_vm0, %v4211_v39, %v4212_v13  ;;  %v4224_v44 = vsel %vm586_vm0, %v4212_v13, %v4213_v5  ;;  %4987 = vmatprep.subr.bf16.mxu1 %v5413_v56  ;;  %v4269_v4 = vpop.permute.xlu0 %4268  ;;  %v4290_v5 = vsel %vm852_vm13, %v7402_v59, %v4289_v46  ;;  %v4427_v56 = vrot.slane %v7409_v43, 4 }
 0x4fd   : > { %v4225_v38 = vsel %vm780_vm10, %v4202_v22, %v4224_v44  ;;  %4988 = vmatpush1.bf16.msra.mxu1 %v5412_v18  ;;  %v4271_v14 = vpop.permute.xlu1 %4270  ;;  %v4223_v12 = vsel %vm780_vm10, %v4200_v45, %v4222_v50  ;;  %v4280_v40 = vrot.slane %v4269_v4, 4  ;;  %v5552_v22 = vunpack.i.h.bf16 %v7265_v9  ;;  %vm7972_vm10 = vmmov %vm7967_vm5 }
 0x4fe   : > { %4949 = vmatpush1.bf16.msra.mxu0 %v5414_v20  ;;  %v4281_v54 = vrot.slane %v4271_v14, 4  ;;  %4989 = vmatprep.subr.bf16.mxu1 %v5417_v15  ;;  %v5418_v30 = vcombine.low %v4223_v12, %v7348_v33  ;;  %v5419_v32 = vcombine.high %v4223_v12, %v7348_v33  ;;  %v5421_v49 = vcombine.high %v4225_v38, %v7351_v53 }
 0x4ff   : > { %v5420_v57 = vcombine.low %v4225_v38, %v7351_v53  ;;  %v5669_v18 = vpack.c.bf16 %v7167_v51, %v7147_v37  ;;  %v4358_v53 = vrot.slane %v7406_v34, 4  ;;  %v4360_v59 = vrot.slane %v5552_v22, 4 }
 0x500   : > { %v4291_v10 = vsel %vm586_vm0, %v4280_v40, %v4281_v54  ;;  %4950 = vmatprep.subr.bf16.mxu0 %v5419_v32  ;;  %v7469_v45 = vpop.permute.xlu0 %4483  ;;  %v5670_v44 = vpack.c.bf16 %v7153_v21, %v7141_v60  ;;  %v5671_v20 = vpack.c.bf16 %v7170_v58, %v7150_v2  ;;  %v4363_v37 = vrot.slane %v7271_v41, 4 }
 0x501   : > { %4990 = vmatpush1.bf16.msra.mxu1 %v5416_v3  ;;  %v4273_v16 = vpop.permute.xlu1 %4272  ;;  %v4292_v61 = vsel %vm852_vm13, %v4269_v4, %v4291_v10  ;;  %v4370_v51 = vsel %vm586_vm0, %v4359_v55, %v4360_v59  ;;  %v5431_v4 = vcombine.high %v7196_v8, %v7360_v47  ;;  %v7963_v12 = vrot.slane %v7411_v29, 4 }
 0x502   : > { %4951 = vmatpush1.bf16.msra.mxu0 %v5418_v30  ;;  %v4282_v39 = vrot.slane %v4273_v16, 4  ;;  %4991 = vmatprep.subr.bf16.mxu1 %v5421_v49  ;;  %v5422_v33 = vcombine.low %v4288_v24, %v4292_v61  ;;  %v5423_v52 = vcombine.high %v4288_v24, %v4292_v61  ;;  %v5561_v2 = vunpack.i.l.bf16 %v7285_v27 }
 0x503   : > { %v4437_v60 = vsel %vm586_vm0, %v4427_v56, %v7963_v12  ;;  %v5433_v58 = vcombine.high %v7198_v35, %v7357_v63  ;;  %v5672_v41 = vpack.c.bf16 %v7156_v19, %v7144_v7  ;;  %v4371_v31 = vsel %vm880_vm14, %v7404_v36, %v4370_v51 }
 0x504   : > { %v4293_v23 = vsel %vm586_vm0, %v4281_v54, %v4282_v39  ;;  %4952 = vmatprep.subr.bf16.mxu0 %v5423_v52  ;;  %v7481_v13 = vpop.permute.xlu0 %4544  ;;  %v5430_v54 = vcombine.low %v7196_v8, %v7360_v47  ;;  %v4438_v19 = vsel %vm952_vm11, %v7409_v43, %v4437_v60  ;;  %v5562_v8 = vunpack.i.h.bf16 %v7285_v27 }
 0x505   : > { %4992 = vmatpush1.bf16.msra.mxu1 %v5420_v57  ;;  %v7483_v11 = vpop.permute.xlu1 %4491  ;;  %v4294_v9 = vsel %vm852_vm13, %v4271_v14, %v4293_v23  ;;  %v4368_v14 = vsel %vm586_vm0, %v4358_v53, %v4359_v55  ;;  %v5432_v47 = vcombine.low %v7198_v35, %v7357_v63  ;;  %v4497_v61 = vrot.slane %v7469_v45, 4 }
 0x506   : > { %4953 = vmatpush1.bf16.msra.mxu0 %v5422_v33  ;;  %v5424_v17 = vcombine.low %v4290_v5, %v4294_v9  ;;  %v5425_v50 = vcombine.high %v4290_v5, %v4294_v9  ;;  %v4369_v3 = vsel %vm880_vm14, %v7406_v34, %v4368_v14  ;;  %v4495_v34 = vrot.slane %v5561_v2, 4 }
 0x507   : > { %4954 = vmatprep.subr.bf16.mxu0 %v5669_v18  ;;  %v5439_v43 = vcombine.high %v7370_v42, %v4438_v19  ;;  %v4432_v33 = vrot.slane %v7283_v48, 4  ;;  %v4498_v27 = vrot.slane %v5562_v8, 4  ;;  %v7964_v57 = vrot.slane %v7367_v0, 4 }
 0x508   : > { %4993 = vmatprep.subr.bf16.mxu1 %v5425_v50  ;;  %v4352_v15 = vpop.permute.xlu0 %4351  ;;  %v4496_v63 = vrot.slane %v7421_v62, 4  ;;  %v5438_v55 = vcombine.low %v7370_v42, %v4438_v19 }
 0x509   : > { %4994 = vmatpush1.bf16.msra.mxu1 %v5424_v17  ;;  %v4350_v38 = vpop.permute.xlu1 %4349  ;;  %v4362_v21 = vrot.slane %v4352_v15, 4  ;;  %v4504_v35 = vsel %vm586_vm0, %v7964_v57, %v4495_v34  ;;  %v4508_v48 = vsel %vm586_vm0, %v4497_v61, %v4498_v27 }
 0x50a   : > { %4955 = vmatpush1.bf16.msra.mxu0 %v5670_v44  ;;  %v4361_v26 = vrot.slane %v4350_v38, 4  ;;  %4995 = vmatprep.subr.bf16.mxu1 %v5671_v20  ;;  %v4505_v50 = vsel %vm976_vm15, %v7367_v0, %v4504_v35  ;;  %v4506_v42 = vsel %vm586_vm0, %v4496_v63, %v4497_v61  ;;  %v4562_v20 = vrot.slane %v7481_v13, 4 }
 0x50b   : > { %4956 = vmatprep.subr.bf16.mxu0 %v5431_v4  ;;  %v4374_v29 = vsel %vm586_vm0, %v4362_v21, %v4363_v37  ;;  %v4501_v37 = vrot.slane %v7483_v11, 4  ;;  %v4509_v0 = vsel %vm976_vm15, %v7469_v45, %v4508_v48  ;;  %v4507_v12 = vsel %vm976_vm15, %v7421_v62, %v4506_v42  ;;  %v7976_v42 = vld [vmem:[#allocation17_spill] sm:$0xff] }
 0x50c   : > { %v4372_v40 = vsel %vm586_vm0, %v4361_v26, %v4362_v21  ;;  %v4375_v30 = vsel %vm880_vm14, %v4352_v15, %v4374_v29  ;;  %v7517_v49 = vpop.permute.xlu0 %4550  ;;  %v7966_v21 = vcombine.low %v7365_v6, %v7419_v28 }
 0x50d   : > { %v4373_v32 = vsel %vm880_vm14, %v4350_v38, %v4372_v40  ;;  %4996 = vmatpush1.bf16.msra.mxu1 %v5672_v41  ;;  %v7519_v7 = vpop.permute.xlu1 %4546  ;;  %v5436_v36 = vcombine.low %v4371_v31, %v4375_v30  ;;  %v5437_v10 = vcombine.high %v4371_v31, %v4375_v30  ;;  %v7965_v38 = vcombine.high %v7365_v6, %v7419_v28 }
 0x50e   : > { %v5434_v16 = vcombine.low %v4369_v3, %v4373_v32  ;;  %v5435_v24 = vcombine.high %v4369_v3, %v4373_v32  ;;  %4957 = vmatpush1.bf16.msra.mxu0 %v5430_v54  ;;  %4997 = vmatprep.subr.bf16.mxu1 %v5433_v58  ;;  %v4563_v18 = vrot.slane %v7519_v7, 4  ;;  %v4565_v31 = vrot.slane %v7517_v49, 4 }
 0x510   : > { %4958 = vmatprep.subr.bf16.mxu0 %v5435_v24  ;;  %v4421_v46 = vpop.permute.xlu0 %4420 }
 0x511   : > { %4998 = vmatpush1.bf16.msra.mxu1 %v5432_v47  ;;  %v4419_v39 = vpop.permute.xlu1 %4418  ;;  %v4431_v52 = vrot.slane %v4421_v46, 4 }
 0x512   : > { %4959 = vmatpush1.bf16.msra.mxu0 %v5434_v16  ;;  %v4430_v22 = vrot.slane %v4419_v39, 4  ;;  %4999 = vmatprep.subr.bf16.mxu1 %v5437_v10 }
 0x513   : > { %4960 = vmatprep.subr.bf16.mxu0 %v5439_v43  ;;  %v4443_v23 = vsel %vm586_vm0, %v4431_v52, %v4432_v33 }
 0x514   : > { %v4441_v5 = vsel %vm586_vm0, %v4430_v22, %v4431_v52  ;;  %v4444_v9 = vsel %vm952_vm11, %v4421_v46, %v4443_v23  ;;  %v4490_v56 = vpop.permute.xlu0 %4489 }
 0x515   : > { %v4442_v53 = vsel %vm952_vm11, %v4419_v39, %v4441_v5  ;;  %5000 = vmatpush1.bf16.msra.mxu1 %v5436_v36  ;;  %v4488_v17 = vpop.permute.xlu1 %4487  ;;  %v4500_v51 = vrot.slane %v4490_v56, 4  ;;  %v5445_v4 = vcombine.high %v4444_v9, %v4505_v50  ;;  %v5444_v29 = vcombine.low %v4444_v9, %v4505_v50 }
 0x516   : > { %v5442_v59 = vcombine.low %v4442_v53, %v7379_v25  ;;  %v5443_v44 = vcombine.high %v4442_v53, %v7379_v25  ;;  %4961 = vmatpush1.bf16.msra.mxu0 %v5438_v55  ;;  %v4499_v15 = vrot.slane %v4488_v17, 4  ;;  %5001 = vmatprep.subr.bf16.mxu1 %v7965_v38  ;;  %v4571_v25 = vsel %vm586_vm0, %v4562_v20, %v4563_v18  ;;  %v7973_v53 = vld [vmem:[#allocation14_spill] sm:$0xff]  ;;  %v7978_v38 = vld [vmem:[#allocation57_spill] sm:$0xff] }
 0x517   : > { %v4512_v14 = vsel %vm586_vm0, %v4500_v51, %v4501_v37  ;;  %v4572_v36 = vsel %vm7967_vm5, %v7481_v13, %v4571_v25  ;;  %v5400_v5 = vcombine.low %v7301_v1, %v7301_v1  ;;  %vm3967_vm11 = vcmask 8192  }
 0x518   : > { %4962 = vmatprep.subr.bf16.mxu0 %v5443_v44  ;;  %v4510_v11 = vsel %vm586_vm0, %v4499_v15, %v4500_v51  ;;  %v5565_v60 = vpop.permute.xlu0 %5564  ;;  %v4513_v2 = vsel %vm976_vm15, %v4490_v56, %v4512_v14  ;;  %v7977_v51 = vld [vmem:[#allocation49_spill] sm:$0xff]  ;;  %v7980_v14 = vld [vmem:[#allocation58_spill] sm:$0xff] }
 0x519   : > { %5002 = vmatpush1.bf16.msra.mxu1 %v7966_v21  ;;  %v4553_v26 = vpop.permute.xlu1 %4552  ;;  %v4511_v45 = vsel %vm976_vm15, %v4488_v17, %v4510_v11  ;;  %v5567_v58 = vunpack.i.h.bf16 %v5565_v60  ;;  %v5566_v41 = vunpack.i.l.bf16 %v5565_v60  ;;  %v5449_v54 = vcombine.high %v4509_v0, %v4513_v2  ;;  %v7974_v17 = vld [vmem:[#allocation16_spill] sm:$0xff] }
 0x51a   : > { %4963 = vmatpush1.bf16.msra.mxu0 %v5442_v59  ;;  %5003 = vmatprep.subr.bf16.mxu1 %v5445_v4  ;;  %v5446_v62 = vcombine.low %v4507_v12, %v4511_v45  ;;  %v5447_v40 = vcombine.high %v4507_v12, %v4511_v45  ;;  %v4566_v32 = vrot.slane %v4553_v26, 4  ;;  %v5448_v6 = vcombine.low %v4509_v0, %v4513_v2  ;;  %v7975_v59 = vld [vmem:[#allocation15_spill] sm:$0xff]  ;;  %v7979_v4 = vld [vmem:[#allocation20_spill] sm:$0xff] }
 0x51b   : > { %v4567_v3 = vrot.slane %v5567_v58, 4  ;;  %v4564_v30 = vrot.slane %v5566_v41, 4 }
 0x51c   : > { %4964 = vmatprep.subr.bf16.mxu0 %v5447_v40  ;;  %v4559_v28 = vpop.permute.xlu0 %4558  ;;  %v4575_v16 = vsel %vm586_vm0, %v4565_v31, %v4566_v32 }
 0x51d   : > { %5004 = vmatpush1.bf16.msra.mxu1 %v5444_v29  ;;  %v4557_v19 = vpop.permute.xlu1 %4556  ;;  %v4573_v10 = vsel %vm586_vm0, %v4563_v18, %v4564_v30  ;;  %v4577_v24 = vsel %vm586_vm0, %v4566_v32, %v4567_v3  ;;  %v4569_v8 = vrot.slane %v4559_v28, 4  ;;  %v4576_v46 = vsel %vm7970_vm8, %v7517_v49, %v4575_v16  ;;  %v7982_v16 = vld [vmem:[#allocation61_spill] sm:$0xff] }
 0x51e   : > { %4965 = vmatpush1.bf16.msra.mxu0 %v5446_v62  ;;  %5005 = vmatprep.subr.bf16.mxu1 %v5449_v54  ;;  %v4574_v47 = vsel %vm7968_vm6, %v7519_v7, %v4573_v10  ;;  %v4578_v34 = vsel %vm7969_vm7, %v4553_v26, %v4577_v24  ;;  %v4568_v61 = vrot.slane %v4557_v19, 4  ;;  %v5450_v13 = vcombine.low %v4572_v36, %v4576_v46 }
 0x51f   : > { %v5453_v39 = vcombine.high %v4574_v47, %v4578_v34  ;;  %v5451_v43 = vcombine.high %v4572_v36, %v4576_v46  ;;  %v5452_v57 = vcombine.low %v4574_v47, %v4578_v34  ;;  %v7981_v36 = vld [vmem:[#allocation59_spill] sm:$0xff] }
 0x520   : > { %v4579_v33 = vsel %vm586_vm0, %v4568_v61, %v4569_v8  ;;  %v7984_v61 = vld [vmem:[#allocation8_spill] sm:$0xff] }
 0x521   : > { %5006 = vmatpush1.bf16.msra.mxu1 %v5448_v6  ;;  %v4561_v52 = vpop.permute.xlu1 %4560  ;;  %v4580_v22 = vsel %vm7971_vm9, %v4557_v19, %v4579_v33  ;;  %4966 = vmatprep.subr.bf16.mxu0 %v5451_v43 }
 0x522   : > { %v4570_v27 = vrot.slane %v4561_v52, 4  ;;  %5007 = vmatprep.subr.bf16.mxu1 %v5453_v39  ;;  %v5454_v7 = vcombine.low %v4580_v22, %v4580_v22  ;;  %v5455_v35 = vcombine.high %v4580_v22, %v4580_v22  ;;  %4967 = vmatpush1.bf16.msra.mxu0 %v5450_v13 }
 0x524   : > { %v4581_v63 = vsel %vm586_vm0, %v4569_v8, %v4570_v27  ;;  %5458 = vmatprep.subr.msk.bf16.mxu0 %vm586_vm0, %v5455_v35  ;;  %v4931_v23 = vsel %vm586_vm0, %v5454_v7, 0  ;;  %v7983_v8 = vld [vmem:[#allocation50_spill] sm:$0xff] }
 0x525   : > { %v4582_v49 = vsel %vm7972_vm10, %v4559_v28, %v4581_v63  ;;  %5008 = vmatpush1.bf16.msra.mxu1 %v5452_v57 }
 0x526   : > { %v5457_v55 = vcombine.high %v4582_v49, %v4582_v49  ;;  %v5456_v48 = vcombine.low %v4582_v49, %v4582_v49  ;;  %4969 = vmatpush1.bf16.msra.mxu0 %v4931_v23 }
 0x528   : > { %5460 = vmatprep.subr.msk.bf16.mxu1 %vm586_vm0, %v5457_v55  ;;  %v4937_v18 = vsel %vm586_vm0, %v5456_v48, 0  ;;  %vm7985_vm0 = vcmask 15360  }
 0x529   : > { %5010 = vmatpush1.bf16.msra.mxu1 %v4937_v18  ;;  %4975 = vmatmul.mubr.bf16.vlgmr.msra.gmra.mrb[20].mxu0 %v5400_v5  ;;  %vm7986_vm12 = vmmov %vm7985_vm0 }
 0x52c   : > { %5016 = vmatmul.mubr.bf16.vlgmr.msra.gmra.mrb[20].mxu1 %v5400_v5 }
 0x52d   : > { %v1622_v9 = vpop.permute.xlu0 %1621 }
 0x52e   : > { %v1636_v56 = vmul.f32 %v1622_v9, %v7973_v53  ;;  %v1637_v50 = vmul.f32 %v1622_v9, %v7974_v17  ;;  %v1638_v44 = vmul.f32 %v1622_v9, %v7975_v59  ;;  %v1639_v20 = vmul.f32 %v1622_v9, %v7976_v42 }
 0x531   : > { %v7587_v1 = vpop.permute.xlu0 %5026 }
 0x532   : > { %v2780_v37 = vpop.permute.xlu1 %2779 }
 0x533   : > { %v2782_v15 = vmul.f32 %v2780_v37, %v7977_v51  ;;  %v2783_v0 = vmul.f32 %v2780_v37, %v7978_v38  ;;  %v2784_v25 = vmul.f32 %v2780_v37, %v7979_v4  ;;  %v2785_v12 = vmul.f32 %v2780_v37, %v7980_v14 }
 0x536   : > { %v3838_v11 = vpop.permute.xlu1 %3837  ;;  %v2788_v60 = vpop.permute.xlu0 %2787 }
 0x537   : > { %v2790_v21 = vadd.f32 %v2788_v60, %v2782_v15  ;;  %v2791_v26 = vadd.f32 %v2788_v60, %v2783_v0  ;;  %v2792_v2 = vadd.f32 %v2788_v60, %v2784_v25  ;;  %v2793_v45 = vadd.f32 %v2788_v60, %v2785_v12  ;;  %v3932_v60 = vld [vmem:[%s5959_s26] sm:$0xff] }
 0x538   : > { %v3852_v10 = vmul.f32 %v3838_v11, %v7981_v36  ;;  %v3853_v24 = vmul.f32 %v3838_v11, %v7982_v16  ;;  %v3854_v47 = vmul.f32 %v3838_v11, %v7983_v8  ;;  %v3855_v46 = vmul.f32 %v3838_v11, %v7984_v61 }
 0x539   : > { %v2794_v58 = vsub.f32 0.0, %v2790_v21  ;;  %v2795_v41 = vsub.f32 0.0, %v2791_v26  ;;  %v2796_v31 = vsub.f32 0.0, %v2792_v2  ;;  %v2797_v29 = vsub.f32 0.0, %v2793_v45  ;;  %v3933_v2 = vld [vmem:[%s5959_s26 + $0x8] sm:$0xff] }
 0x53b   : > { %v1654_v62 = vpop.permute.xlu1 %1653  ;;  %v2798_v40 = vmul.f32 1.442695, %v2794_v58  ;;  %v2800_v54 = vmul.f32 1.442695, %v2795_v41  ;;  %v2802_v3 = vmul.f32 1.442695, %v2796_v31 }
 0x53c   : > { %v7593_v30 = vadd.f32 %v1654_v62, %v1636_v56  ;;  %v2804_v32 = vmul.f32 1.442695, %v2797_v29  ;;  %v7595_v6 = vadd.f32 %v1654_v62, %v1637_v50  ;;  %v7597_v28 = vadd.f32 %v1654_v62, %v1638_v44  ;;  %v3934_v29 = vld [vmem:[%s5959_s26 + $0x10] sm:$0xff] }
 0x53d   : > { %v7599_v19 = vadd.f32 %v1654_v62, %v1639_v20  ;;  %5593 = vpow2.f32 %v2798_v40 }
 0x53e   : > { %5595 = vpow2.f32 %v2800_v54  ;;  %v1719_v61 = vsub.f32 0.0, %v7597_v28 }
 0x53f   : > { %v3870_v34 = vpop.permute.xlu1 %3869  ;;  %5597 = vpow2.f32 %v2802_v3 }
 0x540   : > { %v3884_v39 = vadd.f32 %v3870_v34, %v3852_v10  ;;  %v3885_v13 = vadd.f32 %v3870_v34, %v3853_v24  ;;  %5599 = vpow2.f32 %v2804_v32  ;;  %v3886_v43 = vadd.f32 %v3870_v34, %v3854_v47  ;;  %v3935_v32 = vld [vmem:[%s5959_s26 + $0x18] sm:$0xff] }
 0x541   : > { %v3887_v33 = vadd.f32 %v3870_v34, %v3855_v46  ;;  %v1717_v47 = vsub.f32 0.0, %v7593_v30  ;;  %v1718_v34 = vsub.f32 0.0, %v7595_v6  ;;  %v3954_v46 = vld [vmem:[%s7673_s11] sm:$0xff] }
 0x542   : > { %v3912_v52 = vsub.f32 0.0, %v3884_v39  ;;  %v3913_v22 = vsub.f32 0.0, %v3885_v13  ;;  %v3914_v27 = vsub.f32 0.0, %v3886_v43  ;;  %v1720_v13 = vsub.f32 0.0, %v7599_v19 }
 0x543   : > { %v3915_v57 = vsub.f32 0.0, %v3887_v33  ;;  %v1721_v33 = vmul.f32 1.442695, %v1717_v47  ;;  %v5035_v6 = vpop.permute.xlu1 %5034 }
 0x544   : > { %v3916_v7 = vmul.f32 1.442695, %v3912_v52  ;;  %v3918_v35 = vmul.f32 1.442695, %v3913_v22  ;;  %v3920_v63 = vmul.f32 1.442695, %v3914_v27 }
 0x545   : > { %v3922_v49 = vmul.f32 1.442695, %v3915_v57  ;;  %v1723_v52 = vmul.f32 1.442695, %v1718_v34  ;;  %v1725_v27 = vmul.f32 1.442695, %v1719_v61 }
 0x546   : > { %5601 = vpow2.f32 %v3916_v7  ;;  %v1727_v57 = vmul.f32 1.442695, %v1720_v13 }
 0x547   : > { %5603 = vpow2.f32 %v3918_v35  ;;  %v5594_v23 = vpop.eup %5593 }
 0x548   : > { %5605 = vpow2.f32 %v3920_v63  ;;  %v5596_v5 = vpop.eup %5595  ;;  %v2806_v18 = vadd.f32 1.0, %v5594_v23 }
 0x549   : > { %5607 = vpow2.f32 %v3922_v49  ;;  %v5598_v55 = vpop.eup %5597  ;;  %v2807_v9 = vadd.f32 1.0, %v5596_v5 }
 0x54a   : > { %v5600_v48 = vpop.eup %5599  ;;  %v2808_v53 = vadd.f32 1.0, %v5598_v55  ;;  %5609 = vrcp.f32 %v2806_v18 }
 0x54b   : > { %v2809_v56 = vadd.f32 1.0, %v5600_v48  ;;  %5611 = vrcp.f32 %v2807_v9 }
 0x54c   : > { %5613 = vrcp.f32 %v2808_v53 }
 0x54d   : > { %5615 = vrcp.f32 %v2809_v56 }
 0x550   : > { %v5602_v17 = vpop.eup %5601 }
 0x551   : > { %v5604_v50 = vpop.eup %5603  ;;  %v3924_v59 = vadd.f32 1.0, %v5602_v17 }
 0x552   : > { %v5606_v44 = vpop.eup %5605  ;;  %v3925_v42 = vadd.f32 1.0, %v5604_v50 }
 0x553   : > { %v5608_v20 = vpop.eup %5607  ;;  %v3926_v37 = vadd.f32 1.0, %v5606_v44  ;;  %5617 = vrcp.f32 %v3924_v59 }
 0x554   : > { %v3927_v51 = vadd.f32 1.0, %v5608_v20  ;;  %5619 = vrcp.f32 %v3925_v42  ;;  %v5610_v15 = vpop.eup %5609 }
 0x555   : > { %5621 = vrcp.f32 %v3926_v37  ;;  %v5612_v38 = vpop.eup %5611 }
 0x556   : > { %5623 = vrcp.f32 %v3927_v51  ;;  %v5614_v0 = vpop.eup %5613 }
 0x557   : > { %v5616_v4 = vpop.eup %5615  ;;  %5625 = vpow2.f32 %v1721_v33 }
 0x558   : > { %5627 = vpow2.f32 %v1723_v52 }
 0x559   : > { %5629 = vpow2.f32 %v1725_v27 }
 0x55a   : > { %5631 = vpow2.f32 %v1727_v57 }
 0x55d   : > { %v5618_v25 = vpop.eup %5617 }
 0x55e   : > { %v5620_v14 = vpop.eup %5619  ;;  %v3936_v12 = vadd.f32 %v5618_v25, %v5610_v15 }
 0x55f   : > { %v5622_v11 = vpop.eup %5621  ;;  %v3937_v21 = vadd.f32 %v5620_v14, %v5612_v38 }
 0x560   : > { %v5624_v26 = vpop.eup %5623  ;;  %v3938_v45 = vadd.f32 %v5622_v11, %v5614_v0  ;;  %v3940_v58 = vadd.f32 1.0, %v3936_v12 }
 0x561   : > { %v3939_v41 = vadd.f32 %v5624_v26, %v5616_v4  ;;  %v3941_v31 = vadd.f32 1.0, %v3937_v21  ;;  %v5626_v11 = vpop.eup %5625  ;;  %v3965_v21 = vld [vmem:[%s7674_s12] sm:$0x1] }
 0x562   : > { %v3942_v62 = vadd.f32 1.0, %v3938_v45  ;;  %v7608_v40 = vmul.f32 %v3940_v58, %v3932_v60  ;;  %v5628_v60 = vpop.eup %5627  ;;  %v1729_v58 = vadd.f32 1.0, %v5626_v11 }
 0x563   : > { %v3943_v54 = vadd.f32 1.0, %v3939_v41  ;;  %v7610_v3 = vmul.f32 %v3941_v31, %v3933_v2  ;;  %v5630_v26 = vpop.eup %5629  ;;  %v1730_v41 = vadd.f32 1.0, %v5628_v60 }
 0x564   : > { %v7613_v36 = vmul.f32 %v3942_v62, %v3934_v29  ;;  %v5632_v45 = vpop.eup %5631  ;;  %v1731_v29 = vadd.f32 1.0, %v5630_v26 }
 0x565   : > { %v3948_v10 = vadd.f32 %v7610_v3, %v7608_v40  ;;  %v7617_v16 = vmul.f32 %v3943_v54, %v3935_v32  ;;  %v1732_v62 = vadd.f32 1.0, %v5632_v45 }
 0x567   : > { %v3949_v24 = vadd.f32 %v3948_v10, %v7613_v36 }
 0x569   : > { %v3950_v8 = vadd.f32 %v3949_v24, %v7617_v16 }
 0x56b   : > { %3951 = vadd.xlane.f32.xlu0 %v3950_v8 }
 0x5f8   : > { %v3952_v39 = vpop.xlane.xlu0 %3951 }
 0x5f9   : > { %v3953_v43 = vmul.f32 0.00390625, %v3952_v39 }
 0x5fb   : > { %v3955_v22 = vmul.f32 %v3954_v46, %v3953_v43 }
 0x5fc   : > { %v4976_v30 = vpop.f32.mrb[20].mxu0 }
 0x5fd   : > { %v3957_v7 = vsel %vm7985_vm0, %v3955_v22, 0.0  ;;  %v5029_v28 = vmul.f32 %v7587_v1, %v4976_v30  ;;  %v4978_v63 = vpop.f32.mrb[21].mxu0 }
 0x5fe   : > { %v3958_v35 = vrot.slane %v3957_v7, 4  ;;  %v5030_v49 = vmul.f32 %v7587_v1, %v4978_v63  ;;  %v4980_v23 = vpop.f32.mrb[22].mxu0 }
 0x5ff   : > { %v5017_v19 = vpop.f32.mrb[20].mxu1  ;;  %v5037_v55 = vadd.f32 %v5035_v6, %v5029_v28  ;;  %v4981_v48 = vpop.f32.mrb[23].mxu0 }
 0x600   : > { %v3959_v5 = vadd.f32 %v3958_v35, %v3957_v7  ;;  %v5031_v18 = vmul.f32 %v7587_v1, %v5017_v19  ;;  %v5019_v9 = vpop.f32.mrb[21].mxu1  ;;  %v5038_v53 = vadd.f32 %v5035_v6, %v5030_v49  ;;  %v5061_v7 = vld [vmem:[%s5819_s24] sm:$0xff]  ;;  %v5062_v35 = vld [vmem:[%s5819_s24 + $0x8] sm:$0xff]  ;;  %v5063_v49 = vld [vmem:[%s5819_s24 + $0x10] sm:$0xff] }
 0x601   : > { %v5032_v56 = vmul.f32 %v7587_v1, %v5019_v9  ;;  %v5021_v17 = vpop.f32.mrb[22].mxu1  ;;  %v5041_v59 = vsub.f32 0.0, %v5037_v55 }
 0x602   : > { %v3960_v50 = vrot.slane %v3959_v5, 2  ;;  %v5039_v44 = vadd.f32 %v5035_v6, %v5031_v18  ;;  %v5022_v42 = vpop.f32.mrb[23].mxu1  ;;  %v5042_v20 = vsub.f32 0.0, %v5038_v53 }
 0x603   : > { %v5040_v37 = vadd.f32 %v5035_v6, %v5032_v56  ;;  %v5045_v15 = vmul.f32 1.442695, %v5041_v59 }
 0x604   : > { %v3961_v51 = vadd.f32 %v3960_v50, %v3959_v5  ;;  %v5043_v38 = vsub.f32 0.0, %v5039_v44  ;;  %v5047_v0 = vmul.f32 1.442695, %v5042_v20  ;;  %v5064_v5 = vld [vmem:[%s5819_s24 + $0x18] sm:$0xff]  ;;  %v5083_v44 = vld [vmem:[%s7675_s13] sm:$0xff] }
 0x605   : > { %v5044_v4 = vsub.f32 0.0, %v5040_v37  ;;  %5633 = vpow2.f32 %v5045_v15 }
 0x606   : > { %v5049_v25 = vmul.f32 1.442695, %v5043_v38  ;;  %v3962_v14 = vrot.slane %v3961_v51, 1  ;;  %5635 = vpow2.f32 %v5047_v0 }
 0x607   : > { %v5051_v12 = vmul.f32 1.442695, %v5044_v4 }
 0x608   : > { %5637 = vpow2.f32 %v5049_v25  ;;  %v3963_v1 = vadd.f32 %v3962_v14, %v3961_v51 }
 0x609   : > { %5639 = vpow2.f32 %v5051_v12  ;;  %v5093_v12 = vld [vmem:[%s7676_s14] sm:$0x1] }
 0x60a   : > { %v3964_v2 = vmax.f32 %v3963_v1, 0.0  ;;  %5641 = vrcp.f32 %v1729_v58 }
 0x60b   : > { %5643 = vrcp.f32 %v1730_v41 }
 0x60c   : > { %v3966_v31 = vmul.f32 %v3965_v21, %v3964_v2  ;;  %5645 = vrcp.f32 %v1731_v29 }
 0x60d   : > { %5647 = vrcp.f32 %v1732_v62 }
 0x60e   : > { %v3968_v54 = vsel %vm3967_vm11, %v3966_v31, 0.0 }
 0x60f   : > { %3969 = vadd.xlane.f32.xlu0 %v3968_v54  ;;  %v5634_v32 = vpop.eup %5633 }
 0x610   : > { %v5636_v10 = vpop.eup %5635  ;;  %v5053_v24 = vadd.f32 1.0, %v5634_v32 }
 0x611   : > { %v5054_v47 = vadd.f32 1.0, %v5636_v10 }
 0x612   : > { %v5638_v8 = vpop.eup %5637  ;;  %5649 = vrcp.f32 %v5053_v24 }
 0x613   : > { %v5640_v34 = vpop.eup %5639  ;;  %v5055_v61 = vadd.f32 1.0, %v5638_v8  ;;  %5651 = vrcp.f32 %v5054_v47  ;;  %v7987_v8 = vld [vmem:[#allocation7_spill] sm:$0xff] }
 0x614   : > { %v5056_v46 = vadd.f32 1.0, %v5640_v34  ;;  %v5642_v39 = vpop.eup %5641 }
 0x615   : > { %5653 = vrcp.f32 %v5055_v61  ;;  %v5644_v13 = vpop.eup %5643 }
 0x616   : > { %5655 = vrcp.f32 %v5056_v46  ;;  %v5646_v43 = vpop.eup %5645 }
 0x617   : > { %v5648_v33 = vpop.eup %5647 }
 0x61c   : > { %v5650_v52 = vpop.eup %5649 }
 0x61d   : > { %v5652_v22 = vpop.eup %5651  ;;  %v5065_v27 = vadd.f32 %v5650_v52, %v5642_v39 }
 0x61e   : > { %v5066_v30 = vadd.f32 %v5652_v22, %v5644_v13 }
 0x61f   : > { %v5654_v57 = vpop.eup %5653  ;;  %v5069_v63 = vadd.f32 1.0, %v5065_v27 }
 0x620   : > { %v5656_v6 = vpop.eup %5655  ;;  %v5067_v28 = vadd.f32 %v5654_v57, %v5646_v43  ;;  %v5070_v19 = vadd.f32 1.0, %v5066_v30 }
 0x621   : > { %v5068_v23 = vadd.f32 %v5656_v6, %v5648_v33  ;;  %v5073_v48 = vmul.f32 %v5069_v63, %v5061_v7 }
 0x622   : > { %v5071_v55 = vadd.f32 1.0, %v5067_v28  ;;  %v5074_v9 = vmul.f32 %v5070_v19, %v5062_v35 }
 0x623   : > { %v5072_v18 = vadd.f32 1.0, %v5068_v23 }
 0x624   : > { %v5075_v53 = vmul.f32 %v5071_v55, %v5063_v49  ;;  %v5077_v17 = vadd.f32 %v5074_v9, %v5073_v48 }
 0x625   : > { %v5076_v56 = vmul.f32 %v5072_v18, %v5064_v5 }
 0x626   : > { %v5078_v50 = vadd.f32 %v5077_v17, %v5075_v53 }
 0x628   : > { %v5079_v59 = vadd.f32 %v5078_v50, %v5076_v56 }
 0x62a   : > { %5080 = vadd.xlane.f32.xlu1 %v5079_v59 }
 0x69c   : > { %v3970_v21 = vpop.xlane.xlu0 %3969 }
 0x69d   : > { %v3971_v26 = vmax.f32 %v3970_v21, 0.0 }
 0x69f   : > { %v3972_v2 = vsub.f32 0.0, %v3971_v26 }
 0x6a1   : > { %v3973_v45 = vmul.f32 1.442695, %v3972_v2 }
 0x6a3   : > { %5657 = vpow2.f32 %v3973_v45 }
 0x6ad   : > { %v5658_v62 = vpop.eup %5657 }
 0x6ae   : > { %v3975_v54 = vadd.f32 1.0, %v5658_v62 }
 0x6b7   : > { %v5081_v42 = vpop.xlane.xlu1 %5080 }
 0x6b8   : > { %v5082_v20 = vmul.f32 0.00390625, %v5081_v42 }
 0x6ba   : > { %v5084_v37 = vmul.f32 %v5083_v44, %v5082_v20 }
 0x6bc   : > { %v5085_v51 = vsel %vm7986_vm12, %v5084_v37, 0.0 }
 0x6bd   : > { %v5086_v15 = vrot.slane %v5085_v51, 4 }
 0x6bf   : > { %v5087_v38 = vadd.f32 %v5086_v15, %v5085_v51 }
 0x6c1   : > { %v5088_v0 = vrot.slane %v5087_v38, 2 }
 0x6c3   : > { %v5089_v4 = vadd.f32 %v5088_v0, %v5087_v38 }
 0x6c5   : > { %v5090_v25 = vrot.slane %v5089_v4, 1 }
 0x6c7   : > { %v5091_v14 = vadd.f32 %v5090_v25, %v5089_v4 }
 0x6c9   : > { %v5092_v11 = vmax.f32 %v5091_v14, 0.0 }
 0x6cb   : > { %v5094_v1 = vmul.f32 %v5093_v12, %v5092_v11 }
 0x6cd   : > { %v5095_v60 = vsel %vm3967_vm11, %v5094_v1, 0.0 }
 0x6ce   : > { %5096 = vadd.xlane.f32.xlu0 %v5095_v60 }
 0x75b   : > { %v5097_v58 = vpop.xlane.xlu0 %5096 }
 0x75c   : > { %v5098_v41 = vmax.f32 %v5097_v58, 0.0 }
 0x75e   : > { %v5099_v31 = vsub.f32 0.0, %v5098_v41 }
 0x760   : > { %v5100_v29 = vmul.f32 1.442695, %v5099_v31 }
 0x762   : > { %5659 = vpow2.f32 %v5100_v29 }
 0x763   : > { %5661 = vrcp.f32 %v3975_v54 }
 0x76c   : > { %v5660_v32 = vpop.eup %5659 }
 0x76d   : > { %v5102_v10 = vadd.f32 1.0, %v5660_v32  ;;  %v5662_v24 = vpop.eup %5661 }
 0x76e   : > { %v3980_v47 = vrot.slane %v5662_v24, %v7987_v8 }
 0x76f   : > { %5663 = vrcp.f32 %v5102_v10 }
 0x770   : > { %v3981_v46 = vmul.f32 %v3980_v47, %v7608_v40  ;;  %v3982_v39 = vmul.f32 %v3980_v47, %v7610_v3  ;;  %v3983_v13 = vmul.f32 %v3980_v47, %v7613_v36  ;;  %v3984_v43 = vmul.f32 %v3980_v47, %v7617_v16 }
 0x779   : > { %v5664_v34 = vpop.eup %5663 }
 0x77a   : > { %v5107_v61 = vrot.slane %v5664_v34, %v7987_v8 }
 0x77c   : > { %v5108_v33 = vmul.f32 %v5107_v61, %v5073_v48  ;;  %v5109_v52 = vmul.f32 %v5107_v61, %v5074_v9  ;;  %v5110_v22 = vmul.f32 %v5107_v61, %v5075_v53  ;;  %v5111_v27 = vmul.f32 %v5107_v61, %v5076_v56 }
 0x77e   : > { %v5112_v57 = vadd.f32 %v5108_v33, %v3981_v46  ;;  %v5113_v7 = vadd.f32 %v5109_v52, %v3982_v39  ;;  %v5114_v30 = vadd.f32 %v5110_v22, %v3983_v13  ;;  %v5115_v6 = vadd.f32 %v5111_v27, %v3984_v43 }
 0x780   : > { %5116 = vst [vmem:[%s514_s16] sm:$0xff] %v5112_v57  ;;  %5117 = vst [vmem:[%s514_s16 + $0x8] sm:$0xff] %v5113_v7 }
 0x781   : > { %5118 = vst [vmem:[%s514_s16 + $0x10] sm:$0xff] %v5114_v30  ;;  %5119 = vst [vmem:[%s514_s16 + $0x18] sm:$0xff] %v5115_v6 }
 0x782 PF: > { %s25_s18 = sadd.s32 1, %s5679_s18  }
 0x783   : > { %p22_p4 = scmp.ge.s32.totalorder %s25_s18, 4  }
 0x785   :  { %24 = sbr.rel (!%p22_p4) target bundleno = 3 (0x3), region = 113 }

</bundles_post_ra>
